<compile_context>
chip_gen: v6e
topology: v6e:2x2x1
jax: 0.10.0
libtpu: 0.0.40
codegen_flags: <defaults>
</compile_context>

<pallas_src>
import jax
import jax.numpy as jnp
import numpy as np
from jax.experimental import pallas as pl
from jax.experimental.pallas import tpu as pltpu

DIM = 128          # rotary feature dim (lane-native)
THETA = 10000.0
_VMEM_LIMIT = 32 * 1024 * 1024   # safe on v5e/v6e (128 MiB phys) and v7x (64 MiB phys)


def init_inv_freq(dim, theta=THETA, theta_rescale_factor=1.0):
    """Deterministic init matching IntensityRotaryEncoding.__init__ (learned_freq=False)."""
    theta = theta * theta_rescale_factor ** (dim / (dim - 2))
    idx = jnp.arange(0, dim, 2)[: dim // 2].astype(jnp.float32)
    return 1.0 / theta ** (idx / dim)                      # (dim//2,)


def _round_up(x, m):
    return ((x + m - 1) // m) * m


def _default_tile(dtype):
    # Larger tiles for 16-bit q/k keep per-step DMA well above the ~0.35 us fixed
    # per-step cost on v7x; 1024 keeps f32 intermediates well inside 32 MiB VMEM.
    return 2048 if jnp.dtype(dtype).itemsize <= 2 else 1024


# ---------------- Fused kernel: freqs (in-register) + rotary(q) + rotary(k) ----------------
def _fused_rotary_kernel(t_ref, inv_ref, sign_ref, q_ref, k_ref, rq_ref, rk_ref):
    # t_ref    : (1, st) f32  per-row intensity (lane-dense, tiny DMA)
    # inv_ref  : (D, 1)  f32  pair-repeated inverse frequencies as a column (constant)
    # sign_ref : (1, D)  f32  -1 on even lanes, +1 on odd lanes (constant)
    # q/k/rq/rk: (st, D)
    f_t = inv_ref[...] * t_ref[...]              # (D, st) outer product via VPU broadcasts
    f = jnp.transpose(f_t)                       # (st, D) tile-aligned XLU transpose
    cos_f = jnp.cos(f)                           # f32 trig, shared by q and k
    sign = sign_ref[...]                         # (1, D): broadcasts implicitly below
    sin_signed = jnp.sin(f) * sign               # sign of the rotate_half partner term
    even = sign < 0.0                            # (1, D) bool, single vreg of mask state

    def _rotate(x_ref, o_ref):
        x = x_ref[...].astype(jnp.float32)       # (st, D)
        d = x.shape[-1]
        # rotate_half on interleaved pairs: partner[j] = x[j ^ 1]
        left = pltpu.roll(x, shift=d - 1, axis=1)    # left[j]  = x[(j+1) % d]
        right = pltpu.roll(x, shift=1, axis=1)       # right[j] = x[(j-1) % d]
        partner = jnp.where(even, left, right)       # implicit (1, D) mask broadcast
        o_ref[...] = (x * cos_f + partner * sin_signed).astype(o_ref.dtype)

    _rotate(q_ref, rq_ref)
    _rotate(k_ref, rk_ref)


def rotate_queries_and_keys(q, k, intensity, inv_rep, s_tile=None):
    """Mirrors IntensityRotaryEncoding.rotate_queries_and_keys (scale hard-coded 1.0).

    q, k      : (B, S, D) float dtype (bf16 recommended — halves HBM traffic)
    intensity : (B, S)
    inv_rep   : (D,) pair-repeated inverse-frequency parameter
    returns (rotated_q, rotated_k) in the dtypes of q / k.
    """
    B, S, D = q.shape
    assert k.shape == (B, S, D) and intensity.shape == (B, S)
    assert D % 2 == 0, "rotary feature dim must be even (interleaved pairs)"
    BS = B * S

    st = _default_tile(q.dtype) if s_tile is None else int(s_tile)
    assert st >= 128 and st % 128 == 0, "s_tile must be a positive multiple of 128"

    q2 = q.reshape(BS, D)                                  # layout-preserving (D minor)
    k2 = k.reshape(BS, D)
    t2 = intensity.astype(jnp.float32).reshape(1, BS)      # lane-dense, ~4*BS bytes

    rows = BS
    if BS <= st:
        # Single tile: pad the (small) arrays to a 128-aligned row count so the
        # in-kernel transpose stays tile-aligned.  Negligible copy (< one tile).
        rows = _round_up(BS, 128)
        st = rows
        if rows != BS:
            q2 = jnp.pad(q2, ((0, rows - BS), (0, 0)))
            k2 = jnp.pad(k2, ((0, rows - BS), (0, 0)))
            t2 = jnp.pad(t2, ((0, 0), (0, rows - BS)))
    # else: fixed st, cdiv grid; Pallas masks the partial tail block (no wrapper copy).

    inv_col = inv_rep.astype(jnp.float32).reshape(D, 1)    # freqs along sublanes
    sign_row = jnp.where(jnp.arange(D) % 2 == 0, -1.0, 1.0).astype(jnp.float32).reshape(1, D)

    nb = pl.cdiv(rows, st)
    rq2, rk2 = pl.pallas_call(
        _fused_rotary_kernel,
        out_shape=(jax.ShapeDtypeStruct((rows, D), q.dtype),
                   jax.ShapeDtypeStruct((rows, D), k.dtype)),
        grid_spec=pltpu.PrefetchScalarGridSpec(
            num_scalar_prefetch=0,
            grid=(nb,),
            in_specs=[pl.BlockSpec((1, st), lambda i: (0, i)),     # intensity (lane-dense)
                      pl.BlockSpec((D, 1), lambda i: (0, 0)),      # inv-freq column (const)
                      pl.BlockSpec((1, D), lambda i: (0, 0)),      # +-1 parity sign (const)
                      pl.BlockSpec((st, D), lambda i: (i, 0)),     # q tile
                      pl.BlockSpec((st, D), lambda i: (i, 0))],    # k tile
            out_specs=[pl.BlockSpec((st, D), lambda i: (i, 0)),
                       pl.BlockSpec((st, D), lambda i: (i, 0))]),
        compiler_params=pltpu.CompilerParams(
            dimension_semantics=("parallel",),
            vmem_limit_bytes=_VMEM_LIMIT),
    )(t2, inv_col, sign_row, q2, k2)

    if rows != BS:
        rq2 = rq2[:BS]
        rk2 = rk2[:BS]
    return rq2.reshape(B, S, D), rk2.reshape(B, S, D)


# ---------------- Standalone kernel: IntensityRotaryEncoding.forward (freqs output) ----------------
def _freqs_kernel(t_ref, inv_ref, o_ref):
    f_t = inv_ref[...] * t_ref[...]              # (D, st)
    o_ref[...] = jnp.transpose(f_t)              # (st, D) lane-dense output


def intensity_rotary_forward(t, inv_rep, s_tile=None):
    """t: (B, S) intensity; returns freqs (B, S, D) float32 (the module's forward())."""
    B, S = t.shape
    D = inv_rep.shape[0]
    BS = B * S
    st = 1024 if s_tile is None else int(s_tile)
    assert st >= 128 and st % 128 == 0

    t2 = t.astype(jnp.float32).reshape(1, BS)
    rows = BS
    if BS <= st:
        rows = _round_up(BS, 128)
        st = rows
        if rows != BS:
            t2 = jnp.pad(t2, ((0, 0), (0, rows - BS)))

    inv_col = inv_rep.astype(jnp.float32).reshape(D, 1)
    out = pl.pallas_call(
        _freqs_kernel,
        out_shape=jax.ShapeDtypeStruct((rows, D), jnp.float32),
        grid_spec=pltpu.PrefetchScalarGridSpec(
            num_scalar_prefetch=0,
            grid=(pl.cdiv(rows, st),),
            in_specs=[pl.BlockSpec((1, st), lambda i: (0, i)),
                      pl.BlockSpec((D, 1), lambda i: (0, 0))],
            out_specs=pl.BlockSpec((st, D), lambda i: (i, 0))),
        compiler_params=pltpu.CompilerParams(
            dimension_semantics=("parallel",),
            vmem_limit_bytes=_VMEM_LIMIT),
    )(t2, inv_col)
    if rows != BS:
        out = out[:BS]
    return out.reshape(B, S, D)


# ---------------- Plain-JAX reference (mirrors the PyTorch code) ----------------
def _rotate_half_ref(x):
    x4 = x.reshape(*x.shape[:-1], x.shape[-1] // 2, 2)
    x1, x2 = x4[..., 0], x4[..., 1]
    return jnp.stack((-x2, x1), axis=-1).reshape(x.shape)


def _forward_ref(t, inv_half):
    f = t.astype(jnp.float32)[..., None] * inv_half         # einsum('..., f -> ... f')
    return jnp.repeat(f, 2, axis=-1)                        # '... n -> ... (n r)', r=2


def _apply_ref(freqs, x):
    return x * jnp.cos(freqs) + _rotate_half_ref(x) * jnp.sin(freqs)


if __name__ == "__main__":
    B, S, D = 2, 64, DIM            # B*S = 128 -> one lane/sublane-aligned tile
    key = jax.random.PRNGKey(0)
    k1, k2, k3 = jax.random.split(key, 3)
    intensity = jax.random.uniform(k1, (B, S), jnp.float32) * 10.0   # "intensity" scalars
    q = jax.random.normal(k2, (B, S, D), jnp.float32)
    k = jax.random.normal(k3, (B, S, D), jnp.float32)

    inv_half = init_inv_freq(D)               # the nn.Parameter, shape (D//2,)
    inv_rep = jnp.repeat(inv_half, 2)         # pair-repeat folded into the constant (D,)

    # fused rotary application (freqs stays in-register, q & k share cos/sin)
    rq, rk = rotate_queries_and_keys(q, k, intensity, inv_rep)
    # standalone forward() for API parity with the module (freqs as explicit output)
    freqs = intensity_rotary_forward(intensity, inv_rep)
    jax.block_until_ready((rq, rk, freqs))

    # correctness vs. pure-JAX reference of the PyTorch semantics
    freqs_ref = _forward_ref(intensity, inv_half)
    rq_ref = _apply_ref(freqs_ref, q)
    rk_ref = _apply_ref(freqs_ref, k)
    assert np.allclose(np.asarray(freqs), np.asarray(freqs_ref), rtol=1e-5, atol=1e-5)
    assert np.allclose(np.asarray(rq), np.asarray(rq_ref), rtol=1e-4, atol=1e-4)
    assert np.allclose(np.asarray(rk), np.asarray(rk_ref), rtol=1e-4, atol=1e-4)

    # bf16 inputs: trig stays f32 in-kernel, outputs written in bf16 (half the HBM bytes)
    rq_b, rk_b = rotate_queries_and_keys(q.astype(jnp.bfloat16),
                                         k.astype(jnp.bfloat16),
                                         intensity, inv_rep)
    jax.block_until_ready((rq_b, rk_b))
    assert rq_b.dtype == jnp.bfloat16 and rk_b.dtype == jnp.bfloat16
    assert np.allclose(np.asarray(rq_b, dtype=np.float32), np.asarray(rq_ref),
                       rtol=2e-2, atol=6e-2)
    assert np.allclose(np.asarray(rk_b, dtype=np.float32), np.asarray(rk_ref),
                       rtol=2e-2, atol=6e-2)

    # unaligned B*S (wrapper pads the small single tile, then slices back)
    Bo, So = 2, 10
    io = jax.random.uniform(k1, (Bo, So), jnp.float32) * 10.0
    qo = jax.random.normal(k2, (Bo, So, D), jnp.float32)
    ko = jax.random.normal(k3, (Bo, So, D), jnp.float32)
    rqo, rko = rotate_queries_and_keys(qo, ko, io, inv_rep)
    fo_ref = _forward_ref(io, inv_half)
    assert np.allclose(np.asarray(rqo), np.asarray(_apply_ref(fo_ref, qo)), rtol=1e-4, atol=1e-4)
    assert np.allclose(np.asarray(rko), np.asarray(_apply_ref(fo_ref, ko)), rtol=1e-4, atol=1e-4)

    # multi-tile + Pallas-masked partial tail (fixed tile, cdiv grid)
    Bm, Sm = 2, 320                 # B*S = 640, s_tile=256 -> 3 blocks, partial tail
    im = jax.random.uniform(k1, (Bm, Sm), jnp.float32) * 10.0
    qm = jax.random.normal(k2, (Bm, Sm, D), jnp.float32)
    km = jax.random.normal(k3, (Bm, Sm, D), jnp.float32)
    rqm, rkm = rotate_queries_and_keys(qm, km, im, inv_rep, s_tile=256)
    fm_ref = _forward_ref(im, inv_half)
    assert np.allclose(np.asarray(rqm), np.asarray(_apply_ref(fm_ref, qm)), rtol=1e-4, atol=1e-4)
    assert np.allclose(np.asarray(rkm), np.asarray(_apply_ref(fm_ref, km)), rtol=1e-4, atol=1e-4)

    print("KERNEL_OK")
</pallas_src>

<mosaic_0001>
module attributes {stable_mosaic.version = 11 : i64} {
  func.func @_fused_rotary_kernel(%arg0: i32, %arg1: memref<1x128xf32, #tpu.memory_space<vmem>>, %arg2: memref<128x1xf32, #tpu.memory_space<vmem>>, %arg3: memref<1x128xf32, #tpu.memory_space<vmem>>, %arg4: memref<128x128xf32, #tpu.memory_space<vmem>>, %arg5: memref<128x128xf32, #tpu.memory_space<vmem>>, %arg6: memref<128x128xf32, #tpu.memory_space<vmem>>, %arg7: memref<128x128xf32, #tpu.memory_space<vmem>>) attributes {dimension_semantics = [#tpu.dimension_semantics<parallel>], iteration_bounds = array<i64: 1>, scalar_prefetch = 0 : i64, scratch_operands = 0 : i64, tpu.core_type = #tpu.core_type<tc>, window_params = [{transform_indices = @transform_0, window_bounds = array<i64: 1, 128>}, {pipeline_mode = #tpu.pipeline_mode<synchronous>, transform_indices = @transform_1, window_bounds = array<i64: 128, 1>}, {pipeline_mode = #tpu.pipeline_mode<synchronous>, transform_indices = @transform_2, window_bounds = array<i64: 1, 128>}, {transform_indices = @transform_3, window_bounds = array<i64: 128, 128>}, {transform_indices = @transform_4, window_bounds = array<i64: 128, 128>}, {transform_indices = @transform_5, window_bounds = array<i64: 128, 128>}, {transform_indices = @transform_6, window_bounds = array<i64: 128, 128>}]} {
    %c0 = arith.constant 0 : index
    %c0_0 = arith.constant 0 : index
    %0 = vector.load %arg2[%c0, %c0_0] : memref<128x1xf32, #tpu.memory_space<vmem>>, vector<128x1xf32>
    %c0_1 = arith.constant 0 : index
    %c0_2 = arith.constant 0 : index
    %1 = vector.load %arg1[%c0_1, %c0_2] : memref<1x128xf32, #tpu.memory_space<vmem>>, vector<1x128xf32>
    %2 = vector.broadcast %0 : vector<128x1xf32> to vector<128x128xf32>
    %3 = vector.broadcast %1 : vector<1x128xf32> to vector<128x128xf32>
    %4 = arith.mulf %2, %3 : vector<128x128xf32>
    %5 = tpu.transpose %4, [1, 0] : vector<128x128xf32> -> vector<128x128xf32>
    %6 = math.cos %5 : vector<128x128xf32>
    %c0_3 = arith.constant 0 : index
    %c0_4 = arith.constant 0 : index
    %7 = vector.load %arg3[%c0_3, %c0_4] : memref<1x128xf32, #tpu.memory_space<vmem>>, vector<1x128xf32>
    %8 = math.sin %5 : vector<128x128xf32>
    %9 = vector.broadcast %7 : vector<1x128xf32> to vector<128x128xf32>
    %10 = arith.mulf %8, %9 : vector<128x128xf32>
    %cst = arith.constant 0.000000e+00 : f32
    %11 = vector.broadcast %cst : f32 to vector<1x128xf32>
    %12 = arith.cmpf olt, %7, %11 : vector<1x128xf32>
    %c0_5 = arith.constant 0 : index
    %c0_6 = arith.constant 0 : index
    %13 = vector.load %arg4[%c0_5, %c0_6] : memref<128x128xf32, #tpu.memory_space<vmem>>, vector<128x128xf32>
    %c127_i32 = arith.constant 127 : i32
    %14 = tpu.dynamic_rotate %13 by %c127_i32 dim 1 : vector<128x128xf32>, i32 -> vector<128x128xf32>
    %c1_i32 = arith.constant 1 : i32
    %15 = tpu.dynamic_rotate %13 by %c1_i32 dim 1 : vector<128x128xf32>, i32 -> vector<128x128xf32>
    %16 = vector.shape_cast %12 : vector<1x128xi1> to vector<1x128xi1>
    %17 = vector.broadcast %16 : vector<1x128xi1> to vector<128x128xi1>
    %18 = arith.select %17, %14, %15 : vector<128x128xi1>, vector<128x128xf32>
    %19 = arith.mulf %13, %6 : vector<128x128xf32>
    %20 = arith.mulf %18, %10 : vector<128x128xf32>
    %21 = arith.addf %19, %20 : vector<128x128xf32>
    %c0_7 = arith.constant 0 : index
    %c0_8 = arith.constant 0 : index
    %22 = vector.load %arg6[%c0_7, %c0_8] : memref<128x128xf32, #tpu.memory_space<vmem>>, vector<128x128xf32>
    tpu.vector_store %arg6[%c0_7, %c0_8], %21 {strides = array<i32>} : memref<128x128xf32, #tpu.memory_space<vmem>>, vector<128x128xf32>,
    %c0_9 = arith.constant 0 : index
    %c0_10 = arith.constant 0 : index
    %23 = vector.load %arg5[%c0_9, %c0_10] : memref<128x128xf32, #tpu.memory_space<vmem>>, vector<128x128xf32>
    %c127_i32_11 = arith.constant 127 : i32
    %24 = tpu.dynamic_rotate %23 by %c127_i32_11 dim 1 : vector<128x128xf32>, i32 -> vector<128x128xf32>
    %c1_i32_12 = arith.constant 1 : i32
    %25 = tpu.dynamic_rotate %23 by %c1_i32_12 dim 1 : vector<128x128xf32>, i32 -> vector<128x128xf32>
    %26 = vector.shape_cast %12 : vector<1x128xi1> to vector<1x128xi1>
    %27 = vector.broadcast %26 : vector<1x128xi1> to vector<128x128xi1>
    %28 = arith.select %27, %24, %25 : vector<128x128xi1>, vector<128x128xf32>
    %29 = arith.mulf %23, %6 : vector<128x128xf32>
    %30 = arith.mulf %28, %10 : vector<128x128xf32>
    %31 = arith.addf %29, %30 : vector<128x128xf32>
    %c0_13 = arith.constant 0 : index
    %c0_14 = arith.constant 0 : index
    %32 = vector.load %arg7[%c0_13, %c0_14] : memref<128x128xf32, #tpu.memory_space<vmem>>, vector<128x128xf32>
    tpu.vector_store %arg7[%c0_13, %c0_14], %31 {strides = array<i32>} : memref<128x128xf32, #tpu.memory_space<vmem>>, vector<128x128xf32>,
    return
  }
  func.func @transform_0(%arg0: i32) -> (i32, i32) {
    %c0_i32 = arith.constant 0 : i32
    %c0_i32_0 = arith.constant 0 : i32
    return %c0_i32, %arg0 : i32, i32
  }
  func.func @transform_1(%arg0: i32) -> (i32, i32) {
    %c0_i32 = arith.constant 0 : i32
    %c0_i32_0 = arith.constant 0 : i32
    %c0_i32_1 = arith.constant 0 : i32
    return %c0_i32, %c0_i32_0 : i32, i32
  }
  func.func @transform_2(%arg0: i32) -> (i32, i32) {
    %c0_i32 = arith.constant 0 : i32
    %c0_i32_0 = arith.constant 0 : i32
    %c0_i32_1 = arith.constant 0 : i32
    return %c0_i32, %c0_i32_0 : i32, i32
  }
  func.func @transform_3(%arg0: i32) -> (i32, i32) {
    %c0_i32 = arith.constant 0 : i32
    %c0_i32_0 = arith.constant 0 : i32
    return %arg0, %c0_i32 : i32, i32
  }
  func.func @transform_4(%arg0: i32) -> (i32, i32) {
    %c0_i32 = arith.constant 0 : i32
    %c0_i32_0 = arith.constant 0 : i32
    return %arg0, %c0_i32 : i32, i32
  }
  func.func @transform_5(%arg0: i32) -> (i32, i32) {
    %c0_i32 = arith.constant 0 : i32
    %c0_i32_0 = arith.constant 0 : i32
    return %arg0, %c0_i32 : i32, i32
  }
  func.func @transform_6(%arg0: i32) -> (i32, i32) {
    %c0_i32 = arith.constant 0 : i32
    %c0_i32_0 = arith.constant 0 : i32
    return %arg0, %c0_i32 : i32, i32
  }
}

</mosaic_0001>

<bundles_post_ra>
// kernel: tpu_custom_call.1
= control target key start
LH: loop header
LB: loop body
LE: loop exit
PB: predicated region body
PF: predicated region fallthrough
CT: control target
= control target key end

     0   :  { %12 = vsyncpa [#allocation3], 0  ;;  %s6350_s0 = inlined_call_operand.vmem [shape: f32[1,128], index: 0, kind: input, shape index: {}]   ;;  %s6351_s1 = inlined_call_operand.vmem [shape: f32[128,1], index: 1, kind: input, shape index: {}]   ;;  %s6352_s2 = inlined_call_operand.vmem [shape: f32[1,128], index: 2, kind: input, shape index: {}]   ;;  %s6353_s3 = inlined_call_operand.vmem [shape: f32[128,128], index: 3, kind: input, shape index: {}]   ;;  %s6354_s4 = inlined_call_operand.hbm [shape: f32[128,128], index: 4, kind: input, shape index: {}]   ;;  %s6355_s5 = inlined_call_operand.hbm [shape: f32[128,128], index: 5, kind: output, shape index: {0}]   ;;  %s6356_s6 = inlined_call_operand.hbm [shape: f32[128,128], index: 6, kind: output, shape index: {1}]  }
   0x1   :  { %13 = vsyncpa [#allocation4], 0 }
   0x2   :  { %14 = vsyncpa [#allocation7], 0  ;;  %s4255_s21 = smov [#allocation2]  }
   0x3   :  { %s28_s22 = sshll.u32 %s4255_s21, 4  ;;  %s29_s22 = int_to_ptr.vmem [resolvable:$true] %s28_s22 }
   0x4   :  { %s4197_s23 = scalar_lea.vmem %s29_s22, 2048  ;;  %p4202_p1 = scmp.lt.s32.totalorder %s29_s22, %s29_s22 }
   0x5   :  { %p4198_p0 = scmp.ne.s32.totalorder %s29_s22, %s4197_s23  ;;  %p4203_p2 = scmp.lt.s32.totalorder %s4197_s23, %s4197_s23 }
   0x7   :  { %p4204_p3 = por %p4203_p2, %p4202_p1 }
   0x9   :  { %p4205_p4 = pnand %p4204_p3, %p4198_p0 }
   0xb   :  { %4208 = shalt.err (!%p4205_p4)
}
   0xc   :  { %s4256_s24 = smov 128   ;;  %s4257_s25 = smov 8  }
   0xd   :  { %34 = dma.hbm_to_vmem [thread:$0]  %s6354_s4, 2048, %s29_s22, [#allocation3], %s4256_s24, %s4256_s24, %s4257_s25  }
   0xe   :  { %4249 = dma.done.wait [#allocation3], 2048  }
   0xf   :  { %4250 = vsyncadd [#allocation3], 4294965248  ;;  %v4258_v0 = vmov 0   ;;  %v40_v1 = vld [vmem:[%s6351_s1 + $0x10] sm:$0xff]  ;;  %v38_v2 = vld [vmem:[%s6351_s1] sm:$0xff]  ;;  %s4259_s16 = smov 127  }
  0x10   :  { %4092 = vset.pattern.permute.xlu1 %v4258_v0  ;;  %4091 = vset.pattern.permute.xlu0 %v4258_v0  ;;  %v41_v3 = vld [vmem:[%s6351_s1 + $0x18] sm:$0xff]  ;;  %v39_v4 = vld [vmem:[%s6351_s1 + $0x8] sm:$0xff]  ;;  %v42_v6 = vld [vmem:[%s6351_s1 + $0x20] sm:$0xff]  ;;  %s4260_s17 = smov 1   ;;  %s4267_s29 = smov [#allocation5]  }
  0x11   :  { %67 = vperm.xlu1 %4092, %v40_v1   ;;  %57 = vperm.xlu0 %4091, %v38_v2   ;;  %v43_v5 = vld [vmem:[%s6351_s1 + $0x28] sm:$0xff]  ;;  %v45_v7 = vld [vmem:[%s6351_s1 + $0x38] sm:$0xff]  ;;  %v44_v8 = vld [vmem:[%s6351_s1 + $0x30] sm:$0xff]  ;;  %s3856_s30 = sshll.u32 %s4267_s29, 4  ;;  %s4268_s9 = smov [#allocation6]   ;;  %s3857_s30 = int_to_ptr.vmem [resolvable:$true] %s3856_s30 }
  0x12   :  { %v47_v9 = vld [vmem:[%s6351_s1 + $0x48] sm:$0xff]  ;;  %v46_v10 = vld [vmem:[%s6351_s1 + $0x40] sm:$0xff]  ;;  %v49_v11 = vld [vmem:[%s6351_s1 + $0x58] sm:$0xff]  ;;  %s3868_s4 = sshll.u32 %s4268_s9, 4  ;;  %s4209_s10 = scalar_lea.vmem %s3857_s30, 2048  ;;  %s3869_s4 = int_to_ptr.vmem [resolvable:$true] %s3868_s4 }
  0x13   :  { %v48_v12 = vld [vmem:[%s6351_s1 + $0x50] sm:$0xff]  ;;  %v51_v13 = vld [vmem:[%s6351_s1 + $0x68] sm:$0xff]  ;;  %v50_v14 = vld [vmem:[%s6351_s1 + $0x60] sm:$0xff]  ;;  %p4210_p5 = scmp.ne.s32.totalorder %s3857_s30, %s4209_s10  ;;  %p4214_p6 = scmp.lt.s32.totalorder %s3857_s30, %s3857_s30 }
  0x14   :  { %v53_v15 = vld [vmem:[%s6351_s1 + $0x78] sm:$0xff]  ;;  %v52_v16 = vld [vmem:[%s6351_s1 + $0x70] sm:$0xff]  ;;  %v3525_v17 = vld [vmem:[%s6353_s3] sm:$0xff]  ;;  %p4215_p7 = scmp.lt.s32.totalorder %s4209_s10, %s4209_s10 }
  0x15   :  { %72 = vperm.xlu1 %4092, %v41_v3   ;;  %62 = vperm.xlu0 %4091, %v39_v4   ;;  %v3532_v18 = vld [vmem:[%s6353_s3 + $0x38] sm:$0xff]  ;;  %v3526_v19 = vld [vmem:[%s6353_s3 + $0x8] sm:$0xff]  ;;  %v4371_v20 = vld [vmem:[#allocation2 + $0x10] sm:$0xff]  ;;  %v3503_v4 = vlaneseq }
  0x16   :  { %v3527_v21 = vld [vmem:[%s6353_s3 + $0x10] sm:$0xff]  ;;  %v4379_v22 = vld [vmem:[#allocation2 + $0x20] sm:$0xff]  ;;  %v3528_v23 = vld [vmem:[%s6353_s3 + $0x18] sm:$0xff]  ;;  %p4216_p8 = por %p4215_p7, %p4214_p6 }
  0x17   :  { %v3529_v24 = vld [vmem:[%s6353_s3 + $0x20] sm:$0xff]  ;;  %v3530_v25 = vld [vmem:[%s6353_s3 + $0x28] sm:$0xff]  ;;  %v3531_v26 = vld [vmem:[%s6353_s3 + $0x30] sm:$0xff] }
  0x18   :  { %v3533_v27 = vld [vmem:[%s6353_s3 + $0x40] sm:$0xff]  ;;  %v3534_v28 = vld [vmem:[%s6353_s3 + $0x48] sm:$0xff]  ;;  %v3535_v29 = vld [vmem:[%s6353_s3 + $0x50] sm:$0xff]  ;;  %p4217_p9 = pnand %p4216_p8, %p4210_p5 }
  0x19   :  { %82 = vperm.xlu1 %4092, %v43_v5   ;;  %77 = vperm.xlu0 %4091, %v42_v6   ;;  %v3536_v30 = vld [vmem:[%s6353_s3 + $0x58] sm:$0xff]  ;;  %v3537_v31 = vld [vmem:[%s6353_s3 + $0x60] sm:$0xff]  ;;  %v3538_v32 = vld [vmem:[%s6353_s3 + $0x68] sm:$0xff] }
  0x1a   :  { %v3539_v33 = vld [vmem:[%s6353_s3 + $0x70] sm:$0xff]  ;;  %v3540_v34 = vld [vmem:[%s6353_s3 + $0x78] sm:$0xff]  ;;  %v4443_v35 = vld [vmem:[%s6350_s0] ss:$0 sm:$0xff] }
  0x1b   :  { %v4461_v57 = vld [vmem:[#allocation2] sm:$0xff]  ;;  %v3692_v60 = vld [vmem:[#allocation2 + $0x8] sm:$0xff]  ;;  %v3694_v1 = vld [vmem:[#allocation2 + $0x18] sm:$0xff] }
  0x1c   :  { %v3696_v5 = vld [vmem:[#allocation2 + $0x28] sm:$0xff] }
  0x1d   :  { %92 = vperm.xlu1 %4092, %v45_v7   ;;  %87 = vperm.xlu0 %4091, %v44_v8   ;;  %v4481_v7 = vld [vmem:[%s6352_s2] sm:$0x1] }
  0x1e   :  { %vm3524_vm0 = vcmp.lt.f32.partialorder %v4481_v7, 0.0 }
  0x21   :  { %102 = vperm.xlu1 %4092, %v47_v9   ;;  %97 = vperm.xlu0 %4091, %v46_v10   ;;  %v4485_v9 = vshrl.u32 %v3503_v4, 7 }
  0x25   :  { %112 = vperm.xlu1 %4092, %v49_v11   ;;  %107 = vperm.xlu0 %4091, %v48_v12   ;;  %v3698_v11 = vld [vmem:[#allocation2 + $0x38] sm:$0xff] }
  0x29   :  { %122 = vperm.xlu1 %4092, %v51_v13   ;;  %117 = vperm.xlu0 %4091, %v50_v14   ;;  %v3505_v14 = vsub.s32 0, %v4485_v9 }
  0x2d   :  { %132 = vperm.xlu1 %4092, %v53_v15   ;;  %127 = vperm.xlu0 %4091, %v52_v16   ;;  %v3700_v15 = vld [vmem:[#allocation2 + $0x48] sm:$0xff]  ;;  %v3605_v16 = vsel %vm3524_vm0, 1, %v4258_v0 }
  0x31   :  { %3541 = vrot.lane.b32.xlu1 %v3525_v17, %s4259_s16  ;;  %3587 = vrot.lane.b32.xlu0 %v3532_v18, %s4260_s17 }
  0x35   :  { %3543 = vrot.lane.b32.xlu1 %v3526_v19, %s4259_s16  ;;  %3711 = vrot.lane.b32.xlu0 %v4371_v20, %s4259_s16 }
  0x39   :  { %3545 = vrot.lane.b32.xlu1 %v3527_v21, %s4259_s16  ;;  %3715 = vrot.lane.b32.xlu0 %v4379_v22, %s4259_s16 }
  0x3d   :  { %3547 = vrot.lane.b32.xlu1 %v3528_v23, %s4259_s16 }
  0x41   :  { %3549 = vrot.lane.b32.xlu1 %v3529_v24, %s4259_s16 }
  0x45   :  { %3551 = vrot.lane.b32.xlu1 %v3530_v25, %s4259_s16 }
  0x49   :  { %3553 = vrot.lane.b32.xlu1 %v3531_v26, %s4259_s16 }
  0x4d   :  { %3555 = vrot.lane.b32.xlu1 %v3532_v18, %s4259_s16 }
  0x51   :  { %3557 = vrot.lane.b32.xlu1 %v3533_v27, %s4259_s16 }
  0x55   :  { %3559 = vrot.lane.b32.xlu1 %v3534_v28, %s4259_s16 }
  0x59   :  { %3561 = vrot.lane.b32.xlu1 %v3535_v29, %s4259_s16 }
  0x5d   :  { %3563 = vrot.lane.b32.xlu1 %v3536_v30, %s4259_s16 }
  0x61   :  { %3565 = vrot.lane.b32.xlu1 %v3537_v31, %s4259_s16 }
  0x65   :  { %3567 = vrot.lane.b32.xlu1 %v3538_v32, %s4259_s16 }
  0x69   :  { %3569 = vrot.lane.b32.xlu1 %v3539_v33, %s4259_s16 }
  0x6d   :  { %3571 = vrot.lane.b32.xlu1 %v3540_v34, %s4259_s16 }
  0x71   :  { %3573 = vrot.lane.b32.xlu1 %v3525_v17, %s4260_s17 }
  0x75   :  { %3575 = vrot.lane.b32.xlu1 %v3526_v19, %s4260_s17  ;;  %v4496_v19 = vrot.slane %v3605_v16, %v3505_v14 }
  0x77   :  { %vm3610_vm1 = vcmp.eq.s32.totalorder %v4496_v19, 1 }
  0x79   :  { %3577 = vrot.lane.b32.xlu1 %v3527_v21, %s4260_s17 }
  0x7d   :  { %3579 = vrot.lane.b32.xlu1 %v3528_v23, %s4260_s17  ;;  %v3702_v23 = vld [vmem:[#allocation2 + $0x58] sm:$0xff] }
  0x81   :  { %3581 = vrot.lane.b32.xlu1 %v3529_v24, %s4260_s17 }
  0x85   :  { %3583 = vrot.lane.b32.xlu1 %v3530_v25, %s4260_s17 }
  0x89   :  { %3585 = vrot.lane.b32.xlu1 %v3531_v26, %s4260_s17  ;;  %v3704_v26 = vld [vmem:[#allocation2 + $0x68] sm:$0xff] }
  0x8c   :  { %v68_v36 = vpop.permute.xlu1 %67  ;;  %v58_v37 = vpop.permute.xlu0 %57 }
  0x8d   :  { %v141_v38 = vmul.f32 %v4443_v35, %v58_v37  ;;  %3589 = vrot.lane.b32.xlu1 %v3533_v27, %s4260_s17  ;;  %v143_v42 = vmul.f32 %v4443_v35, %v68_v36 }
  0x8f   :  { %157 = vxpose.xlu0.b32.start [1/16] %v141_v38, 128 }
  0x90   :  { %v73_v39 = vpop.permute.xlu1 %72  ;;  %v63_v40 = vpop.permute.xlu0 %62 }
  0x91   :  { %v142_v41 = vmul.f32 %v4443_v35, %v63_v40  ;;  %3591 = vrot.lane.b32.xlu1 %v3534_v28, %s4260_s17  ;;  %v144_v45 = vmul.f32 %v4443_v35, %v73_v39 }
  0x93   :  { %158 = vxpose.xlu0.b32.cont [2/16] %v142_v41, 128 }
  0x94   :  { %v83_v43 = vpop.permute.xlu1 %82  ;;  %v78_v46 = vpop.permute.xlu0 %77 }
  0x95   :  { %3593 = vrot.lane.b32.xlu1 %v3535_v29, %s4260_s17  ;;  %v145_v48 = vmul.f32 %v4443_v35, %v78_v46  ;;  %v146_v50 = vmul.f32 %v4443_v35, %v83_v43  ;;  %v3697_v43 = vld [vmem:[#allocation2 + $0x30] sm:$0xff]  ;;  %v3699_v46 = vld [vmem:[#allocation2 + $0x40] sm:$0xff] }
  0x97   :  { %159 = vxpose.xlu0.b32.cont [3/16] %v143_v42, 128 }
  0x98   :  { %v93_v44 = vpop.permute.xlu1 %92  ;;  %v88_v51 = vpop.permute.xlu0 %87 }
  0x99   :  { %3595 = vrot.lane.b32.xlu1 %v3536_v30, %s4260_s17  ;;  %v147_v53 = vmul.f32 %v4443_v35, %v88_v51  ;;  %v148_v55 = vmul.f32 %v4443_v35, %v93_v44  ;;  %v3706_v30 = vld [vmem:[#allocation2 + $0x78] sm:$0xff] }
  0x9b   :  { %160 = vxpose.xlu0.b32.cont [4/16] %v144_v45, 128 }
  0x9c   :  { %v103_v47 = vpop.permute.xlu1 %102  ;;  %v98_v56 = vpop.permute.xlu0 %97 }
  0x9d   :  { %3597 = vrot.lane.b32.xlu1 %v3537_v31, %s4260_s17  ;;  %v149_v59 = vmul.f32 %v4443_v35, %v98_v56  ;;  %v150_v62 = vmul.f32 %v4443_v35, %v103_v47  ;;  %v4566_v56 = vld [vmem:[#allocation2 + $0x70] sm:$0xff] }
  0x9f   :  { %161 = vxpose.xlu0.b32.cont [5/16] %v145_v48, 128 }
  0xa0   :  { %v113_v49 = vpop.permute.xlu1 %112  ;;  %v108_v63 = vpop.permute.xlu0 %107 }
  0xa1   :  { %3599 = vrot.lane.b32.xlu1 %v3538_v32, %s4260_s17  ;;  %v151_v3 = vmul.f32 %v4443_v35, %v108_v63  ;;  %v152_v8 = vmul.f32 %v4443_v35, %v113_v49  ;;  %v4548_v49 = vld [vmem:[#allocation2 + $0x50] sm:$0xff] }
  0xa3   :  { %162 = vxpose.xlu0.b32.cont [6/16] %v146_v50, 128 }
  0xa4   :  { %v123_v52 = vpop.permute.xlu1 %122  ;;  %v118_v10 = vpop.permute.xlu0 %117 }
  0xa5   :  { %3601 = vrot.lane.b32.xlu1 %v3539_v33, %s4260_s17  ;;  %v153_v13 = vmul.f32 %v4443_v35, %v118_v10  ;;  %v154_v18 = vmul.f32 %v4443_v35, %v123_v52  ;;  %v4556_v52 = vld [vmem:[#allocation2 + $0x60] sm:$0xff] }
  0xa7   :  { %163 = vxpose.xlu0.b32.cont [7/16] %v147_v53, 128 }
  0xa8   :  { %v133_v54 = vpop.permute.xlu1 %132  ;;  %v128_v21 = vpop.permute.xlu0 %127 }
  0xa9   :  { %3603 = vrot.lane.b32.xlu1 %v3540_v34, %s4260_s17  ;;  %v155_v25 = vmul.f32 %v4443_v35, %v128_v21  ;;  %v156_v28 = vmul.f32 %v4443_v35, %v133_v54 }
  0xab   :  { %164 = vxpose.xlu0.b32.cont [8/16] %v148_v55, 128 }
  0xac   :  { %v4463_v58 = vpop.permute.xlu1 %3541  ;;  %v3588_v0 = vpop.permute.xlu0 %3587 }
  0xad   :  { %3707 = vrot.lane.b32.xlu1 %v4461_v57, %s4259_s16 }
  0xaf   :  { %165 = vxpose.xlu0.b32.cont [9/16] %v149_v59, 128 }
  0xb0   :  { %v4468_v61 = vpop.permute.xlu1 %3543  ;;  %v4560_v54 = vpop.permute.xlu0 %3711 }
  0xb1   :  { %3709 = vrot.lane.b32.xlu1 %v3692_v60, %s4259_s16  ;;  %6450 = vst [vmem:[#allocation17_spill] sm:$0xff] %v4560_v54 }
  0xb3   :  { %166 = vxpose.xlu0.b32.cont [10/16] %v150_v62, 128 }
  0xb4   :  { %v4472_v2 = vpop.permute.xlu1 %3545 }
  0xb5   :  { %3713 = vrot.lane.b32.xlu1 %v3694_v1, %s4259_s16 }
  0xb7   :  { %167 = vxpose.xlu0.b32.cont [11/16] %v151_v3, 128 }
  0xb8   :  { %v4476_v6 = vpop.permute.xlu1 %3547 }
  0xb9   :  { %3717 = vrot.lane.b32.xlu1 %v3696_v5, %s4259_s16 }
  0xbb   :  { %168 = vxpose.xlu0.b32.cont [12/16] %v152_v8, 128 }
  0xbc   :  { %v3550_v12 = vpop.permute.xlu1 %3549 }
  0xbd   :  { %3721 = vrot.lane.b32.xlu1 %v3698_v11, %s4259_s16 }
  0xbf   :  { %169 = vxpose.xlu0.b32.cont [13/16] %v153_v13, 128 }
  0xc0   :  { %v3552_v17 = vpop.permute.xlu1 %3551 }
  0xc1   :  { %3725 = vrot.lane.b32.xlu1 %v3700_v15, %s4259_s16 }
  0xc3   :  { %170 = vxpose.xlu0.b32.cont [14/16] %v154_v18, 128 }
  0xc4   :  { %v3554_v24 = vpop.permute.xlu1 %3553 }
  0xc5   :  { %3729 = vrot.lane.b32.xlu1 %v3702_v23, %s4259_s16 }
  0xc7   :  { %171 = vxpose.xlu0.b32.cont [15/16] %v155_v25, 128 }
  0xc8   :  { %v3556_v27 = vpop.permute.xlu1 %3555 }
  0xc9   :  { %v4504_v29 = vsel %vm3610_vm1, %v3556_v27, %v3588_v0  ;;  %3733 = vrot.lane.b32.xlu1 %v3704_v26, %s4259_s16 }
  0xca   :  { %6444 = vst [vmem:[#allocation11_spill] sm:$0xff] %v4504_v29 }
  0xcb   :  { %172 = vxpose.xlu0.b32.end [16/16] %v156_v28, 128 }
  0xcc   :  { %v3558_v31 = vpop.permute.xlu1 %3557 }
  0xcd   :  { %3737 = vrot.lane.b32.xlu1 %v3706_v30, %s4259_s16 }
  0xd0   :  { %v3560_v32 = vpop.permute.xlu1 %3559 }
  0xd1   :  { %3741 = vrot.lane.b32.xlu1 %v3692_v60, %s4260_s17  ;;  %v4574_v60 = vpop.permute.xlu0 %3715 }
  0xd2   :  { %6453 = vst [vmem:[#allocation20_spill] sm:$0xff] %v4574_v60 }
  0xd4   :  { %v3562_v33 = vpop.permute.xlu1 %3561 }
  0xd5   :  { %3745 = vrot.lane.b32.xlu1 %v3694_v1, %s4260_s17 }
  0xd8   :  { %v4510_v34 = vpop.permute.xlu1 %3563 }
  0xd9   :  { %3749 = vrot.lane.b32.xlu1 %v3696_v5, %s4260_s17 }
  0xdc   :  { %v4513_v35 = vpop.permute.xlu1 %3565 }
  0xdd   :  { %6445 = vst [vmem:[#allocation12_spill] sm:$0xff] %v4513_v35  ;;  %3753 = vrot.lane.b32.xlu1 %v3698_v11, %s4260_s17 }
  0xe0   :  { %v4516_v36 = vpop.permute.xlu1 %3567 }
  0xe1   :  { %3757 = vrot.lane.b32.xlu1 %v3700_v15, %s4260_s17 }
  0xe4   :  { %v4519_v37 = vpop.permute.xlu1 %3569 }
  0xe5   :  { %6446 = vst [vmem:[#allocation13_spill] sm:$0xff] %v4519_v37  ;;  %3761 = vrot.lane.b32.xlu1 %v3702_v23, %s4260_s17 }
  0xe8   :  { %v4522_v38 = vpop.permute.xlu1 %3571 }
  0xe9   :  { %3765 = vrot.lane.b32.xlu1 %v3704_v26, %s4260_s17 }
  0xec   :  { %v3574_v39 = vpop.permute.xlu1 %3573 }
  0xed   :  { %v4528_v40 = vsel %vm3610_vm1, %v4463_v58, %v3574_v39  ;;  %3769 = vrot.lane.b32.xlu1 %v3706_v30, %s4260_s17  ;;  %v6362_v39 = vmov 2475754826  }
  0xee   :  { %6447 = vst [vmem:[#allocation14_spill] sm:$0xff] %v4528_v40 }
  0xf0   :  { %v3576_v41 = vpop.permute.xlu1 %3575 }
  0xf1   :  { %v4534_v42 = vsel %vm3610_vm1, %v4468_v61, %v3576_v41 }
  0xf4   :  { %v3578_v44 = vpop.permute.xlu1 %3577  ;;  %3719 = vrot.lane.b32.xlu0 %v3697_v43, %s4259_s16 }
  0xf5   :  { %v4540_v45 = vsel %vm3610_vm1, %v4472_v2, %v3578_v44  ;;  %v6366_v44 = vmov 2131351028  }
  0xf6   :  { %6448 = vst [vmem:[#allocation15_spill] sm:$0xff] %v4540_v45 }
  0xf8   :  { %v3580_v47 = vpop.permute.xlu1 %3579  ;;  %3723 = vrot.lane.b32.xlu0 %v3699_v46, %s4259_s16 }
  0xf9   :  { %v4546_v48 = vsel %vm3610_vm1, %v4476_v6, %v3580_v47  ;;  %v6358_v47 = vmov 2102212464  }
  0xfc   :  { %v3582_v50 = vpop.permute.xlu1 %3581  ;;  %3727 = vrot.lane.b32.xlu0 %v4548_v49, %s4259_s16 }
  0xfd   :  { %v4554_v51 = vsel %vm3610_vm1, %v3550_v12, %v3582_v50 }
  0xfe   :  { %6449 = vst [vmem:[#allocation16_spill] sm:$0xff] %v4554_v51 }
 0x100   :  { %v3584_v53 = vpop.permute.xlu1 %3583  ;;  %3731 = vrot.lane.b32.xlu0 %v4556_v52, %s4259_s16 }
 0x101   :  { %v4564_v55 = vsel %vm3610_vm1, %v3552_v17, %v3584_v53  ;;  %v6364_v53 = vmov 920167782  }
 0x102   :  { %6451 = vst [vmem:[#allocation18_spill] sm:$0xff] %v4564_v55 }
 0x104   :  { %v3586_v58 = vpop.permute.xlu1 %3585  ;;  %3735 = vrot.lane.b32.xlu0 %v4566_v56, %s4259_s16 }
 0x105   :  { %v4572_v59 = vsel %vm3610_vm1, %v3554_v24, %v3586_v58 }
 0x106   :  { %6452 = vst [vmem:[#allocation19_spill] sm:$0xff] %v4572_v59 }
 0x108   :  { %v3590_v61 = vpop.permute.xlu1 %3589  ;;  %3739 = vrot.lane.b32.xlu0 %v4461_v57, %s4260_s17 }
 0x109   :  { %v4580_v62 = vsel %vm3610_vm1, %v3558_v31, %v3590_v61 }
 0x10a   :  { %6454 = vst [vmem:[#allocation21_spill] sm:$0xff] %v4580_v62 }
 0x10b   :  { %v4582_v63 = vpop.trf.xlu0 }
 0x10c   :  { %6455 = vst [vmem:[#allocation22_spill] sm:$0xff] %v4582_v63  ;;  %v6369_v1 = vand.u32 2147483647, %v4582_v63  ;;  %v192_v2 = vand.u32 2139095040, %v4582_v63  ;;  %v3592_v3 = vpop.permute.xlu1 %3591  ;;  %3743 = vrot.lane.b32.xlu0 %v4371_v20, %s4260_s17 }
 0x10d   :  { %v4590_v4 = vsel %vm3610_vm1, %v3560_v32, %v3592_v3  ;;  %v6370_v32 = vmov 683565275  }
 0x10e   :  { %6456 = vst [vmem:[#allocation23_spill] sm:$0xff] %v4590_v4  ;;  %v193_v5 = vshrl.u32 %v192_v2, 23  ;;  %v196_v57 = vand.u32 8388607, %v6369_v1 }
 0x10f   :  { %v4594_v6 = vpop.trf.xlu0 }
 0x110   :  { %v3885_v8 = vadd.s32 4294967169, %v193_v5  ;;  %v6368_v10 = vand.u32 2147483647, %v4594_v6  ;;  %v3594_v11 = vpop.permute.xlu1 %3593  ;;  %3747 = vrot.lane.b32.xlu0 %v4379_v22, %s4260_s17  ;;  %v295_v12 = vand.u32 2139095040, %v4594_v6  ;;  %v197_v15 = vor.u32 8388608, %v196_v57 }
 0x111   :  { %v4602_v20 = vsel %vm3610_vm1, %v3562_v33, %v3594_v11  ;;  %v6360_v57 = vmov 1326507024   ;;  %v6464_v9 = vand.u32 2147483647, %v4594_v6 }
 0x112   :  { %6457 = vst [vmem:[#allocation24_spill] sm:$0xff] %v4602_v20  ;;  %v199_v13 = vadd.s32 1, %v3885_v8  ;;  %v296_v16 = vshrl.u32 %v295_v12, 23  ;;  %v4606_v17 = vand.u32 8388607, %v6368_v10  ;;  %v4617_v27 = vshll.u32 %v197_v15, 8 }
 0x113   :  { %v4608_v18 = vpop.trf.xlu0 }
 0x114   :  { %6458 = vst [vmem:[#allocation25_spill] sm:$0xff] %v4608_v18  ;;  %vm200_vm2 = vcmp.gt.s32.totalorder %v199_v13, 0  ;;  %v3596_v21 = vpop.permute.xlu1 %3595  ;;  %3751 = vrot.lane.b32.xlu0 %v3697_v43, %s4260_s17  ;;  %v3889_v23 = vadd.s32 4294967169, %v296_v16  ;;  %v398_v24 = vand.u32 2139095040, %v4608_v18  ;;  %v300_v28 = vor.u32 8388608, %v4606_v17 }
 0x115   :  { %v201_v22 = vsel %vm200_vm2, %v199_v13, 0  ;;  %v4615_v25 = vsel %vm3610_vm1, %v4510_v34, %v3596_v21 }
 0x116   :  { %6459 = vst [vmem:[#allocation26_spill] sm:$0xff] %v4615_v25  ;;  %v202_v0 = vshrl.u32 %v201_v22, 5  ;;  %v203_v26 = vand.u32 31, %v201_v22  ;;  %v302_v30 = vadd.s32 1, %v3889_v23  ;;  %v399_v43 = vshrl.u32 %v398_v24, 23 }
 0x118   :  { %v204_v31 = vsub.s32 32, %v203_v26  ;;  %v206_v33 = vshll.u32 %v6370_v32, %v203_v26  ;;  %v209_v41 = vshll.u32 %v6362_v39, %v203_v26  ;;  %3755 = vrot.lane.b32.xlu0 %v3699_v46, %s4260_s17  ;;  %v212_v34 = vshll.u32 %v6366_v44, %v203_v26 }
 0x119   :  { %v215_v50 = vshll.u32 %v6358_v47, %v203_v26  ;;  %v218_v58 = vshll.u32 %v6364_v53, %v203_v26  ;;  %vm221_vm3 = vcmp.lt.s32.totalorder %v202_v0, 1  ;;  %vm222_vm4 = vcmp.lt.s32.totalorder %v202_v0, 2 }
 0x11a   :  { %v207_v61 = vshrl.u32 %v6362_v39, %v204_v31  ;;  %v210_v2 = vshrl.u32 %v6366_v44, %v204_v31  ;;  %v213_v3 = vshrl.u32 %v6358_v47, %v204_v31  ;;  %v205_v5 = vshrl.u32 %v6370_v32, %v204_v31 }
 0x11b   :  { %v216_v46 = vshrl.u32 %v6364_v53, %v204_v31  ;;  %v219_v8 = vshrl.u32 %v6360_v57, %v204_v31  ;;  %vm223_vm5 = vcmp.lt.s32.totalorder %v202_v0, 3  ;;  %vm303_vm6 = vcmp.gt.s32.totalorder %v302_v30, 0 }
 0x11c   :  { %v208_v11 = vor.u32 %v207_v61, %v206_v33  ;;  %v211_v12 = vor.u32 %v210_v2, %v209_v41  ;;  %v214_v13 = vor.u32 %v213_v3, %v212_v34  ;;  %3759 = vrot.lane.b32.xlu0 %v4548_v49, %s4260_s17  ;;  %vm224_vm7 = vcmp.lt.s32.totalorder %v202_v0, 4 }
 0x11d   :  { %v217_v15 = vor.u32 %v216_v46, %v215_v50  ;;  %v220_v16 = vor.u32 %v219_v8, %v218_v58  ;;  %v304_v17 = vsel %vm303_vm6, %v302_v30, 0  ;;  %vm191_vm6 = vcmp.lt.s32.totalorder %v4582_v63, 0 }
 0x11e   :  { %v225_v21 = vsel %vm221_vm3, %v205_v5, %v208_v11  ;;  %v226_v22 = vsel %vm224_vm7, %v214_v13, 2102212464  ;;  %v229_v23 = vsel %vm221_vm3, %v208_v11, %v211_v12  ;;  %v233_v24 = vsel %vm221_vm3, %v211_v12, %v214_v13 }
 0x11f   :  { %v227_v26 = vsel %vm223_vm5, %v211_v12, %v226_v22  ;;  %v230_v31 = vsel %vm224_vm7, %v217_v15, 920167782  ;;  %v234_v33 = vsel %vm224_vm7, %v220_v16, 1326507024  ;;  %v305_v41 = vshrl.u32 %v304_v17, 5 }
 0x120   :  { %v228_v34 = vsel %vm222_vm4, %v225_v21, %v227_v26  ;;  %v231_v49 = vsel %vm223_vm5, %v214_v13, %v230_v31  ;;  %v235_v50 = vsel %vm223_vm5, %v217_v15, %v234_v33  ;;  %v306_v58 = vand.u32 31, %v304_v17  ;;  %3763 = vrot.lane.b32.xlu0 %v4556_v52, %s4260_s17 }
 0x121   :  { %v232_v30 = vsel %vm222_vm4, %v229_v23, %v231_v49  ;;  %v236_v61 = vsel %vm222_vm4, %v233_v24, %v235_v50  ;;  %v244_v8 = vmul.u32 %v4617_v27, %v228_v34  ;;  %v340_v12 = vshll.u32 %v300_v28, 8 }
 0x122   :  { %v4646_v2 = vmul.u32.u64.low %v4617_v27, %v236_v61  ;;  %v4647_v3 = vmul.u32.u64.high %v4617_v27, %v236_v61, %v4646_v2  ;;  %v4650_v5 = vmul.u32.u64.low %v4617_v27, %v232_v30  ;;  %v4651_v46 = vmul.u32.u64.high %v4617_v27, %v232_v30, %v4650_v5 }
 0x123   :  { %v307_v11 = vsub.s32 32, %v306_v58  ;;  %v3893_v13 = vadd.s32 4294967169, %v399_v43  ;;  %v309_v52 = vshll.u32 %v6370_v32, %v306_v58  ;;  %v312_v15 = vshll.u32 %v6362_v39, %v306_v58 }
 0x124   :  { %v315_v0 = vshll.u32 %v6366_v44, %v306_v58  ;;  %vm324_vm8 = vcmp.lt.s32.totalorder %v305_v41, 1  ;;  %3767 = vrot.lane.b32.xlu0 %v4566_v56, %s4260_s17  ;;  %v318_v27 = vshll.u32 %v6358_v47, %v306_v58  ;;  %vm246_vm9 = vc.u32 %v4647_v3, %v4650_v5 }
 0x125   :  { %v310_v16 = vshrl.u32 %v6362_v39, %v307_v11  ;;  %v313_v17 = vshrl.u32 %v6366_v44, %v307_v11  ;;  %v316_v21 = vshrl.u32 %v6358_v47, %v307_v11  ;;  %v247_v28 = vadd.s32 1, %v4651_v46 }
 0x126   :  { %v319_v43 = vshrl.u32 %v6364_v53, %v307_v11  ;;  %v321_v22 = vshll.u32 %v6364_v53, %v306_v58  ;;  %v322_v26 = vshrl.u32 %v6360_v57, %v307_v11  ;;  %vm325_vm10 = vcmp.lt.s32.totalorder %v305_v41, 2 }
 0x127   :  { %v311_v23 = vor.u32 %v310_v16, %v309_v52  ;;  %v314_v24 = vor.u32 %v313_v17, %v312_v15  ;;  %v317_v56 = vor.u32 %v316_v21, %v315_v0  ;;  %v248_v31 = vsel %vm246_vm9, %v247_v28, %v4651_v46 }
 0x128   :  { %v320_v33 = vor.u32 %v319_v43, %v318_v27  ;;  %vm327_vm11 = vcmp.lt.s32.totalorder %v305_v41, 4  ;;  %v249_v34 = vadd.s32 %v248_v31, %v244_v8  ;;  %v308_v49 = vshrl.u32 %v6370_v32, %v307_v11 }
 0x129   :  { %v323_v50 = vor.u32 %v322_v26, %v321_v22  ;;  %v329_v30 = vsel %vm327_vm11, %v317_v56, 2102212464  ;;  %vm326_vm12 = vcmp.lt.s32.totalorder %v305_v41, 3  ;;  %v332_v61 = vsel %vm324_vm8, %v311_v23, %v314_v24 }
 0x12a   :  { %v333_v2 = vsel %vm327_vm11, %v320_v33, 920167782  ;;  %v336_v58 = vsel %vm324_vm8, %v314_v24, %v317_v56  ;;  %v250_v52 = vadd.s32 536870912, %v249_v34  ;;  %v328_v15 = vsel %vm324_vm8, %v308_v49, %v311_v23 }
 0x12b   :  { %v334_v0 = vsel %vm326_vm12, %v317_v56, %v333_v2  ;;  %v337_v16 = vsel %vm327_vm11, %v323_v50, 1326507024  ;;  %v330_v46 = vsel %vm326_vm12, %v314_v24, %v329_v30  ;;  %v405_v8 = vadd.s32 1, %v3893_v13 }
 0x12c   :  { %v335_v17 = vsel %vm325_vm10, %v332_v61, %v334_v0  ;;  %v338_v21 = vsel %vm326_vm12, %v320_v33, %v337_v16  ;;  %v4676_v27 = vshrl.u32 %v250_v52, 30  ;;  %v331_v24 = vsel %vm325_vm10, %v328_v15, %v330_v46 }
 0x12d   :  { %v339_v11 = vsel %vm325_vm10, %v336_v58, %v338_v21  ;;  %v4679_v28 = vmul.u32.u64.low %v340_v12, %v335_v17  ;;  %v4680_v43 = vmul.u32.u64.high %v340_v12, %v335_v17, %v4679_v28  ;;  %vm406_vm13 = vcmp.gt.s32.totalorder %v405_v8, 0 }
 0x12e   :  { %v4683_v22 = vmul.u32.u64.low %v340_v12, %v339_v11  ;;  %v4684_v26 = vmul.u32.u64.high %v340_v12, %v339_v11, %v4683_v22  ;;  %v252_v23 = vshll.u32 %v4676_v27, 30  ;;  %v6357_v56 = vand.u32 2147483647, %v4608_v18 }
 0x12f   :  { %v407_v31 = vsel %vm406_vm13, %v405_v8, 0  ;;  %v350_v49 = vadd.s32 1, %v4680_v43  ;;  %v347_v50 = vmul.u32 %v340_v12, %v331_v24  ;;  %vm4771_vm10 = vcmp.le.f32.partialorder %v6464_v9, 0.7853982 }
 0x130   :  { %v409_v13 = vand.u32 31, %v407_v31  ;;  %v4689_v33 = vsub.s32 %v249_v34, %v252_v23  ;;  %vm349_vm14 = vc.u32 %v4684_v26, %v4679_v28  ;;  %v402_v41 = vand.u32 8388607, %v6357_v56 }
 0x131   :  { %v351_v2 = vsel %vm349_vm14, %v350_v49, %v4680_v43  ;;  %v408_v22 = vshrl.u32 %v407_v31, 5  ;;  %vm294_vm11 = vcmp.lt.s32.totalorder %v4594_v6, 0 }
 0x132   :  { %v410_v30 = vsub.s32 32, %v409_v13  ;;  %v255_v61 = vsub.s32 0, %v4689_v33  ;;  %v352_v58 = vadd.s32 %v351_v2, %v347_v50  ;;  %v403_v16 = vor.u32 8388608, %v402_v41 }
 0x133   :  { %v412_v21 = vshll.u32 %v6370_v32, %v409_v13  ;;  %v415_v8 = vshll.u32 %v6362_v39, %v409_v13  ;;  %v421_v23 = vshll.u32 %v6358_v47, %v409_v13  ;;  %v418_v2 = vshll.u32 %v6366_v44, %v409_v13 }
 0x134   :  { %v3886_v52 = vmin.u32 %v255_v61, %v4689_v33  ;;  %v353_v15 = vadd.s32 536870912, %v352_v58  ;;  %v413_v34 = vshrl.u32 %v6362_v39, %v410_v30  ;;  %v416_v0 = vshrl.u32 %v6366_v44, %v410_v30 }
 0x135   :  { %v422_v46 = vshrl.u32 %v6364_v53, %v410_v30  ;;  %v419_v11 = vshrl.u32 %v6358_v47, %v410_v30  ;;  %v425_v24 = vshrl.u32 %v6360_v57, %v410_v30  ;;  %vm427_vm0 = vcmp.lt.s32.totalorder %v408_v22, 1 }
 0x136   :  { %v257_v12 = vclz %v3886_v52  ;;  %v4702_v17 = vshrl.u32 %v353_v15, 30  ;;  %v414_v50 = vor.u32 %v413_v34, %v412_v21  ;;  %v417_v61 = vor.u32 %v416_v0, %v415_v8  ;;  %v4712_v15 = vpop.trf.xlu0 }
 0x137   :  { %v423_v41 = vor.u32 %v422_v46, %v421_v23  ;;  %v424_v52 = vshll.u32 %v6364_v53, %v409_v13  ;;  %v420_v47 = vor.u32 %v419_v11, %v418_v2  ;;  %v443_v34 = vshll.u32 %v403_v16, 8 }
 0x138   :  { %v3887_v43 = vadd.s32 4294967294, %v257_v12  ;;  %v355_v49 = vshll.u32 %v4702_v17, 30  ;;  %v245_v12 = vadd.s32 %v4650_v5, %v4647_v3  ;;  %vm430_vm2 = vcmp.lt.s32.totalorder %v408_v22, 4 }
 0x139   :  { %v426_v39 = vor.u32 %v425_v24, %v424_v52  ;;  %v435_v46 = vsel %vm427_vm0, %v414_v50, %v417_v61  ;;  %v501_v13 = vand.u32 2139095040, %v4712_v15  ;;  %vm428_vm3 = vcmp.lt.s32.totalorder %v408_v22, 2 }
 0x13a   :  { %vm3888_vm15 = vcmp.lt.s32.totalorder %v3887_v43, 0  ;;  %v4716_v56 = vsub.s32 %v352_v58, %v355_v49  ;;  %vm429_vm4 = vcmp.lt.s32.totalorder %v408_v22, 3  ;;  %v436_v8 = vsel %vm430_vm2, %v423_v41, 920167782 }
 0x13b   :  { %v260_v31 = vsel %vm3888_vm15, 0, %v3887_v43  ;;  %v432_v5 = vsel %vm430_vm2, %v420_v47, 2102212464  ;;  %v437_v58 = vsel %vm429_vm4, %v420_v47, %v436_v8  ;;  %v439_v11 = vsel %vm427_vm0, %v417_v61, %v420_v47 }
 0x13c   :  { %v265_v57 = vsub.s32 4294967266, %v260_v31  ;;  %v358_v0 = vsub.s32 0, %v4716_v56  ;;  %v261_v43 = vsub.s32 32, %v260_v31  ;;  %v411_v16 = vshrl.u32 %v6370_v32, %v410_v30 }
 0x13d   :  { %v438_v23 = vsel %vm428_vm3, %v435_v46, %v437_v58  ;;  %v440_v24 = vsel %vm430_vm2, %v426_v39, 1326507024  ;;  %v502_v30 = vshrl.u32 %v501_v13, 23  ;;  %v275_v39 = vsub.s32 4, %v4676_v27 }
 0x13e   :  { %v266_v21 = vadd.s32 127, %v265_v57  ;;  %v3890_v3 = vmin.u32 %v358_v0, %v4716_v56  ;;  %v441_v2 = vsel %vm429_vm4, %v423_v41, %v440_v24  ;;  %v431_v44 = vsel %vm427_vm0, %v411_v16, %v414_v50 }
 0x13f   :  { %v4725_v52 = vmul.u32.u64.low %v443_v34, %v438_v23  ;;  %v4726_v53 = vmul.u32.u64.high %v443_v34, %v438_v23, %v4725_v52  ;;  %v433_v0 = vsel %vm429_vm4, %v417_v61, %v432_v5  ;;  %v442_v8 = vsel %vm428_vm3, %v439_v11, %v441_v2  ;;  %v4763_v2 = vpop.trf.xlu0 }
 0x140   :  { %v360_v49 = vclz %v3890_v3  ;;  %v267_v57 = vshll.u32 %v266_v21, 23  ;;  %v4731_v47 = vmul.u32.u64.low %v443_v34, %v442_v8  ;;  %v4732_v1 = vmul.u32.u64.high %v443_v34, %v442_v8, %v4731_v47  ;;  %6463 = vst [vmem:[#allocation27_spill] sm:$0xff] %v4763_v2 }
 0x141   :  { %v263_v32 = vshrl.u32 %v245_v12, %v261_v43  ;;  %v434_v41 = vsel %vm428_vm3, %v431_v44, %v433_v0  ;;  %v453_v46 = vadd.s32 1, %v4726_v53  ;;  %v3897_v3 = vadd.s32 4294967169, %v502_v30 }
 0x142   :  { %v3891_v10 = vadd.s32 4294967294, %v360_v49  ;;  %v262_v21 = vshll.u32 %v4689_v33, %v260_v31  ;;  %v268_v50 = vor.u32 4788187, %v267_v57  ;;  %v6372_v13 = vand.u32 2147483647, %v4712_v15 }
 0x143   :  { %v450_v58 = vmul.u32 %v443_v34, %v434_v41  ;;  %vm452_vm7 = vc.u32 %v4732_v1, %v4725_v52  ;;  %v508_v44 = vadd.s32 1, %v3897_v3  ;;  %v276_v22 = vsel %vm191_vm6, %v275_v39, %v4676_v27 }
 0x144   :  { %vm3892_vm5 = vcmp.lt.s32.totalorder %v3891_v10, 0  ;;  %v264_v12 = vor.u32 %v263_v32, %v262_v21  ;;  %v454_v33 = vsel %vm452_vm7, %v453_v46, %v4726_v53  ;;  %v378_v31 = vsub.s32 4, %v4702_v17 }
 0x145   :  { %v4738_v61 = vsel %vm3892_vm5, 0, %v3891_v10  ;;  %v269_v10 = vand.u32 2147483647, %v268_v50  ;;  %v455_v11 = vadd.s32 %v454_v33, %v450_v58  ;;  %vm509_vm8 = vcmp.gt.s32.totalorder %v508_v44, 0 }
 0x146   :  { %v368_v5 = vsub.s32 4294967266, %v4738_v61  ;;  %v4753_v32 = vrot.slane %v4481_v7, %v3505_v14  ;;  %v505_v43 = vand.u32 8388607, %v6372_v13  ;;  %v510_v16 = vsel %vm509_vm8, %v508_v44, 0 }
 0x147   :  { %v6460_v23 = vand.u32 2147483647, %v4582_v63  ;;  %v271_v53 = vcvt.s32.f32 %v264_v12  ;;  %v456_v24 = vadd.s32 536870912, %v455_v11  ;;  %v512_v49 = vand.u32 31, %v510_v16 }
 0x148   :  { %v369_v34 = vadd.s32 127, %v368_v5  ;;  %v348_v57 = vadd.s32 %v4679_v28, %v4684_v26  ;;  %v379_v8 = vsel %vm294_vm11, %v378_v31, %v4702_v17  ;;  %v364_v39 = vsub.s32 32, %v4738_v61 }
 0x149   :  { %vm4759_vm9 = vcmp.le.f32.partialorder %v6460_v23, 0.7853982  ;;  %v4778_v0 = vmul.f32 %v271_v53, %v269_v10  ;;  %v4783_v47 = vshrl.u32 %v456_v24, 30  ;;  %v513_v30 = vsub.s32 32, %v512_v49 }
 0x14a   :  { %v4767_v7 = vsel %vm4759_vm9, 0, %v276_v22  ;;  %v370_v41 = vshll.u32 %v369_v34, 23  ;;  %v506_v46 = vor.u32 8388608, %v505_v43  ;;  %v604_v3 = vand.u32 2139095040, %v4763_v2 }
 0x14b   :  { %v458_v21 = vshll.u32 %v4783_v47, 30  ;;  %v511_v50 = vshrl.u32 %v510_v16, 5  ;;  %v6467_v5 = vmov 683565275   ;;  %v6468_v26 = vmov 2475754826  }
 0x14c   :  { %v515_v28 = vshll.u32 %v6467_v5, %v512_v49  ;;  %v516_v12 = vshrl.u32 %v6468_v26, %v513_v30  ;;  %v518_v58 = vshll.u32 %v6468_v26, %v512_v49  ;;  %v6469_v44 = vmov 2131351028  }
 0x14d   :  { %v519_v17 = vshrl.u32 %v6469_v44, %v513_v30  ;;  %v6470_v22 = vmov 2102212464   ;;  %v6471_v10 = vmov 920167782   ;;  %v4794_v23 = vsub.s32 %v455_v11, %v458_v21 }
 0x14e   :  { %v522_v33 = vshrl.u32 %v6470_v22, %v513_v30  ;;  %v525_v31 = vshrl.u32 %v6471_v10, %v513_v30  ;;  %v521_v34 = vshll.u32 %v6469_v44, %v512_v49  ;;  %v524_v43 = vshll.u32 %v6470_v22, %v512_v49 }
 0x14f   :  { %v6472_v53 = vmov 1326507024   ;;  %v4801_v24 = vsel %vm4771_vm10, 0, %v379_v8  ;;  %v517_v9 = vor.u32 %v516_v12, %v515_v28  ;;  %v520_v13 = vor.u32 %v519_v17, %v518_v58 }
 0x150   :  { %v528_v16 = vshrl.u32 %v6472_v53, %v513_v30  ;;  %v527_v37 = vshll.u32 %v6471_v10, %v512_v49  ;;  %v365_v35 = vshll.u32 %v4716_v56, %v4738_v61  ;;  %v461_v11 = vsub.s32 0, %v4794_v23 }
 0x151   :  { %v523_v21 = vor.u32 %v522_v33, %v521_v34  ;;  %v526_v20 = vor.u32 %v525_v31, %v524_v43  ;;  %v273_v62 = vxor.u32 2147483648, %v4778_v0  ;;  %v366_v59 = vshrl.u32 %v348_v57, %v364_v39 }
 0x152   :  { %v529_v51 = vor.u32 %v528_v16, %v527_v37  ;;  %v546_v60 = vshll.u32 %v506_v46, 8  ;;  %v371_v45 = vor.u32 4788187, %v370_v41  ;;  %v3894_v8 = vmin.u32 %v461_v11, %v4794_v23 }
 0x153   :  { %vm530_vm12 = vcmp.lt.s32.totalorder %v511_v50, 1  ;;  %v605_v28 = vshrl.u32 %v604_v3, 23  ;;  %v514_v12 = vshrl.u32 %v6467_v5, %v513_v30  ;;  %vm531_vm13 = vcmp.lt.s32.totalorder %v511_v50, 2 }
 0x154   :  { %vm533_vm14 = vcmp.lt.s32.totalorder %v511_v50, 4  ;;  %v538_v49 = vsel %vm530_vm12, %v517_v9, %v520_v13  ;;  %v463_v56 = vclz %v3894_v8  ;;  %vm532_vm15 = vcmp.lt.s32.totalorder %v511_v50, 3 }
 0x155   :  { %v535_v61 = vsel %vm533_vm14, %v523_v21, 2102212464  ;;  %v539_v58 = vsel %vm533_vm14, %v526_v20, 920167782  ;;  %v534_v17 = vsel %vm530_vm12, %v514_v12, %v517_v9  ;;  %v542_v31 = vsel %vm530_vm12, %v520_v13, %v523_v21 }
 0x156   :  { %v540_v33 = vsel %vm532_vm15, %v523_v21, %v539_v58  ;;  %v543_v57 = vsel %vm533_vm14, %v529_v51, 1326507024  ;;  %v3895_v37 = vadd.s32 4294967294, %v463_v56  ;;  %v536_v39 = vsel %vm532_vm15, %v520_v13, %v535_v61 }
 0x157   :  { %v541_v41 = vsel %vm531_vm13, %v538_v49, %v540_v33  ;;  %v544_v46 = vsel %vm532_vm15, %v526_v20, %v543_v57  ;;  %v367_v34 = vor.u32 %v366_v59, %v365_v35  ;;  %vm397_vm0 = vcmp.lt.s32.totalorder %v4608_v18, 0 }
 0x158   :  { %v545_v3 = vsel %vm531_vm13, %v542_v31, %v544_v46  ;;  %v4812_v30 = vmul.u32.u64.low %v546_v60, %v541_v41  ;;  %v4813_v43 = vmul.u32.u64.high %v546_v60, %v541_v41, %v4812_v30  ;;  %vm3896_vm2 = vcmp.lt.s32.totalorder %v3895_v37, 0 }
 0x159   :  { %v4817_v16 = vmul.u32.u64.low %v546_v60, %v545_v3  ;;  %v4818_v9 = vmul.u32.u64.high %v546_v60, %v545_v3, %v4817_v16  ;;  %v3901_v11 = vadd.s32 4294967169, %v605_v28  ;;  %v1931_v51 = vadd.s32 3, %v4767_v7 }
 0x15a   :  { %v372_v13 = vand.u32 2147483647, %v371_v45  ;;  %v466_v21 = vsel %vm3896_vm2, 0, %v3895_v37  ;;  %v537_v20 = vsel %vm531_vm13, %v534_v17, %v536_v39  ;;  %v6373_v8 = vand.u32 2147483647, %v4763_v2 }
 0x15b   :  { %v467_v35 = vsub.s32 32, %v466_v21  ;;  %v471_v59 = vsub.s32 4294967266, %v466_v21  ;;  %v611_v12 = vadd.s32 1, %v3901_v11  ;;  %v374_v49 = vcvt.s32.f32 %v367_v34  ;;  %v4850_v34 = vpop.trf.xlu0 }
 0x15c   :  { %v2035_v56 = vadd.s32 3, %v4801_v24  ;;  %v451_v61 = vadd.s32 %v4725_v52, %v4732_v1  ;;  %v556_v58 = vadd.s32 1, %v4813_v43  ;;  %v274_v45 = vsel %vm191_vm6, %v273_v62, %v4778_v0 }
 0x15d   :  { %v472_v28 = vadd.s32 127, %v471_v59  ;;  %v553_v50 = vmul.u32 %v546_v60, %v537_v20  ;;  %vm555_vm3 = vc.u32 %v4818_v9, %v4812_v30  ;;  %v375_v17 = vmul.f32 %v374_v49, %v372_v13 }
 0x15e   :  { %v6473_v33 = vand.u32 2147483647, %v4608_v18  ;;  %v481_v1 = vsub.s32 4, %v4783_v47  ;;  %v557_v52 = vsel %vm555_vm3, %v556_v58, %v4813_v43  ;;  %vm612_vm5 = vcmp.gt.s32.totalorder %v611_v12, 0 }
 0x15f   :  { %v469_v57 = vshrl.u32 %v451_v61, %v467_v35  ;;  %v558_v37 = vadd.s32 %v557_v52, %v553_v50  ;;  %v608_v60 = vand.u32 8388607, %v6373_v8  ;;  %v613_v62 = vsel %vm612_vm5, %v611_v12, 0 }
 0x160   :  { %vm4834_vm4 = vcmp.le.f32.partialorder %v6473_v33, 0.7853982  ;;  %v4843_v0 = vand.u32 3, %v4767_v7  ;;  %v4845_v39 = vand.u32 3, %v1931_v51  ;;  %v4848_v41 = vand.u32 3, %v4801_v24 }
 0x161   :  { %v615_v46 = vand.u32 31, %v613_v62  ;;  %v4852_v3 = vand.u32 3, %v2035_v56  ;;  %v468_v43 = vshll.u32 %v4794_v23, %v466_v21  ;;  %v473_v16 = vshll.u32 %v472_v28, 23 }
 0x162   :  { %6476 = vst [vmem:[#allocation28_spill] sm:$0xff] %v4843_v0  ;;  %6477 = vst [vmem:[#allocation29_spill] sm:$0xff] %v4845_v39  ;;  %v559_v11 = vadd.s32 536870912, %v558_v37  ;;  %v4858_v13 = vsel %vm4759_vm9, %v4582_v63, %v274_v45  ;;  %v376_v7 = vxor.u32 2147483648, %v375_v17  ;;  %v482_v24 = vsel %vm397_vm0, %v481_v1, %v4783_v47 }
 0x163   :  { %v616_v51 = vsub.s32 32, %v615_v46  ;;  %v470_v20 = vor.u32 %v469_v57, %v468_v43  ;;  %v609_v59 = vor.u32 8388608, %v608_v60  ;;  %v707_v12 = vand.u32 2139095040, %v4850_v34 }
 0x164   :  { %v4863_v35 = vshrl.u32 %v559_v11, 30  ;;  %v614_v23 = vshrl.u32 %v613_v62, 5  ;;  %v474_v56 = vor.u32 4788187, %v473_v16  ;;  %v624_v58 = vshll.u32 %v6469_v44, %v615_v46 }
 0x165   :  { %v619_v21 = vshrl.u32 %v6468_v26, %v616_v51  ;;  %v622_v49 = vshrl.u32 %v6469_v44, %v616_v51  ;;  %v625_v27 = vshrl.u32 %v6470_v22, %v616_v51  ;;  %v628_v47 = vshrl.u32 %v6471_v10, %v616_v51 }
 0x166   :  { %v561_v61 = vshll.u32 %v4863_v35, 30  ;;  %v618_v45 = vshll.u32 %v6467_v5, %v615_v46  ;;  %v621_v28 = vshll.u32 %v6468_v26, %v615_v46  ;;  %v627_v50 = vshll.u32 %v6470_v22, %v615_v46 }
 0x167   :  { %v631_v33 = vshrl.u32 %v6472_v53, %v616_v51  ;;  %v377_v1 = vsel %vm294_vm11, %v376_v7, %v375_v17  ;;  %v484_v52 = vsel %vm4834_vm4, 0, %v482_v24  ;;  %v626_v60 = vor.u32 %v625_v27, %v624_v58 }
 0x168   :  { %v4880_v57 = vsub.s32 %v558_v37, %v561_v61  ;;  %v620_v62 = vor.u32 %v619_v21, %v618_v45  ;;  %v623_v43 = vor.u32 %v622_v49, %v621_v28  ;;  %v629_v16 = vor.u32 %v628_v47, %v627_v50  ;;  %v4900_v28 = vpop.permute.xlu1 %3597 }
 0x169   :  { %v630_v11 = vshll.u32 %v6471_v10, %v615_v46  ;;  %v477_v8 = vcvt.s32.f32 %v470_v20  ;;  %v4884_v40 = vshll.u32 %v609_v59, 8  ;;  %v708_v39 = vshrl.u32 %v707_v12, 23  ;;  %6481 = vst [vmem:[#allocation30_spill] sm:$0xff] %v4900_v28 }
 0x16a   :  { %v564_v54 = vsub.s32 0, %v4880_v57  ;;  %v475_v0 = vand.u32 2147483647, %v474_v56  ;;  %vm500_vm6 = vcmp.lt.s32.totalorder %v4712_v15, 0  ;;  %v617_v17 = vshrl.u32 %v6467_v5, %v616_v51 }
 0x16b   :  { %v632_v7 = vor.u32 %v631_v33, %v630_v11  ;;  %vm636_vm7 = vcmp.lt.s32.totalorder %v614_v23, 4  ;;  %v584_v24 = vsub.s32 4, %v4863_v35  ;;  %vm633_vm8 = vcmp.lt.s32.totalorder %v614_v23, 1 }
 0x16c   :  { %v3898_v37 = vmin.u32 %v564_v54, %v4880_v57  ;;  %v638_v46 = vsel %vm636_vm7, %v626_v60, 2102212464  ;;  %vm634_vm9 = vcmp.lt.s32.totalorder %v614_v23, 2  ;;  %vm635_vm11 = vcmp.lt.s32.totalorder %v614_v23, 3 }
 0x16d   :  { %v641_v20 = vsel %vm633_vm8, %v620_v62, %v623_v43  ;;  %v642_v59 = vsel %vm636_vm7, %v629_v16, 920167782  ;;  %v6478_v12 = vand.u32 2147483647, %v4712_v15  ;;  %v637_v49 = vsel %vm633_vm8, %v617_v17, %v620_v62 }
 0x16e   :  { %v566_v51 = vclz %v3898_v37  ;;  %v643_v27 = vsel %vm635_vm11, %v626_v60, %v642_v59  ;;  %v645_v54 = vsel %vm633_vm8, %v623_v43, %v626_v60  ;;  %v639_v56 = vsel %vm635_vm11, %v623_v43, %v638_v46 }
 0x16f   :  { %vm4894_vm12 = vcmp.le.f32.partialorder %v6478_v12, 0.7853982  ;;  %v644_v61 = vsel %vm634_vm9, %v641_v20, %v643_v27  ;;  %v646_v58 = vsel %vm636_vm7, %v632_v7, 1326507024  ;;  %v3905_v47 = vadd.s32 4294967169, %v708_v39 }
 0x170   :  { %v3899_v45 = vadd.s32 4294967294, %v566_v51  ;;  %v647_v50 = vsel %vm635_vm11, %v629_v16, %v646_v58  ;;  %v4903_v33 = vmul.u32.u64.low %v4884_v40, %v644_v61  ;;  %v4904_v11 = vmul.u32.u64.high %v4884_v40, %v644_v61, %v4903_v33 }
 0x171   :  { %v380_v62 = vsel %vm4771_vm10, %v4594_v6, %v377_v1  ;;  %v648_v60 = vsel %vm634_vm9, %v645_v54, %v647_v50  ;;  %v6376_v43 = vand.u32 2147483647, %v4850_v34  ;;  %v714_v17 = vadd.s32 1, %v3905_v47 }
 0x172   :  { %v478_v7 = vmul.f32 %v477_v8, %v475_v0  ;;  %vm3900_vm13 = vcmp.lt.s32.totalorder %v3899_v45, 0  ;;  %v4913_v39 = vmul.u32.u64.low %v4884_v40, %v648_v60  ;;  %v4914_v37 = vmul.u32.u64.high %v4884_v40, %v648_v60, %v4913_v39  ;;  %v4925_v0 = vpop.trf.xlu0 }
 0x173   :  { %4093 = vcosq.f32 %v4858_v13  ;;  %v4917_v16 = vsel %vm3900_vm13, 0, %v3899_v45  ;;  %v640_v46 = vsel %vm634_vm9, %v637_v49, %v639_v56  ;;  %vm715_vm14 = vcmp.gt.s32.totalorder %v714_v17, 0  ;;  %6482 = vst [vmem:[#allocation31_spill] sm:$0xff] %v4925_v0 }
 0x174   :  { %4095 = vsinq.f32 %v4858_v13  ;;  %v2139_v14 = vadd.s32 3, %v484_v52  ;;  %v585_v1 = vsel %vm500_vm6, %v584_v24, %v4863_v35  ;;  %v659_v8 = vadd.s32 1, %v4904_v11  ;;  %v3600_v35 = vpop.permute.xlu1 %3599 }
 0x175   :  { %4097 = vcosq.f32 %v380_v62  ;;  %v4927_v20 = vand.u32 3, %v484_v52  ;;  %v711_v59 = vand.u32 8388607, %v6376_v43  ;;  %v716_v23 = vsel %vm715_vm14, %v714_v17, 0 }
 0x176   :  { %v479_v12 = vxor.u32 2147483648, %v478_v7  ;;  %v574_v51 = vsub.s32 4294967266, %v4917_v16  ;;  %v656_v13 = vmul.u32 %v4884_v40, %v640_v46  ;;  %vm658_vm10 = vc.u32 %v4914_v37, %v4903_v33 }
 0x177   :  { %6483 = vst [vmem:[#allocation32_spill] sm:$0xff] %v4927_v20  ;;  %v4937_v24 = vsel %vm4894_vm12, 0, %v585_v1  ;;  %v660_v52 = vsel %vm658_vm10, %v659_v8, %v4904_v11  ;;  %v718_v49 = vand.u32 31, %v716_v23  ;;  %v810_v27 = vand.u32 2139095040, %v4925_v0 }
 0x178   :  { %4099 = vsinq.f32 %v380_v62  ;;  %v4941_v54 = vand.u32 3, %v2139_v14  ;;  %v570_v56 = vsub.s32 32, %v4917_v16  ;;  %v661_v61 = vadd.s32 %v660_v52, %v656_v13  ;;  %v5047_v29 = vpop.permute.xlu1 %3601 }
 0x179   :  { %v554_v40 = vadd.s32 %v4812_v30, %v4818_v9  ;;  %v4949_v58 = vsel %vm3610_vm1, %v4516_v36, %v3600_v35  ;;  %v712_v47 = vor.u32 8388608, %v711_v59  ;;  %v719_v45 = vsub.s32 32, %v718_v49  ;;  %6493 = vst [vmem:[#allocation38_spill] sm:$0xff] %v5047_v29 }
 0x17a   :  { %6484 = vst [vmem:[#allocation33_spill] sm:$0xff] %v4941_v54  ;;  %6485 = vst [vmem:[#allocation34_spill] sm:$0xff] %v4949_v58  ;;  %v480_v50 = vsel %vm397_vm0, %v479_v12, %v478_v7  ;;  %v575_v11 = vadd.s32 127, %v574_v51  ;;  %v4954_v62 = vadd.s32 3, %v4937_v24  ;;  %v662_v60 = vadd.s32 536870912, %v661_v61 }
 0x17b   :  { %v722_v17 = vshrl.u32 %v6468_v26, %v719_v45  ;;  %v725_v39 = vshrl.u32 %v6469_v44, %v719_v45  ;;  %v811_v9 = vshrl.u32 %v810_v27, 23  ;;  %v572_v46 = vshrl.u32 %v554_v40, %v570_v56 }
 0x17c   :  { %v4959_v36 = vshrl.u32 %v662_v60, 30  ;;  %v728_v14 = vshrl.u32 %v6470_v22, %v719_v45  ;;  %v731_v1 = vshrl.u32 %v6471_v10, %v719_v45  ;;  %v721_v7 = vshll.u32 %v6467_v5, %v718_v49 }
 0x17d   :  { %v724_v8 = vshll.u32 %v6468_v26, %v718_v49  ;;  %v730_v59 = vshll.u32 %v6470_v22, %v718_v49  ;;  %v734_v12 = vshrl.u32 %v6472_v53, %v719_v45  ;;  %v576_v51 = vshll.u32 %v575_v11, 23 }
 0x17e   :  { %v664_v13 = vshll.u32 %v4959_v36, 30  ;;  %v717_v35 = vshrl.u32 %v716_v23, 5  ;;  %v727_v52 = vshll.u32 %v6469_v44, %v718_v49  ;;  %v723_v27 = vor.u32 %v722_v17, %v721_v7 }
 0x17f   :  { %v726_v56 = vor.u32 %v725_v39, %v724_v8  ;;  %v732_v40 = vor.u32 %v731_v1, %v730_v59  ;;  %v733_v60 = vshll.u32 %v6471_v10, %v718_v49  ;;  %v4975_v30 = vsel %vm4834_vm4, %v4608_v18, %v480_v50 }
 0x180   :  { %v4970_v43 = vpop.eup %4093  ;;  %v571_v11 = vshll.u32 %v4880_v57, %v4917_v16  ;;  %v4979_v28 = vsub.s32 %v661_v61, %v664_v13  ;;  %v729_v23 = vor.u32 %v728_v14, %v727_v52  ;;  %v752_v39 = vshll.u32 %v712_v47, 8 }
 0x181   :  { %6486 = vst [vmem:[#allocation35_spill] sm:$0xff] %v4970_v43  ;;  %v4981_v54 = vpop.eup %4095  ;;  %v735_v17 = vor.u32 %v734_v12, %v733_v60  ;;  %v3909_v1 = vadd.s32 4294967169, %v811_v9  ;;  %v6488_v49 = vand.u32 2147483647, %v4925_v0  ;;  %vm736_vm15 = vcmp.lt.s32.totalorder %v717_v35, 1 }
 0x182   :  { %6487 = vst [vmem:[#allocation36_spill] sm:$0xff] %v4981_v54  ;;  %v4987_v8 = vpop.eup %4097  ;;  %v573_v31 = vor.u32 %v572_v46, %v571_v11  ;;  %v667_v50 = vsub.s32 0, %v4979_v28  ;;  %vm739_vm0 = vcmp.lt.s32.totalorder %v717_v35, 4  ;;  %v577_v57 = vor.u32 4788187, %v576_v51 }
 0x183   :  { %v4985_v7 = vand.u32 8388607, %v6488_v49  ;;  %v720_v16 = vshrl.u32 %v6467_v5, %v719_v45  ;;  %v744_v61 = vsel %vm736_vm15, %v723_v27, %v726_v56  ;;  %v745_v14 = vsel %vm739_vm0, %v732_v40, 920167782 }
 0x184   :  { %v3902_v59 = vmin.u32 %v667_v50, %v4979_v28  ;;  %vm738_vm2 = vcmp.lt.s32.totalorder %v717_v35, 3  ;;  %v741_v47 = vsel %vm739_vm0, %v729_v23, 2102212464  ;;  %v748_v9 = vsel %vm736_vm15, %v726_v56, %v729_v23 }
 0x185   :  { %v4992_v12 = vpop.eup %4099  ;;  %vm603_vm3 = vcmp.lt.s32.totalorder %v4763_v2, 0  ;;  %vm737_vm4 = vcmp.lt.s32.totalorder %v717_v35, 2  ;;  %v740_v46 = vsel %vm736_vm15, %v720_v16, %v723_v27  ;;  %v746_v13 = vsel %vm738_vm2, %v729_v23, %v745_v14 }
 0x186   :  { %v749_v52 = vsel %vm739_vm0, %v735_v17, 1326507024  ;;  %v669_v60 = vclz %v3902_v59  ;;  %v747_v51 = vsel %vm737_vm4, %v744_v61, %v746_v13  ;;  %v817_v45 = vadd.s32 1, %v3909_v1 }
 0x187   :  { %v750_v11 = vsel %vm738_vm2, %v732_v40, %v749_v52  ;;  %v742_v49 = vsel %vm738_vm2, %v726_v56, %v741_v47  ;;  %v4997_v50 = vmul.u32.u64.low %v752_v39, %v747_v51  ;;  %v4998_v18 = vmul.u32.u64.high %v752_v39, %v747_v51, %v4997_v50 }
 0x188   :  { %v751_v20 = vsel %vm737_vm4, %v748_v9, %v750_v11  ;;  %v3903_v58 = vadd.s32 4294967294, %v669_v60  ;;  %vm818_vm5 = vcmp.gt.s32.totalorder %v817_v45, 0  ;;  %4101 = vcosq.f32 %v4975_v30 }
 0x189   :  { %v5001_v43 = vmul.u32.u64.low %v752_v39, %v751_v20  ;;  %v5002_v54 = vmul.u32.u64.high %v752_v39, %v751_v20, %v5001_v43  ;;  %v578_v27 = vand.u32 2147483647, %v577_v57  ;;  %v5006_v23 = vand.u32 3, %v4937_v24 }
 0x18a   :  { %v819_v40 = vsel %vm818_vm5, %v817_v45, 0  ;;  %vm3904_vm7 = vcmp.lt.s32.totalorder %v3903_v58, 0  ;;  %v687_v56 = vsub.s32 4, %v4959_v36  ;;  %v743_v17 = vsel %vm737_vm4, %v740_v46, %v742_v49 }
 0x18b   :  { %v821_v1 = vand.u32 31, %v819_v40  ;;  %v580_v16 = vcvt.s32.f32 %v573_v31  ;;  %v5011_v61 = vand.u32 3, %v4954_v62  ;;  %v6489_v43 = vand.u32 2147483647, %v4763_v2 }
 0x18c   :  { %v672_v57 = vsel %vm3904_vm7, 0, %v3903_v58  ;;  %v762_v24 = vadd.s32 1, %v4998_v18  ;;  %v657_v14 = vadd.s32 %v4903_v33, %v4914_v37  ;;  %v815_v47 = vor.u32 8388608, %v4985_v7 }
 0x18d   :  { %vm5015_vm8 = vcmp.le.f32.partialorder %v6489_v43, 0.7853982  ;;  %v673_v59 = vsub.s32 32, %v672_v57  ;;  %v677_v35 = vsub.s32 4294967266, %v672_v57  ;;  %v581_v31 = vmul.f32 %v580_v16, %v578_v27 }
 0x18e   :  { %v759_v9 = vmul.u32 %v752_v39, %v743_v17  ;;  %vm761_vm9 = vc.u32 %v5002_v54, %v4997_v50  ;;  %v822_v62 = vsub.s32 32, %v821_v1  ;;  %v688_v58 = vsel %vm603_vm3, %v687_v56, %v4959_v36 }
 0x18f   :  { %v678_v46 = vadd.s32 127, %v677_v35  ;;  %v763_v13 = vsel %vm761_vm9, %v762_v24, %v4998_v18  ;;  %v5029_v52 = vshrl.u32 %v819_v40, 5  ;;  %v824_v37 = vshll.u32 %v6467_v5, %v821_v1  ;;  %v5039_v40 = vpop.trf.xlu0 }
 0x190   :  { %v764_v33 = vadd.s32 %v763_v13, %v759_v9  ;;  %v825_v7 = vshrl.u32 %v6468_v26, %v822_v62  ;;  %v828_v39 = vshrl.u32 %v6469_v44, %v822_v62  ;;  %v675_v60 = vshrl.u32 %v657_v14, %v673_v59  ;;  %6492 = vst [vmem:[#allocation37_spill] sm:$0xff] %v5039_v40 }
 0x191   :  { %v679_v51 = vshll.u32 %v678_v46, 23  ;;  %v827_v11 = vshll.u32 %v6468_v26, %v821_v1  ;;  %v831_v45 = vshrl.u32 %v6470_v22, %v822_v62  ;;  %v830_v36 = vshll.u32 %v6469_v44, %v821_v1 }
 0x192   :  { %v765_v49 = vadd.s32 536870912, %v764_v33  ;;  %v833_v18 = vshll.u32 %v6470_v22, %v821_v1  ;;  %v834_v27 = vshrl.u32 %v6471_v10, %v822_v62  ;;  %v582_v56 = vxor.u32 2147483648, %v581_v31 }
 0x193   :  { %v674_v17 = vshll.u32 %v4979_v28, %v672_v57  ;;  %v826_v16 = vor.u32 %v825_v7, %v824_v37  ;;  %v829_v43 = vor.u32 %v828_v39, %v827_v11  ;;  %v832_v14 = vor.u32 %v831_v45, %v830_v36 }
 0x194   :  { %v766_v24 = vshrl.u32 %v765_v49, 30  ;;  %v835_v59 = vor.u32 %v834_v27, %v833_v18  ;;  %v837_v35 = vshrl.u32 %v6472_v53, %v822_v62  ;;  %v680_v9 = vor.u32 4788187, %v679_v51 }
 0x195   :  { %v690_v46 = vsel %vm5015_vm8, 0, %v688_v58  ;;  %v836_v13 = vshll.u32 %v6471_v10, %v821_v1  ;;  %v913_v63 = vand.u32 2139095040, %v5039_v40  ;;  %v676_v25 = vor.u32 %v675_v60, %v674_v17  ;;  %v5051_v28 = vpop.eup %4101 }
 0x196   :  { %v767_v4 = vshll.u32 %v766_v24, 30  ;;  %vm839_vm11 = vcmp.lt.s32.totalorder %v5029_v52, 1  ;;  %vm842_vm13 = vcmp.lt.s32.totalorder %v5029_v52, 4  ;;  %6494 = vst [vmem:[#allocation39_spill] sm:$0xff] %v5051_v28  ;;  %vm841_vm14 = vcmp.lt.s32.totalorder %v5029_v52, 3 }
 0x197   :  { %v838_v57 = vor.u32 %v837_v35, %v836_v13  ;;  %v847_v58 = vsel %vm839_vm11, %v826_v16, %v829_v43  ;;  %v848_v1 = vsel %vm842_vm13, %v835_v59, 920167782  ;;  %vm706_vm10 = vcmp.lt.s32.totalorder %v4850_v34, 0 }
 0x198   :  { %v5059_v37 = vsub.s32 %v764_v33, %v767_v4  ;;  %vm840_vm15 = vcmp.lt.s32.totalorder %v5029_v52, 2  ;;  %v849_v7 = vsel %vm841_vm14, %v832_v14, %v848_v1  ;;  %v855_v39 = vshll.u32 %v815_v47, 8 }
 0x199   :  { %v681_v60 = vand.u32 2147483647, %v680_v9  ;;  %v844_v51 = vsel %vm842_vm13, %v832_v14, 2102212464  ;;  %v850_v11 = vsel %vm840_vm15, %v847_v58, %v849_v7  ;;  %v914_v45 = vshrl.u32 %v913_v63, 23 }
 0x19a   :  { %v583_v49 = vsel %vm500_vm6, %v582_v56, %v581_v31  ;;  %v770_v4 = vsub.s32 0, %v5059_v37  ;;  %v823_v33 = vshrl.u32 %v6467_v5, %v822_v62  ;;  %v851_v36 = vsel %vm839_vm11, %v829_v43, %v832_v14  ;;  %v3604_v14 = vpop.permute.xlu1 %3603 }
 0x19b   :  { %v683_v18 = vcvt.s32.f32 %v676_v25  ;;  %v852_v47 = vsel %vm842_vm13, %v838_v57, 1326507024  ;;  %v5076_v27 = vmul.u32.u64.low %v855_v39, %v850_v11  ;;  %v5077_v17 = vmul.u32.u64.high %v855_v39, %v850_v11, %v5076_v27 }
 0x19c   :  { %v6495_v63 = vand.u32 2147483647, %v4850_v34  ;;  %v3906_v31 = vmin.u32 %v770_v4, %v5059_v37  ;;  %v843_v62 = vsel %vm839_vm11, %v823_v33, %v826_v16  ;;  %v845_v25 = vsel %vm841_vm14, %v829_v43, %v844_v51 }
 0x19d   :  { %v853_v56 = vsel %vm841_vm14, %v835_v59, %v852_v47  ;;  %v684_v9 = vmul.f32 %v683_v18, %v681_v60  ;;  %v790_v13 = vsub.s32 4, %v766_v24  ;;  %v3913_v58 = vadd.s32 4294967169, %v914_v45 }
 0x19e   :  { %vm5082_vm0 = vcmp.le.f32.partialorder %v6495_v63, 0.7853982  ;;  %v854_v57 = vsel %vm840_vm15, %v851_v36, %v853_v56  ;;  %4103 = vsinq.f32 %v4975_v30  ;;  %v772_v1 = vclz %v3906_v31 }
 0x19f   :  { %v5096_v7 = vmul.u32.u64.low %v855_v39, %v854_v57  ;;  %v5097_v11 = vmul.u32.u64.high %v855_v39, %v854_v57, %v5096_v7  ;;  %v846_v16 = vsel %vm840_vm15, %v843_v62, %v845_v25  ;;  %v865_v43 = vadd.s32 1, %v5077_v17 }
 0x1a0   :  { %v5105_v59 = vsel %vm3610_vm1, %v4522_v38, %v3604_v14  ;;  %v920_v60 = vadd.s32 1, %v3913_v58  ;;  %v5110_v51 = vsel %vm4894_vm12, %v4712_v15, %v583_v49  ;;  %v5112_v30 = vand.u32 3, %v690_v46 }
 0x1a1   :  { %6498 = vst [vmem:[#allocation40_spill] sm:$0xff] %v5105_v59  ;;  %v2347_v45 = vadd.s32 3, %v690_v46  ;;  %v3907_v4 = vadd.s32 4294967294, %v772_v1  ;;  %v685_v33 = vxor.u32 2147483648, %v684_v9  ;;  %v791_v52 = vsel %vm706_vm10, %v790_v13, %v766_v24 }
 0x1a2   :  { %6499 = vst [vmem:[#allocation41_spill] sm:$0xff] %v5112_v30  ;;  %v6385_v36 = vand.u32 2147483647, %v5039_v40  ;;  %vm921_vm6 = vcmp.gt.s32.totalorder %v920_v60, 0  ;;  %v862_v38 = vmul.u32 %v855_v39, %v846_v16  ;;  %vm864_vm4 = vc.u32 %v5097_v11, %v5076_v27 }
 0x1a3   :  { %vm3908_vm2 = vcmp.lt.s32.totalorder %v3907_v4, 0  ;;  %v922_v18 = vsel %vm921_vm6, %v920_v60, 0  ;;  %4105 = vcosq.f32 %v5110_v51  ;;  %v866_v49 = vsel %vm864_vm4, %v865_v43, %v5077_v17 }
 0x1a4   :  { %v775_v21 = vsel %vm3908_vm2, 0, %v3907_v4  ;;  %v924_v46 = vand.u32 31, %v922_v18  ;;  %v760_v47 = vadd.s32 %v4997_v50, %v5002_v54  ;;  %v867_v31 = vadd.s32 %v866_v49, %v862_v38 }
 0x1a5   :  { %v776_v63 = vsub.s32 32, %v775_v21  ;;  %v780_v24 = vsub.s32 4294967266, %v775_v21  ;;  %v5125_v62 = vsel %vm603_vm3, %v685_v33, %v684_v9  ;;  %v5127_v39 = vand.u32 3, %v2347_v45  ;;  %v5145_v33 = vpop.trf.xlu0 }
 0x1a6   :  { %v5131_v25 = vsel %vm5082_vm0, 0, %v791_v52  ;;  %v925_v56 = vsub.s32 32, %v924_v46  ;;  %v868_v13 = vadd.s32 536870912, %v867_v31  ;;  %v917_v54 = vand.u32 8388607, %v6385_v36  ;;  %6501 = vst [vmem:[#allocation43_spill] sm:$0xff] %v5145_v33 }
 0x1a7   :  { %6500 = vst [vmem:[#allocation42_spill] sm:$0xff] %v5127_v39  ;;  %v778_v14 = vshrl.u32 %v760_v47, %v776_v63  ;;  %v781_v17 = vadd.s32 127, %v780_v24  ;;  %v777_v50 = vshll.u32 %v5059_v37, %v775_v21  ;;  %v927_v57 = vshll.u32 %v6467_v5, %v924_v46 }
 0x1a8   :  { %v928_v9 = vshrl.u32 %v6468_v26, %v925_v56  ;;  %v931_v58 = vshrl.u32 %v6469_v44, %v925_v56  ;;  %vm809_vm12 = vcmp.lt.s32.totalorder %v4925_v0, 0  ;;  %v869_v7 = vshrl.u32 %v868_v13, 30 }
 0x1a9   :  { %v782_v1 = vshll.u32 %v781_v17, 23  ;;  %v934_v16 = vshrl.u32 %v6470_v22, %v925_v56  ;;  %v937_v43 = vshrl.u32 %v6471_v10, %v925_v56  ;;  %v923_v60 = vshrl.u32 %v922_v18, 5 }
 0x1aa   :  { %v930_v45 = vshll.u32 %v6468_v26, %v924_v46  ;;  %v933_v4 = vshll.u32 %v6469_v44, %v924_v46  ;;  %v936_v37 = vshll.u32 %v6470_v22, %v924_v46  ;;  %v779_v52 = vor.u32 %v778_v14, %v777_v50 }
 0x1ab   :  { %v783_v38 = vor.u32 4788187, %v782_v1  ;;  %v870_v21 = vshll.u32 %v869_v7, 30  ;;  %v929_v49 = vor.u32 %v928_v9, %v927_v57  ;;  %v5147_v47 = vpop.eup %4103  ;;  %v939_v17 = vshll.u32 %v6471_v10, %v924_v46 }
 0x1ac   :  { %6502 = vst [vmem:[#allocation44_spill] sm:$0xff] %v5147_v47  ;;  %v932_v63 = vor.u32 %v931_v58, %v930_v45  ;;  %v938_v24 = vor.u32 %v937_v43, %v936_v37  ;;  %v940_v18 = vshrl.u32 %v6472_v53, %v925_v56  ;;  %v935_v29 = vor.u32 %v934_v16, %v933_v4 }
 0x1ad   :  { %v784_v13 = vand.u32 2147483647, %v783_v38  ;;  %v5151_v36 = vsub.s32 %v867_v31, %v870_v21  ;;  %v1016_v39 = vand.u32 2139095040, %v5145_v33  ;;  %v893_v30 = vsub.s32 4, %v869_v7 }
 0x1ae   :  { %v918_v59 = vor.u32 8388608, %v917_v54  ;;  %v926_v14 = vshrl.u32 %v6467_v5, %v925_v56  ;;  %v941_v50 = vor.u32 %v940_v18, %v939_v17  ;;  %v786_v57 = vcvt.s32.f32 %v779_v52 }
 0x1af   :  { %v6503_v9 = vand.u32 2147483647, %v4925_v0  ;;  %v873_v46 = vsub.s32 0, %v5151_v36  ;;  %vm942_vm5 = vcmp.lt.s32.totalorder %v923_v60, 1  ;;  %vm945_vm7 = vcmp.lt.s32.totalorder %v923_v60, 4 }
 0x1b0   :  { %vm943_vm9 = vcmp.lt.s32.totalorder %v923_v60, 2  ;;  %vm944_vm11 = vcmp.lt.s32.totalorder %v923_v60, 3  ;;  %v950_v31 = vsel %vm942_vm5, %v929_v49, %v932_v63  ;;  %v951_v1 = vsel %vm945_vm7, %v938_v24, 920167782  ;;  %v5163_v54 = vpop.eup %4105 }
 0x1b1   :  { %vm5157_vm3 = vcmp.le.f32.partialorder %v6503_v9, 0.7853982  ;;  %v787_v56 = vmul.f32 %v786_v57, %v784_v13  ;;  %v3910_v16 = vmin.u32 %v873_v46, %v5151_v36  ;;  %v947_v43 = vsel %vm945_vm7, %v935_v29, 2102212464 }
 0x1b2   :  { %v954_v45 = vsel %vm942_vm5, %v932_v63, %v935_v29  ;;  %v894_v4 = vsel %vm809_vm12, %v893_v30, %v869_v7  ;;  %v952_v37 = vsel %vm944_vm11, %v935_v29, %v951_v1  ;;  %v955_v52 = vsel %vm945_vm7, %v941_v50, 1326507024 }
 0x1b3   :  { %v958_v38 = vshll.u32 %v918_v59, 8  ;;  %v875_v21 = vclz %v3910_v16  ;;  %v946_v17 = vsel %vm942_vm5, %v926_v14, %v929_v49  ;;  %v953_v18 = vsel %vm943_vm9, %v950_v31, %v952_v37 }
 0x1b4   :  { %v956_v9 = vsel %vm944_vm11, %v938_v24, %v955_v52  ;;  %v948_v13 = vsel %vm944_vm11, %v932_v63, %v947_v43  ;;  %v788_v30 = vxor.u32 2147483648, %v787_v56  ;;  %4107 = vsinq.f32 %v5110_v51  ;;  %v5187_v63 = vpop.trf.xlu0 }
 0x1b5   :  { %v957_v57 = vsel %vm943_vm9, %v954_v45, %v956_v9  ;;  %v5175_v46 = vmul.u32.u64.low %v958_v38, %v953_v18  ;;  %v5176_v28 = vmul.u32.u64.high %v958_v38, %v953_v18, %v5175_v46  ;;  %v3911_v7 = vadd.s32 4294967294, %v875_v21  ;;  %6507 = vst [vmem:[#allocation46_spill] sm:$0xff] %v5187_v63 }
 0x1b6   :  { %v5179_v29 = vmul.u32.u64.low %v958_v38, %v957_v57  ;;  %v5180_v50 = vmul.u32.u64.high %v958_v38, %v957_v57, %v5179_v29  ;;  %v5184_v59 = vand.u32 3, %v5131_v25  ;;  %v6389_v49 = vand.u32 2147483647, %v5145_v33 }
 0x1b7   :  { %v1017_v24 = vshrl.u32 %v1016_v39, 23  ;;  %v689_v14 = vsel %vm5015_vm8, %v4763_v2, %v5125_v62  ;;  %v2451_v31 = vadd.s32 3, %v5131_v25  ;;  %vm3912_vm13 = vcmp.lt.s32.totalorder %v3911_v7, 0 }
 0x1b8   :  { %6506 = vst [vmem:[#allocation45_spill] sm:$0xff] %v5184_v59  ;;  %v949_v1 = vsel %vm943_vm9, %v946_v17, %v948_v13  ;;  %v878_v16 = vsel %vm3912_vm13, 0, %v3911_v7  ;;  %v896_v51 = vsel %vm5157_vm3, 0, %v894_v4  ;;  %v968_v43 = vadd.s32 1, %v5176_v28 }
 0x1b9   :  { %v3917_v45 = vadd.s32 4294967169, %v1017_v24  ;;  %v789_v39 = vsel %vm706_vm10, %v788_v30, %v787_v56  ;;  %v879_v37 = vsub.s32 32, %v878_v16  ;;  %v883_v52 = vsub.s32 4294967266, %v878_v16 }
 0x1ba   :  { %v1119_v20 = vand.u32 2139095040, %v5187_v63  ;;  %4109 = vcosq.f32 %v689_v14  ;;  %v965_v62 = vmul.u32 %v958_v38, %v949_v1  ;;  %vm967_vm8 = vc.u32 %v5180_v50, %v5175_v46 }
 0x1bb   :  { %v1023_v25 = vadd.s32 1, %v3917_v45  ;;  %v863_v60 = vadd.s32 %v5076_v27, %v5097_v11  ;;  %v884_v4 = vadd.s32 127, %v883_v52  ;;  %v969_v21 = vsel %vm967_vm8, %v968_v43, %v5176_v28 }
 0x1bc   :  { %v1020_v17 = vand.u32 8388607, %v6389_v49  ;;  %v792_v56 = vsel %vm5082_vm0, %v4850_v34, %v789_v39  ;;  %v2555_v18 = vadd.s32 3, %v896_v51  ;;  %v970_v9 = vadd.s32 %v969_v21, %v965_v62 }
 0x1bd   :  { %vm1024_vm14 = vcmp.gt.s32.totalorder %v1023_v25, 0  ;;  %v881_v38 = vshrl.u32 %v863_v60, %v879_v37  ;;  %v885_v13 = vshll.u32 %v884_v4, 23  ;;  %v1120_v30 = vshrl.u32 %v1119_v20, 23 }
 0x1be   :  { %v1025_v57 = vsel %vm1024_vm14, %v1023_v25, 0  ;;  %4111 = vsinq.f32 %v689_v14  ;;  %v5211_v7 = vand.u32 3, %v2451_v31  ;;  %v971_v27 = vadd.s32 536870912, %v970_v9 }
 0x1bf   :  { %v1027_v11 = vand.u32 31, %v1025_v57  ;;  %4113 = vcosq.f32 %v792_v56  ;;  %v880_v28 = vshll.u32 %v5151_v36, %v878_v16  ;;  %v5214_v29 = vand.u32 3, %v896_v51 }
 0x1c0   :  { %6508 = vst [vmem:[#allocation47_spill] sm:$0xff] %v5211_v7  ;;  %v6394_v35 = vand.u32 2147483647, %v5187_v63  ;;  %4115 = vsinq.f32 %v792_v56  ;;  %v5217_v24 = vand.u32 3, %v2555_v18  ;;  %v5219_v1 = vshrl.u32 %v971_v27, 30 }
 0x1c1   :  { %6509 = vst [vmem:[#allocation48_spill] sm:$0xff] %v5214_v29  ;;  %v1028_v43 = vsub.s32 32, %v1027_v11  ;;  %v882_v45 = vor.u32 %v881_v38, %v880_v28  ;;  %v886_v39 = vor.u32 4788187, %v885_v13  ;;  %v1021_v14 = vor.u32 8388608, %v1020_v17  ;;  %v5224_v16 = vpop.eup %4107 }
 0x1c2   :  { %6510 = vst [vmem:[#allocation49_spill] sm:$0xff] %v5217_v24  ;;  %v3921_v31 = vadd.s32 4294967169, %v1120_v30  ;;  %v973_v37 = vshll.u32 %v5219_v1, 30  ;;  %v1026_v52 = vshrl.u32 %v1025_v57, 5  ;;  %v1030_v20 = vshll.u32 %v6467_v5, %v1027_v11 }
 0x1c3   :  { %v1031_v36 = vshrl.u32 %v6468_v26, %v1028_v43  ;;  %v1033_v51 = vshll.u32 %v6468_v26, %v1027_v11  ;;  %v1034_v62 = vshrl.u32 %v6469_v44, %v1028_v43  ;;  %v1037_v25 = vshrl.u32 %v6470_v22, %v1028_v43 }
 0x1c4   :  { %v1040_v60 = vshrl.u32 %v6471_v10, %v1028_v43  ;;  %v5230_v4 = vsub.s32 %v970_v9, %v973_v37  ;;  %v1036_v21 = vshll.u32 %v6469_v44, %v1027_v11  ;;  %v1039_v17 = vshll.u32 %v6470_v22, %v1027_v11 }
 0x1c5   :  { %v1043_v56 = vshrl.u32 %v6472_v53, %v1028_v43  ;;  %v887_v18 = vand.u32 2147483647, %v886_v39  ;;  %v1032_v38 = vor.u32 %v1031_v36, %v1030_v20  ;;  %v1035_v13 = vor.u32 %v1034_v62, %v1033_v51 }
 0x1c6   :  { %v1042_v57 = vshll.u32 %v6471_v10, %v1027_v11  ;;  %v976_v30 = vsub.s32 0, %v5230_v4  ;;  %v1038_v27 = vor.u32 %v1037_v25, %v1036_v21  ;;  %v1041_v28 = vor.u32 %v1040_v60, %v1039_v17 }
 0x1c7   :  { %v1123_v49 = vand.u32 8388607, %v6394_v35  ;;  %v5239_v9 = vpop.eup %4109  ;;  %v889_v37 = vcvt.s32.f32 %v882_v45  ;;  %vm912_vm10 = vcmp.lt.s32.totalorder %v5039_v40, 0  ;;  %v1061_v29 = vshll.u32 %v1021_v14, 8 }
 0x1c8   :  { %6511 = vst [vmem:[#allocation50_spill] sm:$0xff] %v5239_v9  ;;  %v1044_v24 = vor.u32 %v1043_v56, %v1042_v57  ;;  %v1126_v2 = vadd.s32 1, %v3921_v31  ;;  %v3914_v39 = vmin.u32 %v976_v30, %v5230_v4  ;;  %v996_v20 = vsub.s32 4, %v5219_v1 }
 0x1c9   :  { %v1029_v11 = vshrl.u32 %v6467_v5, %v1028_v43  ;;  %vm1045_vm15 = vcmp.lt.s32.totalorder %v1026_v52, 1  ;;  %v890_v36 = vmul.f32 %v889_v37, %v887_v18  ;;  %vm1046_vm0 = vcmp.lt.s32.totalorder %v1026_v52, 2 }
 0x1ca   :  { %vm1048_vm6 = vcmp.lt.s32.totalorder %v1026_v52, 4  ;;  %v1053_v51 = vsel %vm1045_vm15, %v1032_v38, %v1035_v13  ;;  %v6512_v62 = vand.u32 2147483647, %v5039_v40  ;;  %v978_v25 = vclz %v3914_v39 }
 0x1cb   :  { %vm1047_vm4 = vcmp.lt.s32.totalorder %v1026_v52, 3  ;;  %v1050_v14 = vsel %vm1048_vm6, %v1038_v27, 2102212464  ;;  %v1054_v31 = vsel %vm1048_vm6, %v1041_v28, 920167782  ;;  %v5251_v60 = vpop.eup %4111  ;;  %v1049_v21 = vsel %vm1045_vm15, %v1029_v11, %v1032_v38 }
 0x1cc   :  { %vm5247_vm2 = vcmp.le.f32.partialorder %v6512_v62, 0.7853982  ;;  %6515 = vst [vmem:[#allocation51_spill] sm:$0xff] %v5251_v60  ;;  %v1055_v17 = vsel %vm1047_vm4, %v1038_v27, %v1054_v31  ;;  %v1057_v43 = vsel %vm1045_vm15, %v1035_v13, %v1038_v27  ;;  %v1058_v56 = vsel %vm1048_vm6, %v1044_v24, 1326507024  ;;  %v5253_v18 = vpop.eup %4113  ;;  %v5266_v24 = vpop.trf.xlu0 }
 0x1cd   :  { %6516 = vst [vmem:[#allocation52_spill] sm:$0xff] %v5253_v18  ;;  %v3915_v57 = vadd.s32 4294967294, %v978_v25  ;;  %v1051_v30 = vsel %vm1047_vm4, %v1035_v13, %v1050_v14  ;;  %v1056_v37 = vsel %vm1046_vm0, %v1053_v51, %v1055_v17  ;;  %v1059_v62 = vsel %vm1047_vm4, %v1041_v28, %v1058_v56  ;;  %v5256_v35 = vpop.eup %4115  ;;  %6518 = vst [vmem:[#allocation54_spill] sm:$0xff] %v5266_v24 }
 0x1ce   :  { %6517 = vst [vmem:[#allocation53_spill] sm:$0xff] %v5256_v35  ;;  %v1060_v39 = vsel %vm1046_vm0, %v1057_v43, %v1059_v62  ;;  %v5259_v9 = vmul.u32.u64.low %v1061_v29, %v1056_v37  ;;  %v5260_v47 = vmul.u32.u64.high %v1061_v29, %v1056_v37, %v5259_v9  ;;  %v1124_v60 = vor.u32 8388608, %v1123_v49 }
 0x1cf   :  { %vm3916_vm5 = vcmp.lt.s32.totalorder %v3915_v57, 0  ;;  %v5263_v38 = vmul.u32.u64.low %v1061_v29, %v1060_v39  ;;  %v5264_v27 = vmul.u32.u64.high %v1061_v29, %v1060_v39, %v5263_v38  ;;  %vm1127_vm7 = vcmp.gt.s32.totalorder %v1126_v2, 0 }
 0x1d0   :  { %v966_v13 = vadd.s32 %v5175_v46, %v5180_v50  ;;  %v981_v28 = vsel %vm3916_vm5, 0, %v3915_v57  ;;  %v1052_v11 = vsel %vm1046_vm0, %v1049_v21, %v1051_v30  ;;  %v1128_v51 = vsel %vm1127_vm7, %v1126_v2, 0 }
 0x1d1   :  { %v891_v25 = vxor.u32 2147483648, %v890_v36  ;;  %v982_v14 = vsub.s32 32, %v981_v28  ;;  %v986_v31 = vsub.s32 4294967266, %v981_v28  ;;  %v997_v49 = vsel %vm912_vm10, %v996_v20, %v5219_v1 }
 0x1d2   :  { %v1071_v17 = vadd.s32 1, %v5260_v47  ;;  %v1130_v43 = vand.u32 31, %v1128_v51  ;;  %v5275_v56 = vshll.u32 %v1124_v60, 8  ;;  %v1068_v50 = vmul.u32 %v1061_v29, %v1052_v11 }
 0x1d3   :  { %v984_v62 = vshrl.u32 %v966_v13, %v982_v14  ;;  %v987_v46 = vadd.s32 127, %v986_v31  ;;  %vm1070_vm9 = vc.u32 %v5264_v27, %v5259_v9  ;;  %v5282_v2 = vsel %vm5247_vm2, 0, %v997_v49 }
 0x1d4   :  { %v1072_v52 = vsel %vm1070_vm9, %v1071_v17, %v5260_v47  ;;  %v1131_v1 = vsub.s32 32, %v1130_v43  ;;  %v1222_v20 = vand.u32 2139095040, %v5266_v24  ;;  %v892_v60 = vsel %vm809_vm12, %v891_v25, %v890_v36 }
 0x1d5   :  { %v983_v21 = vshll.u32 %v5230_v4, %v981_v28  ;;  %v988_v57 = vshll.u32 %v987_v46, 23  ;;  %v1073_v30 = vadd.s32 %v1072_v52, %v1068_v50  ;;  %v1129_v29 = vshrl.u32 %v1128_v51, 5 }
 0x1d6   :  { %v1134_v39 = vshrl.u32 %v6468_v26, %v1131_v1  ;;  %v1137_v38 = vshrl.u32 %v6469_v44, %v1131_v1  ;;  %v1140_v13 = vshrl.u32 %v6470_v22, %v1131_v1  ;;  %v1133_v31 = vshll.u32 %v6467_v5, %v1130_v43 }
 0x1d7   :  { %v985_v11 = vor.u32 %v984_v62, %v983_v21  ;;  %v989_v14 = vor.u32 4788187, %v988_v57  ;;  %v1074_v47 = vadd.s32 536870912, %v1073_v30  ;;  %v1136_v49 = vshll.u32 %v6468_v26, %v1130_v43 }
 0x1d8   :  { %v1139_v36 = vshll.u32 %v6469_v44, %v1130_v43  ;;  %v1142_v4 = vshll.u32 %v6470_v22, %v1130_v43  ;;  %v1143_v28 = vshrl.u32 %v6471_v10, %v1131_v1  ;;  %v1145_v17 = vshll.u32 %v6471_v10, %v1130_v43 }
 0x1d9   :  { %v990_v51 = vand.u32 2147483647, %v989_v14  ;;  %v1075_v25 = vshrl.u32 %v1074_v47, 30  ;;  %v1146_v46 = vshrl.u32 %v6472_v53, %v1131_v1  ;;  %vm1015_vm12 = vcmp.lt.s32.totalorder %v5145_v33, 0 }
 0x1da   :  { %v1135_v62 = vor.u32 %v1134_v39, %v1133_v31  ;;  %v1138_v50 = vor.u32 %v1137_v38, %v1136_v49  ;;  %v1141_v52 = vor.u32 %v1140_v13, %v1139_v36  ;;  %v1144_v21 = vor.u32 %v1143_v28, %v1142_v4 }
 0x1db   :  { %v992_v57 = vcvt.s32.f32 %v985_v11  ;;  %v2659_v37 = vadd.s32 3, %v5282_v2  ;;  %v1076_v55 = vshll.u32 %v1075_v25, 30  ;;  %v1147_v7 = vor.u32 %v1146_v46, %v1145_v17 }
 0x1dc   :  { %v895_v14 = vsel %vm5157_vm3, %v4925_v0, %v892_v60  ;;  %v1132_v47 = vshrl.u32 %v6467_v5, %v1131_v1  ;;  %v1223_v43 = vshrl.u32 %v1222_v20, 23  ;;  %v6519_v18 = vand.u32 2147483647, %v5266_v24 }
 0x1dd   :  { %v993_v39 = vmul.f32 %v992_v57, %v990_v51  ;;  %v6520_v38 = vand.u32 2147483647, %v5145_v33  ;;  %v5315_v11 = vsub.s32 %v1073_v30, %v1076_v55  ;;  %vm1148_vm13 = vcmp.lt.s32.totalorder %v1129_v29, 1 }
 0x1de   :  { %v5307_v35 = vand.u32 8388607, %v6519_v18  ;;  %vm1151_vm8 = vcmp.lt.s32.totalorder %v1129_v29, 4  ;;  %v1156_v60 = vsel %vm1148_vm13, %v1135_v62, %v1138_v50  ;;  %v1099_v49 = vsub.s32 4, %v1075_v25 }
 0x1df   :  { %vm5311_vm11 = vcmp.le.f32.partialorder %v6520_v38, 0.7853982  ;;  %v1153_v58 = vsel %vm1151_vm8, %v1141_v52, 2102212464  ;;  %v1157_v31 = vsel %vm1151_vm8, %v1144_v21, 920167782  ;;  %v1160_v18 = vsel %vm1148_vm13, %v1138_v50, %v1141_v52 }
 0x1e0   :  { %v1161_v1 = vsel %vm1151_vm8, %v1147_v7, 1326507024  ;;  %v1079_v20 = vsub.s32 0, %v5315_v11  ;;  %vm1150_vm3 = vcmp.lt.s32.totalorder %v1129_v29, 3  ;;  %vm1149_vm14 = vcmp.lt.s32.totalorder %v1129_v29, 2 }
 0x1e1   :  { %v1158_v36 = vsel %vm1150_vm3, %v1141_v52, %v1157_v31  ;;  %v1162_v4 = vsel %vm1150_vm3, %v1144_v21, %v1161_v1  ;;  %v3925_v28 = vadd.s32 4294967169, %v1223_v43  ;;  %v1152_v17 = vsel %vm1148_vm13, %v1132_v47, %v1135_v62 }
 0x1e2   :  { %v3918_v51 = vmin.u32 %v1079_v20, %v5315_v11  ;;  %v1154_v55 = vsel %vm1150_vm3, %v1138_v50, %v1153_v58  ;;  %v1159_v30 = vsel %vm1149_vm14, %v1156_v60, %v1158_v36  ;;  %v994_v46 = vxor.u32 2147483648, %v993_v39 }
 0x1e3   :  { %v1163_v57 = vsel %vm1149_vm14, %v1160_v18, %v1162_v4  ;;  %v5322_v7 = vmul.u32.u64.low %v5275_v56, %v1159_v30  ;;  %v5323_v38 = vmul.u32.u64.high %v5275_v56, %v1159_v30, %v5322_v7  ;;  %v1100_v52 = vsel %vm1015_vm12, %v1099_v49, %v1075_v25 }
 0x1e4   :  { %v1081_v0 = vclz %v3918_v51  ;;  %v5329_v21 = vmul.u32.u64.low %v5275_v56, %v1163_v57  ;;  %v5330_v43 = vmul.u32.u64.high %v5275_v56, %v1163_v57, %v5329_v21  ;;  %4117 = vcosq.f32 %v895_v14 }
 0x1e5   :  { %v5333_v62 = vand.u32 3, %v5282_v2  ;;  %v1155_v50 = vsel %vm1149_vm14, %v1152_v17, %v1154_v55  ;;  %v1229_v47 = vadd.s32 1, %v3925_v28  ;;  %4119 = vsinq.f32 %v895_v14 }
 0x1e6   :  { %v5336_v58 = vand.u32 3, %v2659_v37  ;;  %v3919_v60 = vadd.s32 4294967294, %v1081_v0  ;;  %v1227_v31 = vor.u32 8388608, %v5307_v35  ;;  %v995_v25 = vsel %vm912_vm10, %v994_v46, %v993_v39 }
 0x1e7   :  { %6523 = vst [vmem:[#allocation55_spill] sm:$0xff] %v5333_v62  ;;  %v1102_v1 = vsel %vm5311_vm11, 0, %v1100_v52  ;;  %v1174_v20 = vadd.s32 1, %v5323_v38  ;;  %vm1230_vm15 = vcmp.gt.s32.totalorder %v1229_v47, 0  ;;  %v1171_v2 = vmul.u32 %v5275_v56, %v1155_v50 }
 0x1e8   :  { %6524 = vst [vmem:[#allocation56_spill] sm:$0xff] %v5336_v58  ;;  %vm3920_vm0 = vcmp.lt.s32.totalorder %v3919_v60, 0  ;;  %vm1173_vm6 = vc.u32 %v5330_v43, %v5322_v7  ;;  %v1231_v37 = vsel %vm1230_vm15, %v1229_v47, 0  ;;  %v1069_v0 = vadd.s32 %v5259_v9, %v5264_v27 }
 0x1e9   :  { %v1084_v35 = vsel %vm3920_vm0, 0, %v3919_v60  ;;  %v1175_v29 = vsel %vm1173_vm6, %v1174_v20, %v5323_v38  ;;  %v1233_v14 = vand.u32 31, %v1231_v37  ;;  %v5350_v18 = vand.u32 3, %v1102_v1 }
 0x1ea   :  { %v1085_v39 = vsub.s32 32, %v1084_v35  ;;  %v1089_v49 = vsub.s32 4294967266, %v1084_v35  ;;  %v1176_v36 = vadd.s32 %v1175_v29, %v1171_v2  ;;  %v5355_v56 = vsel %vm5247_vm2, %v5039_v40, %v995_v25 }
 0x1eb   :  { %6525 = vst [vmem:[#allocation57_spill] sm:$0xff] %v5350_v18  ;;  %v1086_v4 = vshll.u32 %v5315_v11, %v1084_v35  ;;  %v5358_v28 = vadd.s32 3, %v1102_v1  ;;  %v1234_v51 = vsub.s32 32, %v1233_v14  ;;  %vm1118_vm10 = vcmp.lt.s32.totalorder %v5187_v63, 0  ;;  %v5371_v35 = vpop.trf.xlu0 }
 0x1ec   :  { %v1087_v9 = vshrl.u32 %v1069_v0, %v1085_v39  ;;  %v1090_v27 = vadd.s32 127, %v1089_v49  ;;  %v1177_v17 = vadd.s32 536870912, %v1176_v36  ;;  %v1236_v55 = vshll.u32 %v6467_v5, %v1233_v14  ;;  %6526 = vst [vmem:[#allocation58_spill] sm:$0xff] %v5371_v35 }
 0x1ed   :  { %v1237_v30 = vshrl.u32 %v6468_v26, %v1234_v51  ;;  %v1239_v46 = vshll.u32 %v6468_v26, %v1233_v14  ;;  %v1240_v45 = vshrl.u32 %v6469_v44, %v1234_v51  ;;  %v1243_v57 = vshrl.u32 %v6470_v22, %v1234_v51 }
 0x1ee   :  { %v1088_v38 = vor.u32 %v1087_v9, %v1086_v4  ;;  %v1091_v11 = vshll.u32 %v1090_v27, 23  ;;  %v1178_v52 = vshrl.u32 %v1177_v17, 30  ;;  %v1246_v21 = vshrl.u32 %v6471_v10, %v1234_v51 }
 0x1ef   :  { %v1232_v50 = vshrl.u32 %v1231_v37, 5  ;;  %v1242_v47 = vshll.u32 %v6469_v44, %v1233_v14  ;;  %v1245_v60 = vshll.u32 %v6470_v22, %v1233_v14  ;;  %v5369_v25 = vshll.u32 %v1227_v31, 8 }
 0x1f0   :  { %v1092_v1 = vor.u32 4788187, %v1091_v11  ;;  %v1179_v20 = vshll.u32 %v1178_v52, 30  ;;  %v1238_v2 = vor.u32 %v1237_v30, %v1236_v55  ;;  %v1241_v0 = vor.u32 %v1240_v45, %v1239_v46 }
 0x1f1   :  { %v1202_v29 = vsub.s32 4, %v1178_v52  ;;  %v1247_v39 = vor.u32 %v1246_v21, %v1245_v60  ;;  %v1248_v49 = vshll.u32 %v6471_v10, %v1233_v14  ;;  %v1249_v4 = vshrl.u32 %v6472_v53, %v1234_v51  ;;  %v5375_v9 = vpop.eup %4117 }
 0x1f2   :  { %6527 = vst [vmem:[#allocation59_spill] sm:$0xff] %v5375_v9  ;;  %v1093_v37 = vand.u32 2147483647, %v1092_v1  ;;  %v1095_v27 = vcvt.s32.f32 %v1088_v38  ;;  %v6528_v17 = vand.u32 2147483647, %v5187_v63  ;;  %v5383_v55 = vsub.s32 %v1176_v36, %v1179_v20  ;;  %v5385_v46 = vpop.eup %4119 }
 0x1f3   :  { %v1244_v30 = vor.u32 %v1243_v57, %v1242_v47  ;;  %6531 = vst [vmem:[#allocation60_spill] sm:$0xff] %v5385_v46  ;;  %v1235_v45 = vshrl.u32 %v6467_v5, %v1234_v51  ;;  %v1250_v14 = vor.u32 %v1249_v4, %v1248_v49  ;;  %v1325_v21 = vand.u32 2139095040, %v5371_v35 }
 0x1f4   :  { %vm5379_vm2 = vcmp.le.f32.partialorder %v6528_v17, 0.7853982  ;;  %v1096_v60 = vmul.f32 %v1095_v27, %v1093_v37  ;;  %v1182_v38 = vsub.s32 0, %v5383_v55  ;;  %vm1251_vm4 = vcmp.lt.s32.totalorder %v1232_v50, 1 }
 0x1f5   :  { %vm1254_vm5 = vcmp.lt.s32.totalorder %v1232_v50, 4  ;;  %v1203_v1 = vsel %vm1118_vm10, %v1202_v29, %v1178_v52  ;;  %vm1252_vm7 = vcmp.lt.s32.totalorder %v1232_v50, 2  ;;  %v1259_v36 = vsel %vm1251_vm4, %v1238_v2, %v1241_v0 }
 0x1f6   :  { %v1260_v57 = vsel %vm1254_vm5, %v1247_v39, 920167782  ;;  %v3922_v47 = vmin.u32 %v1182_v38, %v5383_v55  ;;  %vm1253_vm9 = vcmp.lt.s32.totalorder %v1232_v50, 3  ;;  %v1256_v51 = vsel %vm1254_vm5, %v1244_v30, 2102212464  ;;  %v5401_v38 = vpop.trf.xlu0 }
 0x1f7   :  { %v1263_v20 = vsel %vm1251_vm4, %v1241_v0, %v1244_v30  ;;  %v1097_v49 = vxor.u32 2147483648, %v1096_v60  ;;  %v1261_v4 = vsel %vm1253_vm9, %v1244_v30, %v1260_v57  ;;  %v1264_v17 = vsel %vm1254_vm5, %v1250_v14, 1326507024  ;;  %6532 = vst [vmem:[#allocation61_spill] sm:$0xff] %v5401_v38 }
 0x1f8   :  { %v1326_v11 = vshrl.u32 %v1325_v21, 23  ;;  %v1184_v37 = vclz %v3922_v47  ;;  %v1255_v27 = vsel %vm1251_vm4, %v1235_v45, %v1238_v2  ;;  %v1262_v18 = vsel %vm1252_vm7, %v1259_v36, %v1261_v4 }
 0x1f9   :  { %v1265_v9 = vsel %vm1253_vm9, %v1247_v39, %v1264_v17  ;;  %v1257_v46 = vsel %vm1253_vm9, %v1241_v0, %v1256_v51  ;;  %v5397_v29 = vmul.u32.u64.low %v5369_v25, %v1262_v18  ;;  %v5398_v58 = vmul.u32.u64.high %v5369_v25, %v1262_v18, %v5397_v29 }
 0x1fa   :  { %v1266_v52 = vsel %vm1252_vm7, %v1263_v20, %v1265_v9  ;;  %4121 = vcosq.f32 %v5355_v56  ;;  %v3923_v30 = vadd.s32 4294967294, %v1184_v37  ;;  %v1098_v2 = vsel %vm1015_vm12, %v1097_v49, %v1096_v60 }
 0x1fb   :  { %v5405_v14 = vmul.u32.u64.low %v5369_v25, %v1266_v52  ;;  %v5406_v21 = vmul.u32.u64.high %v5369_v25, %v1266_v52, %v5405_v14  ;;  %v1205_v0 = vsel %vm5379_vm2, 0, %v1203_v1  ;;  %v3929_v39 = vadd.s32 4294967169, %v1326_v11 }
 0x1fc   :  { %v6533_v18 = vand.u32 2147483647, %v5371_v35  ;;  %v5415_v45 = vand.u32 3, %v5358_v28  ;;  %vm3924_vm13 = vcmp.lt.s32.totalorder %v3923_v30, 0  ;;  %v1258_v36 = vsel %vm1252_vm7, %v1255_v27, %v1257_v46 }
 0x1fd   :  { %v6407_v57 = vand.u32 2147483647, %v5401_v38  ;;  %v1172_v47 = vadd.s32 %v5322_v7, %v5330_v43  ;;  %v1187_v51 = vsel %vm3924_vm13, 0, %v3923_v30  ;;  %v1277_v60 = vadd.s32 1, %v5398_v58 }
 0x1fe   :  { %v1329_v9 = vand.u32 8388607, %v6533_v18  ;;  %6534 = vst [vmem:[#allocation62_spill] sm:$0xff] %v5415_v45  ;;  %v1332_v20 = vadd.s32 1, %v3929_v39  ;;  %v1101_v11 = vsel %vm5311_vm11, %v5145_v33, %v1098_v2  ;;  %v1188_v1 = vsub.s32 32, %v1187_v51 }
 0x1ff   :  { %v1192_v49 = vsub.s32 4294967266, %v1187_v51  ;;  %v2867_v28 = vadd.s32 3, %v1205_v0  ;;  %v1274_v4 = vmul.u32 %v5369_v25, %v1258_v36  ;;  %vm1276_vm12 = vc.u32 %v5406_v21, %v5397_v29 }
 0x200   :  { %v1330_v50 = vor.u32 8388608, %v1329_v9  ;;  %vm1333_vm8 = vcmp.gt.s32.totalorder %v1332_v20, 0  ;;  %v1278_v7 = vsel %vm1276_vm12, %v1277_v60, %v5398_v58  ;;  %v1428_v17 = vand.u32 2139095040, %v5401_v38 }
 0x201   :  { %v1193_v46 = vadd.s32 127, %v1192_v49  ;;  %v1334_v43 = vsel %vm1333_vm8, %v1332_v20, 0  ;;  %4123 = vsinq.f32 %v5355_v56  ;;  %v5431_v13 = vand.u32 3, %v1205_v0 }
 0x202   :  { %v1279_v37 = vadd.s32 %v1278_v7, %v1274_v4  ;;  %v1336_v27 = vand.u32 31, %v1334_v43  ;;  %4125 = vcosq.f32 %v1101_v11  ;;  %v1190_v52 = vshrl.u32 %v1172_v47, %v1188_v1 }
 0x203   :  { %6535 = vst [vmem:[#allocation63_spill] sm:$0xff] %v5431_v13  ;;  %v1194_v25 = vshll.u32 %v1193_v46, 23  ;;  %v5433_v30 = vand.u32 3, %v2867_v28  ;;  %vm1221_vm11 = vcmp.lt.s32.totalorder %v5266_v24, 0  ;;  %4127 = vsinq.f32 %v1101_v11 }
 0x204   :  { %v1280_v14 = vadd.s32 536870912, %v1279_v37  ;;  %v1337_v2 = vsub.s32 32, %v1336_v27  ;;  %v5438_v58 = vand.u32 8388607, %v6407_v57  ;;  %v1189_v56 = vshll.u32 %v5383_v55, %v1187_v51 }
 0x205   :  { %6536 = vst [vmem:[#allocation64_spill] sm:$0xff] %v5433_v30  ;;  %v1195_v0 = vor.u32 4788187, %v1194_v25  ;;  %v5441_v39 = vshll.u32 %v1330_v50, 8  ;;  %v1429_v18 = vshrl.u32 %v1428_v17, 23  ;;  %v1335_v60 = vshrl.u32 %v1334_v43, 5 }
 0x206   :  { %v6537_v9 = vand.u32 2147483647, %v5266_v24  ;;  %v1281_v47 = vshrl.u32 %v1280_v14, 30  ;;  %v1340_v20 = vshrl.u32 %v6468_v26, %v1337_v2  ;;  %v1343_v11 = vshrl.u32 %v6469_v44, %v1337_v2 }
 0x207   :  { %v1191_v1 = vor.u32 %v1190_v52, %v1189_v56  ;;  %v1339_v49 = vshll.u32 %v6467_v5, %v1336_v27  ;;  %v1346_v55 = vshrl.u32 %v6470_v22, %v1337_v2  ;;  %v1349_v51 = vshrl.u32 %v6471_v10, %v1337_v2  ;;  %v5454_v28 = vpop.eup %4121 }
 0x208   :  { %vm5445_vm3 = vcmp.le.f32.partialorder %v6537_v9, 0.7853982  ;;  %6540 = vst [vmem:[#allocation65_spill] sm:$0xff] %v5454_v28  ;;  %v1282_v4 = vshll.u32 %v1281_v47, 30  ;;  %v1305_v50 = vsub.s32 4, %v1281_v47  ;;  %v1342_v46 = vshll.u32 %v6468_v26, %v1336_v27 }
 0x209   :  { %v1345_v7 = vshll.u32 %v6469_v44, %v1336_v27  ;;  %v1196_v43 = vand.u32 2147483647, %v1195_v0  ;;  %v1348_v17 = vshll.u32 %v6470_v22, %v1336_v27  ;;  %v1351_v25 = vshll.u32 %v6471_v10, %v1336_v27 }
 0x20a   :  { %v1352_v52 = vshrl.u32 %v6472_v53, %v1337_v2  ;;  %v5461_v14 = vsub.s32 %v1279_v37, %v1282_v4  ;;  %v1341_v56 = vor.u32 %v1340_v20, %v1339_v49  ;;  %v1344_v9 = vor.u32 %v1343_v11, %v1342_v46 }
 0x20b   :  { %v1347_v57 = vor.u32 %v1346_v55, %v1345_v7  ;;  %v1198_v45 = vcvt.s32.f32 %v1191_v1  ;;  %v1275_v33 = vadd.s32 %v5397_v29, %v5406_v21  ;;  %v1350_v30 = vor.u32 %v1349_v51, %v1348_v17 }
 0x20c   :  { %v1433_v13 = vor.u32 8388608, %v5438_v58  ;;  %v1285_v0 = vsub.s32 0, %v5461_v14  ;;  %v1306_v28 = vsel %vm1221_vm11, %v1305_v50, %v1281_v47  ;;  %v1353_v27 = vor.u32 %v1352_v52, %v1351_v25  ;;  %v5486_v52 = vpop.trf.xlu0 }
 0x20d   :  { %v3933_v40 = vadd.s32 4294967169, %v1429_v18  ;;  %v1199_v62 = vmul.f32 %v1198_v45, %v1196_v43  ;;  %v1338_v37 = vshrl.u32 %v6467_v5, %v1337_v2  ;;  %vm1354_vm14 = vcmp.lt.s32.totalorder %v1335_v60, 1 }
 0x20e   :  { %vm1357_vm15 = vcmp.lt.s32.totalorder %v1335_v60, 4  ;;  %v3926_v20 = vmin.u32 %v1285_v0, %v5461_v14  ;;  %vm1355_vm0 = vcmp.lt.s32.totalorder %v1335_v60, 2  ;;  %v1362_v29 = vsel %vm1354_vm14, %v1341_v56, %v1344_v9  ;;  %v5471_v21 = vpop.eup %4123 }
 0x20f   :  { %v1359_v11 = vsel %vm1357_vm15, %v1347_v57, 2102212464  ;;  %6541 = vst [vmem:[#allocation66_spill] sm:$0xff] %v5471_v21  ;;  %v1308_v58 = vsel %vm5445_vm3, 0, %v1306_v28  ;;  %vm1356_vm6 = vcmp.lt.s32.totalorder %v1335_v60, 3  ;;  %v1366_v47 = vsel %vm1354_vm14, %v1344_v9, %v1347_v57  ;;  %v5475_v49 = vpop.eup %4125 }
 0x210   :  { %v1363_v1 = vsel %vm1357_vm15, %v1350_v30, 920167782  ;;  %6542 = vst [vmem:[#allocation67_spill] sm:$0xff] %v5475_v49  ;;  %v1287_v45 = vclz %v3926_v20  ;;  %v1358_v18 = vsel %vm1354_vm14, %v1338_v37, %v1341_v56  ;;  %v1367_v55 = vsel %vm1357_vm15, %v1353_v27, 1326507024  ;;  %v5477_v51 = vpop.eup %4127 }
 0x211   :  { %v1364_v2 = vsel %vm1356_vm6, %v1347_v57, %v1363_v1  ;;  %6543 = vst [vmem:[#allocation68_spill] sm:$0xff] %v5477_v51  ;;  %v1360_v4 = vsel %vm1356_vm6, %v1344_v9, %v1359_v11  ;;  %v1368_v46 = vsel %vm1356_vm6, %v1350_v30, %v1367_v55  ;;  %v1435_v7 = vadd.s32 1, %v3933_v40 }
 0x212   :  { %v1365_v50 = vsel %vm1355_vm0, %v1362_v29, %v1364_v2  ;;  %v3927_v43 = vadd.s32 4294967294, %v1287_v45  ;;  %v1369_v17 = vsel %vm1355_vm0, %v1366_v47, %v1368_v46  ;;  %v1200_v56 = vxor.u32 2147483648, %v1199_v62 }
 0x213   :  { %v5482_v28 = vmul.u32.u64.low %v5441_v39, %v1365_v50  ;;  %v5483_v25 = vmul.u32.u64.high %v5441_v39, %v1365_v50, %v5482_v28  ;;  %v5489_v57 = vmul.u32.u64.low %v5441_v39, %v1369_v17  ;;  %v5490_v0 = vmul.u32.u64.high %v5441_v39, %v1369_v17, %v5489_v57 }
 0x214   :  { %vm1436_vm4 = vcmp.gt.s32.totalorder %v1435_v7, 0  ;;  %vm3928_vm5 = vcmp.lt.s32.totalorder %v3927_v43, 0  ;;  %v1361_v30 = vsel %vm1355_vm0, %v1358_v18, %v1360_v4  ;;  %v5493_v9 = vshll.u32 %v1433_v13, 8 }
 0x215   :  { %v1437_v40 = vsel %vm1436_vm4, %v1435_v7, 0  ;;  %v1290_v27 = vsel %vm3928_vm5, 0, %v3927_v43  ;;  %v5495_v37 = vand.u32 3, %v1308_v58  ;;  %v2971_v47 = vadd.s32 3, %v1308_v58 }
 0x216   :  { %v1439_v20 = vand.u32 31, %v1437_v40  ;;  %v1291_v29 = vsub.s32 32, %v1290_v27  ;;  %v1295_v1 = vsub.s32 4294967266, %v1290_v27  ;;  %v1380_v45 = vadd.s32 1, %v5483_v25 }
 0x217   :  { %6544 = vst [vmem:[#allocation69_spill] sm:$0xff] %v5495_v37  ;;  %v1201_v2 = vsel %vm1118_vm10, %v1200_v56, %v1199_v62  ;;  %v1377_v60 = vmul.u32 %v5441_v39, %v1361_v30  ;;  %vm1379_vm7 = vc.u32 %v5490_v0, %v5482_v28  ;;  %v1292_v18 = vshll.u32 %v5461_v14, %v1290_v27 }
 0x218   :  { %v1440_v13 = vsub.s32 32, %v1439_v20  ;;  %v1293_v55 = vshrl.u32 %v1275_v33, %v1291_v29  ;;  %v1296_v4 = vadd.s32 127, %v1295_v1  ;;  %v1381_v50 = vsel %vm1379_vm7, %v1380_v45, %v5483_v25 }
 0x219   :  { %vm1324_vm9 = vcmp.lt.s32.totalorder %v5371_v35, 0  ;;  %v1382_v58 = vadd.s32 %v1381_v50, %v1377_v60  ;;  %v1442_v46 = vshll.u32 %v6467_v5, %v1439_v20  ;;  %v1445_v17 = vshll.u32 %v6468_v26, %v1439_v20 }
 0x21a   :  { %v1443_v7 = vshrl.u32 %v6468_v26, %v1440_v13  ;;  %v1446_v62 = vshrl.u32 %v6469_v44, %v1440_v13  ;;  %v1294_v39 = vor.u32 %v1293_v55, %v1292_v18  ;;  %v1297_v43 = vshll.u32 %v1296_v4, 23 }
 0x21b   :  { %v1449_v56 = vshrl.u32 %v6470_v22, %v1440_v13  ;;  %v1383_v14 = vadd.s32 536870912, %v1382_v58  ;;  %v1438_v33 = vshrl.u32 %v1437_v40, 5  ;;  %v1448_v25 = vshll.u32 %v6469_v44, %v1439_v20 }
 0x21c   :  { %v1444_v57 = vor.u32 %v1443_v7, %v1442_v46  ;;  %v1298_v30 = vor.u32 4788187, %v1297_v43  ;;  %v6545_v27 = vand.u32 2147483647, %v5371_v35  ;;  %v1447_v1 = vor.u32 %v1446_v62, %v1445_v17 }
 0x21d   :  { %v1451_v45 = vshll.u32 %v6470_v22, %v1439_v20  ;;  %v1452_v60 = vshrl.u32 %v6471_v10, %v1440_v13  ;;  %v1204_v18 = vsel %vm5379_vm2, %v5187_v63, %v1201_v2  ;;  %v1301_v40 = vcvt.s32.f32 %v1294_v39 }
 0x21e   :  { %vm5515_vm10 = vcmp.le.f32.partialorder %v6545_v27, 0.7853982  ;;  %v1384_v55 = vshrl.u32 %v1383_v14, 30  ;;  %v1455_v4 = vshrl.u32 %v6472_v53, %v1440_v13  ;;  %v1299_v50 = vand.u32 2147483647, %v1298_v30 }
 0x21f   :  { %v1450_v46 = vor.u32 %v1449_v56, %v1448_v25  ;;  %v1453_v7 = vor.u32 %v1452_v60, %v1451_v45  ;;  %v1454_v43 = vshll.u32 %v6471_v10, %v1439_v20  ;;  %v1441_v62 = vshrl.u32 %v6467_v5, %v1440_v13 }
 0x220   :  { %v1385_v27 = vshll.u32 %v1384_v55, 30  ;;  %v1408_v11 = vsub.s32 4, %v1384_v55  ;;  %vm1457_vm13 = vcmp.lt.s32.totalorder %v1438_v33, 1  ;;  %v1302_v17 = vmul.f32 %v1301_v40, %v1299_v50 }
 0x221   :  { %v1456_v37 = vor.u32 %v1455_v4, %v1454_v43  ;;  %vm1460_vm12 = vcmp.lt.s32.totalorder %v1438_v33, 4  ;;  %v1465_v31 = vsel %vm1457_vm13, %v1444_v57, %v1447_v1  ;;  %vm1458_vm2 = vcmp.lt.s32.totalorder %v1438_v33, 2 }
 0x222   :  { %v5528_v2 = vsub.s32 %v1382_v58, %v1385_v27  ;;  %vm1459_vm8 = vcmp.lt.s32.totalorder %v1438_v33, 3  ;;  %v1466_v39 = vsel %vm1460_vm12, %v1453_v7, 920167782  ;;  %v1303_v56 = vxor.u32 2147483648, %v1302_v17 }
 0x223   :  { %v1409_v20 = vsel %vm1324_vm9, %v1408_v11, %v1384_v55  ;;  %v1462_v14 = vsel %vm1460_vm12, %v1450_v46, 2102212464  ;;  %v1467_v13 = vsel %vm1459_vm8, %v1450_v46, %v1466_v39  ;;  %4129 = vcosq.f32 %v1204_v18 }
 0x224   :  { %v5535_v25 = vand.u32 3, %v2971_v47  ;;  %v1388_v30 = vsub.s32 0, %v5528_v2  ;;  %v1468_v58 = vsel %vm1458_vm2, %v1465_v31, %v1467_v13  ;;  %v1461_v45 = vsel %vm1457_vm13, %v1441_v62, %v1444_v57 }
 0x225   :  { %v1469_v60 = vsel %vm1457_vm13, %v1447_v1, %v1450_v46  ;;  %v1470_v40 = vsel %vm1460_vm12, %v1456_v37, 1326507024  ;;  %v1531_v4 = vand.u32 2139095040, %v5486_v52  ;;  %v1411_v55 = vsel %vm5515_vm10, 0, %v1409_v20  ;;  %v5555_v37 = vpop.trf.xlu0 }
 0x226   :  { %6548 = vst [vmem:[#allocation70_spill] sm:$0xff] %v5535_v25  ;;  %v3930_v11 = vmin.u32 %v1388_v30, %v5528_v2  ;;  %v1463_v47 = vsel %vm1459_vm8, %v1447_v1, %v1462_v14  ;;  %v1471_v50 = vsel %vm1459_vm8, %v1453_v7, %v1470_v40  ;;  %v1304_v43 = vsel %vm1221_vm11, %v1303_v56, %v1302_v17 }
 0x227   :  { %v1472_v57 = vsel %vm1458_vm2, %v1469_v60, %v1471_v50  ;;  %v5552_v46 = vmul.u32.u64.low %v5493_v9, %v1468_v58  ;;  %v5553_v27 = vmul.u32.u64.high %v5493_v9, %v1468_v58, %v5552_v46  ;;  %4131 = vsinq.f32 %v1204_v18 }
 0x228   :  { %v1390_v62 = vclz %v3930_v11  ;;  %v5558_v31 = vmul.u32.u64.low %v5493_v9, %v1472_v57  ;;  %v5559_v39 = vmul.u32.u64.high %v5493_v9, %v1472_v57, %v5558_v31  ;;  %v1378_v1 = vadd.s32 %v5482_v28, %v5490_v0 }
 0x229   :  { %v1464_v7 = vsel %vm1458_vm2, %v1461_v45, %v1463_v47  ;;  %v1532_v17 = vshrl.u32 %v1531_v4, 23  ;;  %v6549_v56 = vand.u32 2147483647, %v5486_v52  ;;  %v1307_v14 = vsel %vm5445_vm3, %v5266_v24, %v1304_v43  ;;  %v5578_v43 = vpop.trf.xlu0 }
 0x22a   :  { %v3931_v13 = vadd.s32 4294967294, %v1390_v62  ;;  %v5569_v18 = vand.u32 3, %v1411_v55  ;;  %v1634_v30 = vand.u32 2139095040, %v5555_v37  ;;  %v3075_v58 = vadd.s32 3, %v1411_v55 }
 0x22b   :  { %v1535_v20 = vand.u32 8388607, %v6549_v56  ;;  %v1483_v60 = vadd.s32 1, %v5553_v27  ;;  %v3937_v40 = vadd.s32 4294967169, %v1532_v17  ;;  %v6418_v28 = vand.u32 2147483647, %v5555_v37 }
 0x22c   :  { %6550 = vst [vmem:[#allocation71_spill] sm:$0xff] %v5569_v18  ;;  %vm3932_vm11 = vcmp.lt.s32.totalorder %v3931_v13, 0  ;;  %v1480_v0 = vmul.u32 %v5493_v9, %v1464_v7  ;;  %vm1482_vm14 = vc.u32 %v5559_v39, %v5552_v46  ;;  %v1635_v33 = vshrl.u32 %v1634_v30, 23 }
 0x22d   :  { %4133 = vcosq.f32 %v1307_v14  ;;  %v1393_v36 = vsel %vm3932_vm11, 0, %v3931_v13  ;;  %v1484_v45 = vsel %vm1482_vm14, %v1483_v60, %v5553_v27  ;;  %v1538_v4 = vadd.s32 1, %v3937_v40 }
 0x22e   :  { %v1394_v11 = vsub.s32 32, %v1393_v36  ;;  %v1398_v47 = vsub.s32 4294967266, %v1393_v36  ;;  %vm1427_vm3 = vcmp.lt.s32.totalorder %v5401_v38, 0  ;;  %v1485_v55 = vadd.s32 %v1484_v45, %v1480_v0 }
 0x22f   :  { %v1536_v50 = vor.u32 8388608, %v1535_v20  ;;  %v1395_v57 = vshll.u32 %v5528_v2, %v1393_v36  ;;  %vm1539_vm15 = vcmp.gt.s32.totalorder %v1538_v4, 0  ;;  %v3941_v9 = vadd.s32 4294967169, %v1635_v33 }
 0x230   :  { %v1638_v62 = vand.u32 8388607, %v6418_v28  ;;  %v1396_v31 = vshrl.u32 %v1378_v1, %v1394_v11  ;;  %v1399_v7 = vadd.s32 127, %v1398_v47  ;;  %v1486_v17 = vadd.s32 536870912, %v1485_v55  ;;  %v5583_v56 = vpop.eup %4129 }
 0x231   :  { %v1540_v27 = vsel %vm1539_vm15, %v1538_v4, 0  ;;  %6551 = vst [vmem:[#allocation72_spill] sm:$0xff] %v5583_v56  ;;  %4135 = vsinq.f32 %v1307_v14  ;;  %v5585_v13 = vand.u32 3, %v3075_v58  ;;  %v6553_v2 = vand.u32 2147483647, %v5401_v38 }
 0x232   :  { %v1542_v30 = vand.u32 31, %v1540_v27  ;;  %v1397_v60 = vor.u32 %v1396_v31, %v1395_v57  ;;  %v1400_v40 = vshll.u32 %v1399_v7, 23  ;;  %v1487_v1 = vshrl.u32 %v1486_v17, 30 }
 0x233   :  { %6552 = vst [vmem:[#allocation73_spill] sm:$0xff] %v5585_v13  ;;  %vm5590_vm0 = vcmp.le.f32.partialorder %v6553_v2, 0.7853982  ;;  %v5594_v33 = vshll.u32 %v1536_v50, 8  ;;  %v5597_v36 = vadd.s32 %v5552_v46, %v5559_v39  ;;  %v5599_v14 = vshrl.u32 %v1540_v27, 5 }
 0x234   :  { %v1543_v58 = vsub.s32 32, %v1542_v30  ;;  %v1639_v45 = vor.u32 8388608, %v1638_v62  ;;  %v1401_v4 = vor.u32 4788187, %v1400_v40  ;;  %v1488_v11 = vshll.u32 %v1487_v1, 30  ;;  %v5601_v31 = vpop.eup %4131 }
 0x235   :  { %v1511_v47 = vsub.s32 4, %v1487_v1  ;;  %v1641_v57 = vadd.s32 1, %v3941_v9  ;;  %6556 = vst [vmem:[#allocation74_spill] sm:$0xff] %v5601_v31  ;;  %v1545_v7 = vshll.u32 %v6467_v5, %v1542_v30  ;;  %v1404_v39 = vcvt.s32.f32 %v1397_v60 }
 0x236   :  { %v1546_v2 = vshrl.u32 %v6468_v26, %v1543_v58  ;;  %v1549_v50 = vshrl.u32 %v6469_v44, %v1543_v58  ;;  %v1552_v17 = vshrl.u32 %v6470_v22, %v1543_v58  ;;  %v1402_v46 = vand.u32 2147483647, %v1401_v4  ;;  %v5617_v4 = vpop.permute.xlu1 %3707 }
 0x237   :  { %v5607_v27 = vsub.s32 %v1485_v55, %v1488_v11  ;;  %v1551_v62 = vshll.u32 %v6469_v44, %v1542_v30  ;;  %v1512_v40 = vsel %vm1427_vm3, %v1511_v47, %v1487_v1  ;;  %v1548_v9 = vshll.u32 %v6468_v26, %v1542_v30  ;;  %6557 = vst [vmem:[#allocation75_spill] sm:$0xff] %v5617_v4 }
 0x238   :  { %v1554_v28 = vshll.u32 %v6470_v22, %v1542_v30  ;;  %v5614_v20 = vshll.u32 %v1639_v45, 8  ;;  %v1405_v25 = vmul.f32 %v1404_v39, %v1402_v46  ;;  %v1547_v49 = vor.u32 %v1546_v2, %v1545_v7 }
 0x239   :  { %v1491_v24 = vsub.s32 0, %v5607_v27  ;;  %v1553_v51 = vor.u32 %v1552_v17, %v1551_v62  ;;  %v1550_v55 = vor.u32 %v1549_v50, %v1548_v9  ;;  %v1555_v60 = vshrl.u32 %v6471_v10, %v1543_v58 }
 0x23a   :  { %v1557_v11 = vshll.u32 %v6471_v10, %v1542_v30  ;;  %v1558_v1 = vshrl.u32 %v6472_v53, %v1543_v58  ;;  %v5622_v47 = vpop.eup %4133  ;;  %v1406_v13 = vxor.u32 2147483648, %v1405_v25  ;;  %v1544_v46 = vshrl.u32 %v6467_v5, %v1543_v58 }
 0x23b   :  { %6558 = vst [vmem:[#allocation76_spill] sm:$0xff] %v5622_v47  ;;  %v3934_v45 = vmin.u32 %v1491_v24, %v5607_v27  ;;  %v1737_v39 = vand.u32 2139095040, %v5578_v43  ;;  %v5629_v7 = vsel %vm5590_vm0, 0, %v1512_v40  ;;  %v1556_v2 = vor.u32 %v1555_v60, %v1554_v28  ;;  %v5648_v60 = vpop.permute.xlu1 %3709 }
 0x23c   :  { %v1559_v50 = vor.u32 %v1558_v1, %v1557_v11  ;;  %vm1563_vm6 = vcmp.lt.s32.totalorder %v5599_v14, 4  ;;  %v1407_v30 = vsel %vm1324_vm9, %v1406_v13, %v1405_v25  ;;  %vm1560_vm4 = vcmp.lt.s32.totalorder %v5599_v14, 1 }
 0x23d   :  { %v1493_v17 = vclz %v3934_v45  ;;  %v1565_v24 = vsel %vm1563_vm6, %v1553_v51, 2102212464  ;;  %vm1561_vm5 = vcmp.lt.s32.totalorder %v5599_v14, 2  ;;  %vm1562_vm7 = vcmp.lt.s32.totalorder %v5599_v14, 3 }
 0x23e   :  { %v1568_v58 = vsel %vm1560_vm4, %v1547_v49, %v1550_v55  ;;  %v1569_v28 = vsel %vm1563_vm6, %v1556_v2, 920167782  ;;  %v5641_v62 = vpop.eup %4135  ;;  %v5646_v25 = vsel %vm5515_vm10, %v5371_v35, %v1407_v30  ;;  %v1564_v40 = vsel %vm1560_vm4, %v1544_v46, %v1547_v49 }
 0x23f   :  { %6559 = vst [vmem:[#allocation77_spill] sm:$0xff] %v5641_v62  ;;  %v3935_v13 = vadd.s32 4294967294, %v1493_v17  ;;  %v1570_v9 = vsel %vm1562_vm7, %v1553_v51, %v1569_v28  ;;  %v1566_v11 = vsel %vm1562_vm7, %v1550_v55, %v1565_v24  ;;  %v1572_v45 = vsel %vm1560_vm4, %v1550_v55, %v1553_v51 }
 0x240   :  { %v1571_v1 = vsel %vm1561_vm5, %v1568_v58, %v1570_v9  ;;  %v1573_v47 = vsel %vm1563_vm6, %v1559_v50, 1326507024  ;;  %v5660_v49 = vadd.s32 3, %v5629_v7  ;;  %vm1642_vm10 = vcmp.gt.s32.totalorder %v1641_v57, 0 }
 0x241   :  { %vm3936_vm9 = vcmp.lt.s32.totalorder %v3935_v13, 0  ;;  %v1574_v62 = vsel %vm1562_vm7, %v1556_v2, %v1573_v47  ;;  %v5655_v4 = vmul.u32.u64.low %v5594_v33, %v1571_v1  ;;  %v5656_v29 = vmul.u32.u64.high %v5594_v33, %v1571_v1, %v5655_v4  ;;  %v5675_v1 = vpop.permute.xlu1 %3713 }
 0x242   :  { %v1496_v30 = vsel %vm3936_vm9, 0, %v3935_v13  ;;  %v1575_v46 = vsel %vm1561_vm5, %v1572_v45, %v1574_v62  ;;  %v1567_v55 = vsel %vm1561_vm5, %v1564_v40, %v1566_v11  ;;  %v1643_v50 = vsel %vm1642_vm10, %v1641_v57, 0 }
 0x243   :  { %v1497_v17 = vsub.s32 32, %v1496_v30  ;;  %v1501_v51 = vsub.s32 4294967266, %v1496_v30  ;;  %4137 = vcosq.f32 %v5646_v25  ;;  %v1645_v24 = vand.u32 31, %v1643_v50 }
 0x244   :  { %v5668_v47 = vmul.u32.u64.low %v5594_v33, %v1575_v46  ;;  %v5669_v2 = vmul.u32.u64.high %v5594_v33, %v1575_v46, %v5668_v47  ;;  %v1498_v58 = vshll.u32 %v5607_v27, %v1496_v30  ;;  %v1586_v62 = vadd.s32 1, %v5656_v29 }
 0x245   :  { %v1499_v28 = vshrl.u32 %v5597_v36, %v1497_v17  ;;  %v1502_v13 = vadd.s32 127, %v1501_v51  ;;  %v1583_v9 = vmul.u32 %v5594_v33, %v1567_v55  ;;  %v5677_v14 = vshrl.u32 %v1643_v50, 5 }
 0x246   :  { %v1646_v57 = vsub.s32 32, %v1645_v24  ;;  %v1738_v40 = vshrl.u32 %v1737_v39, 23  ;;  %v1648_v46 = vshll.u32 %v6467_v5, %v1645_v24  ;;  %v1651_v47 = vshll.u32 %v6468_v26, %v1645_v24 }
 0x247   :  { %v1500_v11 = vor.u32 %v1499_v28, %v1498_v58  ;;  %v1503_v45 = vshll.u32 %v1502_v13, 23  ;;  %vm1585_vm13 = vc.u32 %v5669_v2, %v5655_v4  ;;  %v1654_v27 = vshll.u32 %v6469_v44, %v1645_v24 }
 0x248   :  { %v1649_v36 = vshrl.u32 %v6468_v26, %v1646_v57  ;;  %v1657_v33 = vshll.u32 %v6470_v22, %v1645_v24  ;;  %vm1530_vm12 = vcmp.lt.s32.totalorder %v5486_v52, 0  ;;  %v1587_v39 = vsel %vm1585_vm13, %v1586_v62, %v5656_v29 }
 0x249   :  { %v1504_v30 = vor.u32 4788187, %v1503_v45  ;;  %v1652_v17 = vshrl.u32 %v6469_v44, %v1646_v57  ;;  %v1660_v51 = vshll.u32 %v6471_v10, %v1645_v24  ;;  %v6560_v55 = vand.u32 2147483647, %v5486_v52 }
 0x24a   :  { %v1588_v58 = vadd.s32 %v1587_v39, %v1583_v9  ;;  %v1650_v28 = vor.u32 %v1649_v36, %v1648_v46  ;;  %v1655_v13 = vshrl.u32 %v6470_v22, %v1646_v57  ;;  %v1658_v45 = vshrl.u32 %v6471_v10, %v1646_v57 }
 0x24b   :  { %vm5692_vm2 = vcmp.le.f32.partialorder %v6560_v55, 0.7853982  ;;  %v1505_v18 = vand.u32 2147483647, %v1504_v30  ;;  %v1507_v35 = vcvt.s32.f32 %v1500_v11  ;;  %v1653_v56 = vor.u32 %v1652_v17, %v1651_v47  ;;  %v5700_v55 = vpop.permute.xlu1 %3717 }
 0x24c   :  { %v1661_v29 = vshrl.u32 %v6472_v53, %v1646_v57  ;;  %v1589_v62 = vadd.s32 536870912, %v1588_v58  ;;  %v1647_v24 = vshrl.u32 %v6467_v5, %v1646_v57  ;;  %v1656_v31 = vor.u32 %v1655_v13, %v1654_v27 }
 0x24d   :  { %v1659_v63 = vor.u32 %v1658_v45, %v1657_v33  ;;  %v1508_v21 = vmul.f32 %v1507_v35, %v1505_v18  ;;  %vm1663_vm8 = vcmp.lt.s32.totalorder %v5677_v14, 1  ;;  %vm1666_vm11 = vcmp.lt.s32.totalorder %v5677_v14, 4 }
 0x24e   :  { %v1662_v59 = vor.u32 %v1661_v29, %v1660_v51  ;;  %v1590_v9 = vshrl.u32 %v1589_v62, 30  ;;  %vm1664_vm14 = vcmp.lt.s32.totalorder %v5677_v14, 2  ;;  %v1668_v11 = vsel %vm1666_vm11, %v1656_v31, 2102212464 }
 0x24f   :  { %v1671_v46 = vsel %vm1663_vm8, %v1650_v28, %v1653_v56  ;;  %v1509_v47 = vxor.u32 2147483648, %v1508_v21  ;;  %vm1665_vm15 = vcmp.lt.s32.totalorder %v5677_v14, 3  ;;  %v1667_v57 = vsel %vm1663_vm8, %v1647_v24, %v1650_v28  ;;  %v5725_v62 = vpop.permute.xlu1 %3721 }
 0x250   :  { %v1672_v36 = vsel %vm1666_vm11, %v1659_v63, 920167782  ;;  %v1591_v35 = vshll.u32 %v1590_v9, 30  ;;  %v1614_v18 = vsub.s32 4, %v1590_v9  ;;  %v1675_v33 = vsel %vm1663_vm8, %v1653_v56, %v1656_v31  ;;  %v5710_v30 = vpop.eup %4137 }
 0x251   :  { %v1673_v27 = vsel %vm1665_vm15, %v1656_v31, %v1672_v36  ;;  %v1510_v39 = vsel %vm1427_vm3, %v1509_v47, %v1508_v21  ;;  %v1669_v17 = vsel %vm1665_vm15, %v1653_v56, %v1668_v11  ;;  %v1676_v13 = vsel %vm1666_vm11, %v1662_v59, 1326507024 }
 0x252   :  { %v1674_v51 = vsel %vm1664_vm14, %v1671_v46, %v1673_v27  ;;  %v1513_v28 = vsel %vm5590_vm0, %v5401_v38, %v1510_v39  ;;  %v5721_v45 = vsub.s32 %v1588_v58, %v1591_v35  ;;  %v1615_v31 = vsel %vm1530_vm12, %v1614_v18, %v1590_v9 }
 0x253   :  { %v1677_v29 = vsel %vm1665_vm15, %v1659_v63, %v1676_v13  ;;  %4139 = vsinq.f32 %v5646_v25  ;;  %v1617_v21 = vsel %vm5692_vm2, 0, %v1615_v31  ;;  %v3945_v56 = vadd.s32 4294967169, %v1738_v40 }
 0x254   :  { %v1678_v59 = vsel %vm1664_vm14, %v1675_v33, %v1677_v29  ;;  %4141 = vcosq.f32 %v1513_v28  ;;  %v5733_v0 = vand.u32 3, %v5629_v7  ;;  %v1594_v58 = vsub.s32 0, %v5721_v45  ;;  %v5755_v33 = vpop.permute.xlu1 %3725 }
 0x255   :  { %v1670_v63 = vsel %vm1664_vm14, %v1667_v57, %v1669_v17  ;;  %v5739_v24 = vmul.u32.u64.low %v5614_v20, %v1678_v59  ;;  %v5740_v9 = vmul.u32.u64.high %v5614_v20, %v1678_v59, %v5739_v24  ;;  %v3283_v40 = vadd.s32 3, %v1617_v21 }
 0x256   :  { %6563 = vst [vmem:[#allocation78_spill] sm:$0xff] %v5733_v0  ;;  %v5743_v25 = vmul.u32.u64.low %v5614_v20, %v1674_v51  ;;  %v5744_v11 = vmul.u32.u64.high %v5614_v20, %v1674_v51, %v5743_v25  ;;  %v3938_v46 = vmin.u32 %v1594_v58, %v5721_v45  ;;  %v6564_v47 = vand.u32 2147483647, %v5578_v43 }
 0x257   :  { %v1744_v36 = vadd.s32 1, %v3945_v56  ;;  %4143 = vsinq.f32 %v1513_v28  ;;  %v5750_v35 = vand.u32 3, %v5660_v49  ;;  %v1584_v14 = vadd.s32 %v5655_v4, %v5669_v2 }
 0x258   :  { %v1741_v7 = vand.u32 8388607, %v6564_v47  ;;  %v1686_v57 = vmul.u32 %v5614_v20, %v1670_v63  ;;  %v1596_v18 = vclz %v3938_v46  ;;  %v6436_v39 = vxor.u32 2147483648, %v4992_v12 }
 0x259   :  { %6565 = vst [vmem:[#allocation79_spill] sm:$0xff] %v5750_v35  ;;  %vm1745_vm3 = vcmp.gt.s32.totalorder %v1744_v36, 0  ;;  %v5758_v17 = vand.u32 3, %v1617_v21  ;;  %vm1688_vm0 = vc.u32 %v5740_v9, %v5743_v25  ;;  %v1689_v51 = vadd.s32 1, %v5744_v11 }
 0x25a   :  { %v1742_v27 = vor.u32 8388608, %v1741_v7  ;;  %v1746_v49 = vsel %vm1745_vm3, %v1744_v36, 0  ;;  %v3939_v13 = vadd.s32 4294967294, %v1596_v18  ;;  %v5762_v28 = vand.u32 3, %v3283_v40  ;;  %v5789_v36 = vpop.permute.xlu1 %3729 }
 0x25b   :  { %6566 = vst [vmem:[#allocation80_spill] sm:$0xff] %v5758_v17  ;;  %v1748_v4 = vand.u32 31, %v1746_v49  ;;  %vm387_vm6 = vcmp.eq.s32.totalorder %v4848_v41, 0  ;;  %vm1633_vm4 = vcmp.lt.s32.totalorder %v5555_v37, 0  ;;  %v5767_v20 = vadd.s32 %v5743_v25, %v5740_v9  ;;  %6571 = vst [vmem:[#allocation82_spill] sm:$0xff] %v5789_v36 }
 0x25c   :  { %6567 = vst [vmem:[#allocation81_spill] sm:$0xff] %v5762_v28  ;;  %v1690_v2 = vsel %vm1688_vm0, %v1689_v51, %v5744_v11  ;;  %v5770_v31 = vshrl.u32 %v1746_v49, 5  ;;  %v5772_v29 = vshll.u32 %v1742_v27, 8  ;;  %vm3940_vm5 = vcmp.lt.s32.totalorder %v3939_v13, 0 }
 0x25d   :  { %v6568_v21 = vand.u32 2147483647, %v5555_v37  ;;  %v1691_v56 = vadd.s32 %v1690_v2, %v1686_v57  ;;  %v1749_v58 = vsub.s32 32, %v1748_v4  ;;  %v5783_v63 = vsel %vm387_vm6, %v4987_v8, %v6436_v39 }
 0x25e   :  { %v1599_v24 = vsel %vm3940_vm5, 0, %v3939_v13  ;;  %v1751_v9 = vshll.u32 %v6467_v5, %v1748_v4  ;;  %v1754_v25 = vshll.u32 %v6468_v26, %v1748_v4  ;;  %v1757_v7 = vshll.u32 %v6469_v44, %v1748_v4 }
 0x25f   :  { %vm5776_vm7 = vcmp.le.f32.partialorder %v6568_v21, 0.7853982  ;;  %v1600_v46 = vsub.s32 32, %v1599_v24  ;;  %v1604_v40 = vsub.s32 4294967266, %v1599_v24  ;;  %v1692_v47 = vadd.s32 536870912, %v1691_v56 }
 0x260   :  { %v1601_v57 = vshll.u32 %v5721_v45, %v1599_v24  ;;  %v1752_v18 = vshrl.u32 %v6468_v26, %v1749_v58  ;;  %v1755_v27 = vshrl.u32 %v6469_v44, %v1749_v58  ;;  %v1758_v51 = vshrl.u32 %v6470_v22, %v1749_v58  ;;  %v5795_v49 = vpop.eup %4139 }
 0x261   :  { %v1602_v13 = vshrl.u32 %v1584_v14, %v1600_v46  ;;  %v1605_v2 = vadd.s32 127, %v1604_v40  ;;  %v1693_v21 = vshrl.u32 %v1692_v47, 30  ;;  %v1761_v39 = vshrl.u32 %v6471_v10, %v1749_v58  ;;  %v5798_v11 = vpop.eup %4141 }
 0x262   :  { %6572 = vst [vmem:[#allocation83_spill] sm:$0xff] %v5798_v11  ;;  %v1750_v35 = vshrl.u32 %v6467_v5, %v1749_v58  ;;  %v1753_v0 = vor.u32 %v1752_v18, %v1751_v9  ;;  %v1756_v38 = vor.u32 %v1755_v27, %v1754_v25  ;;  %v1760_v45 = vshll.u32 %v6470_v22, %v1748_v4  ;;  %v5811_v22 = vpop.permute.xlu1 %3733 }
 0x263   :  { %v1603_v26 = vor.u32 %v1602_v13, %v1601_v57  ;;  %v1606_v24 = vshll.u32 %v1605_v2, 23  ;;  %v1694_v44 = vshll.u32 %v1693_v21, 30  ;;  %v1717_v28 = vsub.s32 4, %v1693_v21 }
 0x264   :  { %v1759_v17 = vor.u32 %v1758_v51, %v1757_v7  ;;  %v1762_v36 = vor.u32 %v1761_v39, %v1760_v45  ;;  %v1763_v14 = vshll.u32 %v6471_v10, %v1748_v4  ;;  %v1764_v46 = vshrl.u32 %v6472_v53, %v1749_v58  ;;  %v5804_v40 = vpop.eup %4143 }
 0x265   :  { %v1607_v47 = vor.u32 4788187, %v1606_v24  ;;  %v5806_v11 = vsub.s32 %v1691_v56, %v1694_v44  ;;  %v1718_v5 = vsel %vm1633_vm4, %v1717_v28, %v1693_v21  ;;  %vm1766_vm9 = vcmp.lt.s32.totalorder %v5770_v31, 1 }
 0x266   :  { %vm390_vm10 = vcmp.eq.s32.totalorder %v4848_v41, 2  ;;  %v1610_v9 = vcvt.s32.f32 %v1603_v26  ;;  %v1720_v10 = vsel %vm5776_vm7, 0, %v1718_v5  ;;  %v1765_v39 = vor.u32 %v1764_v46, %v1763_v14  ;;  %v5840_v24 = vpop.permute.xlu1 %3737 }
 0x267   :  { %vm1767_vm13 = vcmp.lt.s32.totalorder %v5770_v31, 2  ;;  %vm386_vm8 = vcmp.lt.s32.totalorder %v4848_v41, 2  ;;  %v1608_v53 = vand.u32 2147483647, %v1607_v47  ;;  %v1697_v4 = vsub.s32 0, %v5806_v11 }
 0x268   :  { %vm1768_vm11 = vcmp.lt.s32.totalorder %v5770_v31, 3  ;;  %vm1769_vm14 = vcmp.lt.s32.totalorder %v5770_v31, 4  ;;  %vm384_vm15 = vweird.f32 %v4594_v6  ;;  %v1770_v28 = vsel %vm1766_vm9, %v1750_v35, %v1753_v0 }
 0x269   :  { %v1771_v56 = vsel %vm1769_vm14, %v1759_v17, 2102212464  ;;  %v1774_v58 = vsel %vm1766_vm9, %v1753_v0, %v1756_v38  ;;  %v1775_v25 = vsel %vm1769_vm14, %v1762_v36, 920167782  ;;  %v1611_v7 = vmul.f32 %v1610_v9, %v1608_v53 }
 0x26a   :  { %v3942_v57 = vmin.u32 %v1697_v4, %v5806_v11  ;;  %v3387_v18 = vadd.s32 3, %v1720_v10  ;;  %v1772_v27 = vsel %vm1768_vm11, %v1756_v38, %v1771_v56  ;;  %v1776_v13 = vsel %vm1768_vm11, %v1759_v17, %v1775_v25 }
 0x26b   :  { %v1773_v51 = vsel %vm1767_vm13, %v1770_v28, %v1772_v27  ;;  %v1778_v35 = vsel %vm1766_vm9, %v1756_v38, %v1759_v17  ;;  %v1779_v2 = vsel %vm1769_vm14, %v1765_v39, 1326507024  ;;  %vm2037_vm3 = vcmp.lt.s32.totalorder %v4852_v3, 2  ;;  %v4157_v27 = vld [vmem:[%s6353_s3 + $0x8] sm:$0xff] }
 0x26c   :  { %v1612_v0 = vxor.u32 2147483648, %v1611_v7  ;;  %v1699_v21 = vclz %v3942_v57  ;;  %v1777_v45 = vsel %vm1767_vm13, %v1774_v58, %v1776_v13  ;;  %v1780_v26 = vsel %vm1768_vm11, %v1762_v36, %v1779_v2  ;;  %v3742_v57 = vpop.permute.xlu1 %3741 }
 0x26d   :  { %v5842_v44 = vand.u32 3, %v1720_v10  ;;  %v1781_v14 = vsel %vm1767_vm13, %v1778_v35, %v1780_v26  ;;  %v5847_v38 = vmul.u32.u64.low %v5772_v29, %v1777_v45  ;;  %v5848_v17 = vmul.u32.u64.high %v5772_v29, %v1777_v45, %v5847_v38  ;;  %v4158_v45 = vld [vmem:[#allocation2 + $0x8] sm:$0xff] }
 0x26e   :  { %v1613_v46 = vsel %vm1530_vm12, %v1612_v0, %v1611_v7  ;;  %v3943_v47 = vadd.s32 4294967294, %v1699_v21  ;;  %v5854_v5 = vmul.u32.u64.low %v5772_v29, %v1781_v14  ;;  %v5855_v9 = vmul.u32.u64.high %v5772_v29, %v1781_v14, %v5854_v5 }
 0x26f   :  { %v1616_v36 = vsel %vm5692_vm2, %v5486_v52, %v1613_v46  ;;  %v5860_v10 = vand.u32 3, %v3387_v18  ;;  %v1789_v31 = vmul.u32 %v5772_v29, %v1773_v51  ;;  %v6573_v39 = vxor.u32 2147483648, %v4987_v8 }
 0x270   :  { %4145 = vcosq.f32 %v1616_v36  ;;  %vm3944_vm12 = vcmp.lt.s32.totalorder %v3943_v47, 0  ;;  %vm2038_vm0 = vcmp.eq.s32.totalorder %v4852_v3, 0  ;;  %v1792_v28 = vadd.s32 1, %v5848_v17 }
 0x271   :  { %v392_v53 = vsel %vm390_vm10, %v6573_v39, %v4992_v12  ;;  %v1702_v50 = vsel %vm3944_vm12, 0, %v3943_v47  ;;  %v6574_v56 = vxor.u32 2147483648, %v4992_v12  ;;  %4147 = vsinq.f32 %v1616_v36 }
 0x272   :  { %v393_v4 = vsel %vm386_vm8, %v5783_v63, %v392_v53  ;;  %v1703_v25 = vsub.s32 32, %v1702_v50  ;;  %v1707_v7 = vsub.s32 4294967266, %v1702_v50  ;;  %vm2041_vm2 = vcmp.eq.s32.totalorder %v4852_v3, 2 }
 0x273   :  { %v394_v29 = vsel %vm384_vm15, nan, %v393_v4  ;;  %v2040_v58 = vsel %vm2038_vm0, %v4987_v8, %v6574_v56  ;;  %v1704_v41 = vshll.u32 %v5806_v11, %v1702_v50  ;;  %vm1791_vm6 = vc.u32 %v5855_v9, %v5847_v38  ;;  %v4166_v8 = vld [vmem:[#allocation2 + $0x48] sm:$0xff] }
 0x274   :  { %v6575_v63 = vmov %v6573_v39  ;;  %v3628_v51 = vmul.f32 %v4157_v27, %v394_v29  ;;  %v1705_v13 = vshrl.u32 %v5767_v20, %v1703_v25  ;;  %v1708_v35 = vadd.s32 127, %v1707_v7  ;;  %v3746_v7 = vpop.permute.xlu1 %3745 }
 0x275   :  { %v2043_v18 = vsel %vm2041_vm2, %v6575_v63, %v4992_v12  ;;  %vm1736_vm5 = vcmp.lt.s32.totalorder %v5578_v43, 0  ;;  %v1793_v2 = vsel %vm1791_vm6, %v1792_v28, %v5848_v17  ;;  %v6576_v0 = vand.u32 2147483647, %v5578_v43 }
 0x276   :  { %v2044_v11 = vsel %vm2037_vm3, %v2040_v58, %v2043_v18  ;;  %v1794_v12 = vadd.s32 %v1793_v2, %v1789_v31  ;;  %v3772_v20 = vsel %vm3610_vm1, %v5648_v60, %v3742_v57  ;;  %v3788_v26 = vmul.f32 %v4158_v45, %v394_v29 }
 0x277   :  { %vm5895_vm9 = vcmp.le.f32.partialorder %v6576_v0, 0.7853982  ;;  %v2045_v21 = vsel %vm384_vm15, nan, %v2044_v11  ;;  %v1706_v14 = vor.u32 %v1705_v13, %v1704_v41  ;;  %v1709_v17 = vshll.u32 %v1708_v35, 23 }
 0x278   :  { %v3509_v3 = vmul.f32 %v4753_v32, %v2045_v21  ;;  %vm590_vm10 = vweird.f32 %v4712_v15  ;;  %v1795_v46 = vadd.s32 536870912, %v1794_v12  ;;  %vm592_vm13 = vcmp.lt.s32.totalorder %v5006_v23, 2  ;;  %v4159_v21 = vld [vmem:[%s6353_s3 + $0x18] sm:$0xff] }
 0x279   :  { %vm593_vm8 = vcmp.eq.s32.totalorder %v5006_v23, 0  ;;  %v594_v6 = vxor.u32 2147483648, %v5224_v16  ;;  %v1710_v47 = vor.u32 4788187, %v1709_v17  ;;  %vm596_vm11 = vcmp.eq.s32.totalorder %v5006_v23, 2 }
 0x27a   :  { %v3644_v5 = vmul.f32 %v4534_v42, %v3509_v3  ;;  %v3804_v36 = vmul.f32 %v3772_v20, %v3509_v3  ;;  %v1713_v60 = vcvt.s32.f32 %v1706_v14  ;;  %v1796_v31 = vshrl.u32 %v1795_v46, 30  ;;  %v6579_v46 = vld [vmem:[#allocation45_spill] sm:$0xff] }
 0x27b   :  { %v595_v39 = vsel %vm593_vm8, %v5163_v54, %v594_v6  ;;  %v597_v53 = vxor.u32 2147483648, %v5163_v54  ;;  %v1711_v4 = vand.u32 2147483647, %v1710_v47  ;;  %vm2246_vm14 = vcmp.eq.s32.totalorder %v5011_v61, 0  ;;  %v6580_v47 = vld [vmem:[#allocation53_spill] sm:$0xff] }
 0x27c   :  { %v3660_v50 = vadd.f32 %v3644_v5, %v3628_v51  ;;  %v3820_v28 = vadd.f32 %v3804_v36, %v3788_v26  ;;  %v1797_v29 = vshll.u32 %v1796_v31, 30  ;;  %v1820_v56 = vsub.s32 4, %v1796_v31  ;;  %v4160_v26 = vld [vmem:[#allocation2 + $0x18] sm:$0xff] }
 0x27d   :  { %v598_v58 = vsel %vm596_vm11, %v597_v53, %v5224_v16  ;;  %v2248_v42 = vsel %vm2246_vm14, %v5163_v54, %v594_v6  ;;  %v1714_v25 = vmul.f32 %v1713_v60, %v1711_v4  ;;  %vm2245_vm15 = vcmp.lt.s32.totalorder %v5011_v61, 2  ;;  %v5920_v41 = vpop.eup %4145  ;;  %v6581_v60 = vld [vmem:[#allocation52_spill] sm:$0xff] }
 0x27e   :  { %3676 = vst [vmem:[#allocation5 + $0x8] sm:$0xff] %v3660_v50  ;;  %3836 = vst [vmem:[#allocation6 + $0x8] sm:$0xff] %v3820_v28  ;;  %v599_v57 = vsel %vm592_vm13, %v595_v39, %v598_v58  ;;  %vm2249_vm3 = vcmp.eq.s32.totalorder %v5011_v61, 2  ;;  %v5922_v63 = vsub.s32 %v1794_v12, %v1797_v29  ;;  %v1821_v18 = vsel %vm1736_vm5, %v1820_v56, %v1796_v31  ;;  %v5933_v35 = vpop.eup %4147 }
 0x27f   :  { %v600_v54 = vsel %vm590_vm10, nan, %v599_v57  ;;  %v2251_v27 = vsel %vm2249_vm3, %v597_v53, %v5224_v16  ;;  %v1715_v51 = vxor.u32 2147483648, %v1714_v25  ;;  %v1790_v23 = vadd.s32 %v5847_v38, %v5855_v9  ;;  %v3750_v53 = vpop.permute.xlu1 %3749 }
 0x280   :  { %v1823_v13 = vsel %vm5895_vm9, 0, %v1821_v18  ;;  %v2252_v61 = vsel %vm2245_vm15, %v2248_v42, %v2251_v27  ;;  %v1800_v2 = vsub.s32 0, %v5922_v63  ;;  %v3774_v16 = vsel %vm3610_vm1, %v5675_v1, %v3746_v7 }
 0x281   :  { %v3491_v11 = vadd.s32 3, %v1823_v13  ;;  %v2253_v0 = vsel %vm590_vm10, nan, %v2252_v61  ;;  %v1716_v12 = vsel %vm1633_vm4, %v1715_v51, %v1714_v25  ;;  %v5943_v38 = vand.u32 3, %v1823_v13  ;;  %v5979_v51 = vpop.permute.xlu0 %3719  ;;  %v4161_v61 = vld [vmem:[%s6353_s3 + $0x28] sm:$0xff] }
 0x282   :  { %v3511_v9 = vmul.f32 %v4753_v32, %v2253_v0  ;;  %v3630_v20 = vmul.f32 %v4159_v21, %v600_v54  ;;  %v1719_v15 = vsel %vm5776_vm7, %v5555_v37, %v1716_v12  ;;  %v3946_v45 = vmin.u32 %v1800_v2, %v5922_v63  ;;  %v6583_v0 = vld [vmem:[#allocation55_spill] sm:$0xff]  ;;  %v6585_v21 = vld [vmem:[#allocation18_spill] sm:$0xff] }
 0x283   :  { %v3790_v1 = vmul.f32 %v4160_v26, %v600_v54  ;;  %vm796_vm12 = vweird.f32 %v4850_v34  ;;  %v5954_v14 = vand.u32 3, %v3491_v11  ;;  %vm798_vm4 = vcmp.lt.s32.totalorder %v6579_v46, 2  ;;  %v4162_v11 = vld [vmem:[#allocation2 + $0x28] sm:$0xff] }
 0x284   :  { %v3646_v17 = vmul.f32 %v4546_v48, %v3511_v9  ;;  %v3806_v3 = vmul.f32 %v3774_v16, %v3511_v9  ;;  %4149 = vcosq.f32 %v1719_v15  ;;  %v1802_v6 = vclz %v3946_v45  ;;  %v6582_v48 = vld [vmem:[#allocation47_spill] sm:$0xff]  ;;  %v6584_v16 = vld [vmem:[#allocation66_spill] sm:$0xff]  ;;  %v6587_v45 = vld [vmem:[#allocation65_spill] sm:$0xff] }
 0x285   :  { %vm799_vm0 = vcmp.eq.s32.totalorder %v6579_v46, 0  ;;  %v800_v59 = vxor.u32 2147483648, %v6580_v47  ;;  %vm802_vm7 = vcmp.eq.s32.totalorder %v6579_v46, 2  ;;  %v803_v31 = vxor.u32 2147483648, %v6581_v60 }
 0x286   :  { %v3662_v5 = vadd.f32 %v3646_v17, %v3630_v20  ;;  %v3822_v36 = vadd.f32 %v3806_v3, %v3790_v1  ;;  %v3947_v39 = vadd.s32 4294967294, %v1802_v6  ;;  %vm2454_vm2 = vcmp.eq.s32.totalorder %v6582_v48, 0 }
 0x287   :  { %v801_v4 = vsel %vm799_vm0, %v6581_v60, %v800_v59  ;;  %vm2457_vm6 = vcmp.eq.s32.totalorder %v6582_v48, 2  ;;  %v804_v50 = vsel %vm802_vm7, %v803_v31, %v6580_v47  ;;  %vm2453_vm10 = vcmp.lt.s32.totalorder %v6582_v48, 2 }
 0x288   :  { %3678 = vst [vmem:[#allocation5 + $0x18] sm:$0xff] %v3662_v5  ;;  %3838 = vst [vmem:[#allocation6 + $0x18] sm:$0xff] %v3822_v36  ;;  %v2456_v28 = vsel %vm2454_vm2, %v6581_v60, %v800_v59  ;;  %v2459_v29 = vsel %vm2457_vm6, %v803_v31, %v6580_v47  ;;  %4151 = vsinq.f32 %v1719_v15  ;;  %vm3948_vm13 = vcmp.lt.s32.totalorder %v3947_v39, 0  ;;  %v6586_v15 = vld [vmem:[#allocation37_spill] sm:$0xff]  ;;  %v3754_v47 = vpop.permute.xlu1 %3753  ;;  %v6588_v59 = vld [vmem:[#allocation56_spill] sm:$0xff]  ;;  %v5996_v36 = vpop.permute.xlu0 %3723 }
 0x289   :  { %v805_v56 = vsel %vm798_vm4, %v801_v4, %v804_v50  ;;  %v2460_v58 = vsel %vm2453_vm10, %v2456_v28, %v2459_v29  ;;  %v1805_v42 = vsel %vm3948_vm13, 0, %v3947_v39  ;;  %v3776_v57 = vsel %vm3610_vm1, %v5700_v55, %v3750_v53 }
 0x28a   :  { %v806_v25 = vsel %vm796_vm12, nan, %v805_v56  ;;  %v2461_v7 = vsel %vm796_vm12, nan, %v2460_v58  ;;  %v1806_v18 = vsub.s32 32, %v1805_v42  ;;  %v1807_v54 = vshll.u32 %v5922_v63, %v1805_v42  ;;  %v6589_v56 = vld [vmem:[#allocation46_spill] sm:$0xff]  ;;  %v6590_v58 = vld [vmem:[#allocation63_spill] sm:$0xff] }
 0x28b   :  { %v1810_v27 = vsub.s32 4294967266, %v1805_v42  ;;  %v3513_v13 = vmul.f32 %v4753_v32, %v2461_v7  ;;  %v3632_v2 = vmul.f32 %v4161_v61, %v806_v25  ;;  %v3792_v34 = vmul.f32 %v4162_v11, %v806_v25  ;;  %v4163_v25 = vld [vmem:[%s6353_s3 + $0x38] sm:$0xff]  ;;  %v6592_v61 = vld [vmem:[#allocation72_spill] sm:$0xff] }
 0x28c   :  { %vm1005_vm8 = vcmp.eq.s32.totalorder %v6583_v0, 0  ;;  %v1006_v12 = vxor.u32 2147483648, %v6584_v16  ;;  %v1808_v55 = vshrl.u32 %v1790_v23, %v1806_v18  ;;  %vm1002_vm11 = vweird.f32 %v6586_v15 }
 0x28d   :  { %v1811_v9 = vadd.s32 127, %v1810_v27  ;;  %v3648_v63 = vmul.f32 %v6585_v21, %v3513_v13  ;;  %v3808_v20 = vmul.f32 %v3776_v57, %v3513_v13  ;;  %vm1008_vm14 = vcmp.eq.s32.totalorder %v6583_v0, 2  ;;  %v4164_v57 = vld [vmem:[#allocation2 + $0x38] sm:$0xff]  ;;  %v6026_v21 = vpop.permute.xlu0 %3727 }
 0x28e   :  { %v1007_v26 = vsel %vm1005_vm8, %v6587_v45, %v1006_v12  ;;  %v1009_v1 = vxor.u32 2147483648, %v6587_v45  ;;  %v1809_v17 = vor.u32 %v1808_v55, %v1807_v54  ;;  %vm1004_vm15 = vcmp.lt.s32.totalorder %v6583_v0, 2  ;;  %v6591_v54 = vld [vmem:[#allocation74_spill] sm:$0xff]  ;;  %v6593_v0 = vld [vmem:[#allocation64_spill] sm:$0xff] }
 0x28f   :  { %v1812_v3 = vshll.u32 %v1811_v9, 23  ;;  %v3664_v46 = vadd.f32 %v3648_v63, %v3632_v2  ;;  %v3824_v6 = vadd.f32 %v3808_v20, %v3792_v34  ;;  %vm2661_vm3 = vcmp.lt.s32.totalorder %v6588_v59, 2  ;;  %v3758_v63 = vpop.permute.xlu1 %3757 }
 0x290   :  { %v1010_v23 = vsel %vm1008_vm14, %v1009_v1, %v6584_v16  ;;  %vm2662_vm12 = vcmp.eq.s32.totalorder %v6588_v59, 0  ;;  %vm2665_vm4 = vcmp.eq.s32.totalorder %v6588_v59, 2  ;;  %v1816_v53 = vcvt.s32.f32 %v1809_v17  ;;  %v6595_v59 = vld [vmem:[#allocation58_spill] sm:$0xff] }
 0x291   :  { %v1813_v5 = vor.u32 4788187, %v1812_v3  ;;  %3680 = vst [vmem:[#allocation5 + $0x28] sm:$0xff] %v3664_v46  ;;  %3840 = vst [vmem:[#allocation6 + $0x28] sm:$0xff] %v3824_v6  ;;  %v1011_v60 = vsel %vm1004_vm15, %v1007_v26, %v1010_v23  ;;  %v2664_v31 = vsel %vm2662_vm12, %v6587_v45, %v1006_v12  ;;  %v6000_v39 = vpop.eup %4149  ;;  %v2667_v48 = vsel %vm2665_vm4, %v1009_v1, %v6584_v16  ;;  %v6594_v12 = vld [vmem:[#allocation11_spill] sm:$0xff] }
 0x292   :  { %v1012_v4 = vsel %vm1002_vm11, nan, %v1011_v60  ;;  %v3778_v50 = vsel %vm3610_vm1, %v5725_v62, %v3754_v47  ;;  %v2668_v29 = vsel %vm2661_vm3, %v2664_v31, %v2667_v48  ;;  %vm1208_vm0 = vweird.f32 %v6589_v56  ;;  %v4165_v60 = vld [vmem:[%s6353_s3 + $0x48] sm:$0xff]  ;;  %v6596_v48 = vld [vmem:[#allocation71_spill] sm:$0xff] }
 0x293   :  { %v1814_v28 = vand.u32 2147483647, %v1813_v5  ;;  %vm1210_vm7 = vcmp.lt.s32.totalorder %v6590_v58, 2  ;;  %v2669_v42 = vsel %vm1002_vm11, nan, %v2668_v29  ;;  %v3634_v7 = vmul.f32 %v4163_v25, %v1012_v4  ;;  %v6597_v29 = vld [vmem:[#allocation73_spill] sm:$0xff]  ;;  %v6598_v56 = vld [vmem:[#allocation23_spill] sm:$0xff]  ;;  %v3762_v25 = vpop.permute.xlu1 %3761 }
 0x294   :  { %v3794_v18 = vmul.f32 %v4164_v57, %v1012_v4  ;;  %v1212_v27 = vxor.u32 2147483648, %v6591_v54  ;;  %v3515_v62 = vmul.f32 %v4753_v32, %v2669_v42  ;;  %vm1211_vm2 = vcmp.eq.s32.totalorder %v6590_v58, 0 }
 0x295   :  { %v1817_v13 = vmul.f32 %v1816_v53, %v1814_v28  ;;  %v1215_v2 = vxor.u32 2147483648, %v6592_v61  ;;  %v6019_v11 = vpop.eup %4151  ;;  %vm1214_vm6 = vcmp.eq.s32.totalorder %v6590_v58, 2  ;;  %vm2870_vm10 = vcmp.eq.s32.totalorder %v6593_v0, 0 }
 0x296   :  { %v1213_v34 = vsel %vm1211_vm2, %v6592_v61, %v1212_v27  ;;  %vm2873_vm13 = vcmp.eq.s32.totalorder %v6593_v0, 2  ;;  %v3650_v55 = vmul.f32 %v6594_v12, %v3515_v62  ;;  %v3810_v9 = vmul.f32 %v3778_v50, %v3515_v62  ;;  %v6054_v50 = vpop.permute.xlu0 %3731 }
 0x297   :  { %v1818_v16 = vxor.u32 2147483648, %v1817_v13  ;;  %v1216_v20 = vsel %vm1214_vm6, %v1215_v2, %v6591_v54  ;;  %vm2869_vm8 = vcmp.lt.s32.totalorder %v6593_v0, 2  ;;  %v2872_v45 = vsel %vm2870_vm10, %v6592_v61, %v1212_v27 }
 0x298   :  { %v1217_v15 = vsel %vm1210_vm7, %v1213_v34, %v1216_v20  ;;  %v2875_v26 = vsel %vm2873_vm13, %v1215_v2, %v6591_v54  ;;  %v3666_v17 = vadd.f32 %v3650_v55, %v3634_v7  ;;  %v3826_v3 = vadd.f32 %v3810_v9, %v3794_v18  ;;  %v6600_v55 = vld [vmem:[#allocation80_spill] sm:$0xff] }
 0x299   :  { %v1819_v1 = vsel %vm1736_vm5, %v1818_v16, %v1817_v13  ;;  %v1218_v46 = vsel %vm1208_vm0, nan, %v1217_v15  ;;  %v2876_v47 = vsel %vm2869_vm8, %v2872_v45, %v2875_v26  ;;  %v3780_v23 = vsel %vm3610_vm1, %v5755_v33, %v3758_v63  ;;  %v4167_v16 = vld [vmem:[%s6353_s3 + $0x58] sm:$0xff]  ;;  %v6601_v26 = vld [vmem:[#allocation81_spill] sm:$0xff] }
 0x29a   :  { %v1822_v6 = vsel %vm5895_vm9, %v5578_v43, %v1819_v1  ;;  %vm1414_vm11 = vweird.f32 %v6595_v59  ;;  %3682 = vst [vmem:[#allocation5 + $0x38] sm:$0xff] %v3666_v17  ;;  %3842 = vst [vmem:[#allocation6 + $0x38] sm:$0xff] %v3826_v3  ;;  %v2877_v5 = vsel %vm1208_vm0, nan, %v2876_v47  ;;  %v3636_v31 = vmul.f32 %v4165_v60, %v1218_v46  ;;  %v4168_v63 = vld [vmem:[#allocation2 + $0x58] sm:$0xff]  ;;  %v6082_v15 = vpop.permute.xlu0 %3735 }
 0x29b   :  { %4153 = vcosq.f32 %v1822_v6  ;;  %v3796_v53 = vmul.f32 %v4166_v8, %v1218_v46  ;;  %v3517_v4 = vmul.f32 %v4753_v32, %v2877_v5  ;;  %vm1416_vm5 = vcmp.lt.s32.totalorder %v6596_v48, 2  ;;  %v6602_v1 = vld [vmem:[#allocation26_spill] sm:$0xff]  ;;  %v3766_v46 = vpop.permute.xlu1 %3765 }
 0x29c   :  { %vm1417_vm9 = vcmp.eq.s32.totalorder %v6596_v48, 0  ;;  %v1418_v33 = vxor.u32 2147483648, %v5795_v49  ;;  %vm1420_vm14 = vcmp.eq.s32.totalorder %v6596_v48, 2  ;;  %v1421_v28 = vxor.u32 2147483648, %v5710_v30 }
 0x29d   :  { %vm3078_vm15 = vcmp.eq.s32.totalorder %v6597_v29, 0  ;;  %vm3081_vm3 = vcmp.eq.s32.totalorder %v6597_v29, 2  ;;  %v3652_v58 = vmul.f32 %v6598_v56, %v3517_v4  ;;  %v3812_v42 = vmul.f32 %v3780_v23, %v3517_v4  ;;  %v6603_v4 = vld [vmem:[#allocation22_spill] sm:$0xff] }
 0x29e   :  { %v1419_v7 = vsel %vm1417_vm9, %v5710_v30, %v1418_v33  ;;  %v3080_v57 = vsel %vm3078_vm15, %v5710_v30, %v1418_v33  ;;  %4155 = vsinq.f32 %v1822_v6  ;;  %v1422_v18 = vsel %vm1420_vm14, %v1421_v28, %v5795_v49  ;;  %v6599_v30 = vld [vmem:[#allocation82_spill] sm:$0xff] }
 0x29f   :  { %vm3077_vm12 = vcmp.lt.s32.totalorder %v6597_v29, 2  ;;  %v3083_v54 = vsel %vm3081_vm3, %v1421_v28, %v5795_v49  ;;  %v3668_v27 = vadd.f32 %v3652_v58, %v3636_v31  ;;  %v3828_v13 = vadd.f32 %v3812_v42, %v3796_v53  ;;  %v6604_v28 = vld [vmem:[#allocation28_spill] sm:$0xff] }
 0x2a0   :  { %v1423_v62 = vsel %vm1416_vm5, %v1419_v7, %v1422_v18  ;;  %v3084_v61 = vsel %vm3077_vm12, %v3080_v57, %v3083_v54  ;;  %v3782_v0 = vsel %vm3610_vm1, %v6599_v30, %v3762_v25  ;;  %vm1620_vm4 = vweird.f32 %v5486_v52  ;;  %v4170_v42 = vld [vmem:[#allocation2 + $0x68] sm:$0xff]  ;;  %v6606_v7 = vld [vmem:[#allocation35_spill] sm:$0xff]  ;;  %v3740_v18 = vpop.permute.xlu0 %3739  ;;  %v6607_v54 = vld [vmem:[#allocation29_spill] sm:$0xff] }
 0x2a1   :  { %v1424_v2 = vsel %vm1414_vm11, nan, %v1423_v62  ;;  %v3085_v34 = vsel %vm1414_vm11, nan, %v3084_v61  ;;  %3684 = vst [vmem:[#allocation5 + $0x48] sm:$0xff] %v3668_v27  ;;  %3844 = vst [vmem:[#allocation6 + $0x48] sm:$0xff] %v3828_v13  ;;  %vm1623_vm0 = vcmp.eq.s32.totalorder %v6600_v55, 0  ;;  %v1624_v9 = vxor.u32 2147483648, %v5933_v35 }
 0x2a2   :  { %v3519_v49 = vmul.f32 %v4753_v32, %v3085_v34  ;;  %v3638_v12 = vmul.f32 %v4167_v16, %v1424_v2  ;;  %v3798_v20 = vmul.f32 %v4168_v63, %v1424_v2  ;;  %vm1626_vm7 = vcmp.eq.s32.totalorder %v6600_v55, 2  ;;  %v6608_v27 = vld [vmem:[#allocation34_spill] sm:$0xff] }
 0x2a3   :  { %v1627_v45 = vxor.u32 2147483648, %v5920_v41  ;;  %vm3286_vm2 = vcmp.eq.s32.totalorder %v6601_v26, 0  ;;  %v1625_v6 = vsel %vm1623_vm0, %v5920_v41, %v1624_v9  ;;  %vm1622_vm6 = vcmp.lt.s32.totalorder %v6600_v55, 2 }
 0x2a4   :  { %v3654_v17 = vmul.f32 %v6602_v1, %v3519_v49  ;;  %v3814_v3 = vmul.f32 %v3782_v0, %v3519_v49  ;;  %v3288_v47 = vsel %vm3286_vm2, %v5920_v41, %v1624_v9  ;;  %vm3285_vm10 = vcmp.lt.s32.totalorder %v6601_v26, 2  ;;  %v6609_v49 = vld [vmem:[#allocation75_spill] sm:$0xff] }
 0x2a5   :  { %v1628_v23 = vsel %vm1626_vm7, %v1627_v45, %v5933_v35  ;;  %vm3289_vm13 = vcmp.eq.s32.totalorder %v6601_v26, 2  ;;  %v3784_v41 = vsel %vm3610_vm1, %v5811_v22, %v3766_v46  ;;  %vm281_vm8 = vweird.f32 %v6603_v4  ;;  %v4169_v22 = vld [vmem:[%s6353_s3 + $0x68] sm:$0xff] }
 0x2a6   :  { %v3670_v59 = vadd.f32 %v3654_v17, %v3638_v12  ;;  %v3830_v5 = vadd.f32 %v3814_v3, %v3798_v20  ;;  %v1629_v60 = vsel %vm1622_vm6, %v1625_v6, %v1628_v23  ;;  %v3291_v31 = vsel %vm3289_vm13, %v1627_v45, %v5933_v35  ;;  %v6605_v35 = vld [vmem:[#allocation36_spill] sm:$0xff]  ;;  %v4171_v45 = vld [vmem:[%s6353_s3] sm:$0xff] }
 0x2a7   :  { %v1630_v8 = vsel %vm1620_vm4, nan, %v1629_v60  ;;  %v3292_v53 = vsel %vm3285_vm10, %v3288_v47, %v3291_v31  ;;  %vm283_vm11 = vcmp.lt.s32.totalorder %v6604_v28, 2  ;;  %vm284_vm5 = vcmp.eq.s32.totalorder %v6604_v28, 0  ;;  %v4172_v17 = vld [vmem:[#allocation2] sm:$0xff]  ;;  %v6610_v47 = vld [vmem:[#allocation14_spill] sm:$0xff] }
 0x2a8   :  { %v4154_v48 = vpop.eup %4153  ;;  %3686 = vst [vmem:[#allocation5 + $0x58] sm:$0xff] %v3670_v59  ;;  %3846 = vst [vmem:[#allocation6 + $0x58] sm:$0xff] %v3830_v5  ;;  %v3293_v33 = vsel %vm1620_vm4, nan, %v3292_v53  ;;  %v285_v29 = vxor.u32 2147483648, %v6605_v35  ;;  %v3640_v58 = vmul.f32 %v4169_v22, %v1630_v8  ;;  %v3800_v25 = vmul.f32 %v4170_v42, %v1630_v8  ;;  %v3770_v5 = vpop.permute.xlu1 %3769 }
 0x2a9   :  { %v3521_v56 = vmul.f32 %v4753_v32, %v3293_v33  ;;  %v288_v57 = vxor.u32 2147483648, %v6606_v7  ;;  %vm287_vm9 = vcmp.eq.s32.totalorder %v6604_v28, 2  ;;  %vm1934_vm14 = vcmp.eq.s32.totalorder %v6607_v54, 0 }
 0x2aa   :  { %v286_v52 = vsel %vm284_vm5, %v6606_v7, %v285_v29  ;;  %vm1937_vm15 = vcmp.eq.s32.totalorder %v6607_v54, 2  ;;  %v1936_v2 = vsel %vm1934_vm14, %v6606_v7, %v285_v29  ;;  %vm1933_vm3 = vcmp.lt.s32.totalorder %v6607_v54, 2  ;;  %v6616_v54 = vld [vmem:[#allocation40_spill] sm:$0xff] }
 0x2ab   :  { %v3656_v13 = vmul.f32 %v6608_v27, %v3521_v56  ;;  %v3816_v62 = vmul.f32 %v3784_v41, %v3521_v56  ;;  %v289_v61 = vsel %vm287_vm9, %v288_v57, %v6605_v35  ;;  %v4156_v34 = vpop.eup %4155  ;;  %v1939_v0 = vsel %vm1937_vm15, %v288_v57, %v6605_v35  ;;  %v4173_v56 = vld [vmem:[%s6353_s3 + $0x78] sm:$0xff]  ;;  %v6614_v57 = vld [vmem:[#allocation39_spill] sm:$0xff] }
 0x2ac   :  { %v290_v30 = vsel %vm283_vm11, %v286_v52, %v289_v61  ;;  %v3771_v16 = vsel %vm3610_vm1, %v6609_v49, %v3740_v18  ;;  %v1940_v63 = vsel %vm1933_vm3, %v1936_v2, %v1939_v0  ;;  %vm1826_vm12 = vweird.f32 %v5578_v43  ;;  %v6613_v43 = vld [vmem:[#allocation44_spill] sm:$0xff]  ;;  %v6615_v52 = vld [vmem:[#allocation33_spill] sm:$0xff] }
 0x2ad   :  { %v3672_v12 = vadd.f32 %v3656_v13, %v3640_v58  ;;  %v3832_v55 = vadd.f32 %v3816_v62, %v3800_v25  ;;  %v291_v9 = vsel %vm281_vm8, nan, %v290_v30  ;;  %v1941_v20 = vsel %vm281_vm8, nan, %v1940_v63  ;;  %v4174_v58 = vld [vmem:[#allocation2 + $0x78] sm:$0xff]  ;;  %v6612_v25 = vld [vmem:[#allocation32_spill] sm:$0xff] }
 0x2ae   :  { %v3627_v26 = vmul.f32 %v4171_v45, %v291_v9  ;;  %vm1828_vm4 = vcmp.lt.s32.totalorder %v5943_v38, 2  ;;  %v3508_v1 = vmul.f32 %v4753_v32, %v1941_v20  ;;  %v3787_v3 = vmul.f32 %v4172_v17, %v291_v9  ;;  %v6617_v9 = vld [vmem:[#allocation17_spill] sm:$0xff]  ;;  %v6618_v20 = vld [vmem:[#allocation27_spill] sm:$0xff] }
 0x2af   :  { %3688 = vst [vmem:[#allocation5 + $0x68] sm:$0xff] %v3672_v12  ;;  %3848 = vst [vmem:[#allocation6 + $0x68] sm:$0xff] %v3832_v55  ;;  %v1830_v46 = vxor.u32 2147483648, %v4156_v34  ;;  %v1833_v6 = vxor.u32 2147483648, %v4154_v48  ;;  %vm1829_vm0 = vcmp.eq.s32.totalorder %v5943_v38, 0  ;;  %vm1832_vm7 = vcmp.eq.s32.totalorder %v5943_v38, 2 }
 0x2b0   :  { %vm3494_vm2 = vcmp.eq.s32.totalorder %v5954_v14, 0  ;;  %vm3497_vm6 = vcmp.eq.s32.totalorder %v5954_v14, 2  ;;  %v3643_v23 = vmul.f32 %v6610_v47, %v3508_v1  ;;  %v3803_v59 = vmul.f32 %v3771_v16, %v3508_v1  ;;  %v6619_v17 = vld [vmem:[#allocation41_spill] sm:$0xff] }
 0x2b1   :  { %v1831_v60 = vsel %vm1829_vm0, %v4154_v48, %v1830_v46  ;;  %v1834_v31 = vsel %vm1832_vm7, %v1833_v6, %v4156_v34  ;;  %vm3493_vm10 = vcmp.lt.s32.totalorder %v5954_v14, 2  ;;  %v3496_v53 = vsel %vm3494_vm2, %v4154_v48, %v1830_v46  ;;  %v6611_v14 = vld [vmem:[#allocation25_spill] sm:$0xff] }
 0x2b2   :  { %v1835_v8 = vsel %vm1828_vm4, %v1831_v60, %v1834_v31  ;;  %v3499_v41 = vsel %vm3497_vm6, %v1833_v6, %v4156_v34  ;;  %v3659_v4 = vadd.f32 %v3643_v23, %v3627_v26  ;;  %v3819_v33 = vadd.f32 %v3803_v59, %v3787_v3  ;;  %v4175_v26 = vld [vmem:[%s6353_s3 + $0x10] sm:$0xff]  ;;  %v6620_v3 = vld [vmem:[#allocation51_spill] sm:$0xff]  ;;  %v6621_v23 = vld [vmem:[#allocation50_spill] sm:$0xff] }
 0x2b3   :  { %v1836_v28 = vsel %vm1826_vm12, nan, %v1835_v8  ;;  %v3500_v35 = vsel %vm3493_vm10, %v3496_v53, %v3499_v41  ;;  %v3786_v38 = vsel %vm3610_vm1, %v5840_v24, %v3770_v5  ;;  %vm487_vm13 = vweird.f32 %v6611_v14  ;;  %v3744_v24 = vpop.permute.xlu0 %3743  ;;  %v4176_v6 = vld [vmem:[#allocation2 + $0x10] sm:$0xff]  ;;  %v6622_v5 = vld [vmem:[#allocation42_spill] sm:$0xff]  ;;  %v6623_v31 = vld [vmem:[#allocation15_spill] sm:$0xff] }
 0x2b4   :  { %v3501_v29 = vsel %vm1826_vm12, nan, %v3500_v35  ;;  %v3642_v22 = vmul.f32 %v4173_v56, %v1836_v28  ;;  %3675 = vst [vmem:[#allocation5] sm:$0xff] %v3659_v4  ;;  %3835 = vst [vmem:[#allocation6] sm:$0xff] %v3819_v33  ;;  %v3802_v42 = vmul.f32 %v4174_v58, %v1836_v28  ;;  %vm490_vm8 = vcmp.eq.s32.totalorder %v6612_v25, 0  ;;  %v6624_v14 = vld [vmem:[#allocation20_spill] sm:$0xff]  ;;  %v6625_v58 = vld [vmem:[#allocation31_spill] sm:$0xff] }
 0x2b5   :  { %v3523_v48 = vmul.f32 %v4753_v32, %v3501_v29  ;;  %v491_v7 = vxor.u32 2147483648, %v6613_v43  ;;  %vm493_vm11 = vcmp.eq.s32.totalorder %v6612_v25, 2  ;;  %v494_v18 = vxor.u32 2147483648, %v6614_v57 }
 0x2b6   :  { %vm2142_vm5 = vcmp.eq.s32.totalorder %v6615_v52, 0  ;;  %vm2145_vm9 = vcmp.eq.s32.totalorder %v6615_v52, 2  ;;  %vm489_vm14 = vcmp.lt.s32.totalorder %v6612_v25, 2  ;;  %vm2141_vm15 = vcmp.lt.s32.totalorder %v6615_v52, 2  ;;  %v6626_v25 = vld [vmem:[#allocation48_spill] sm:$0xff] }
 0x2b7   :  { %v3658_v27 = vmul.f32 %v6616_v54, %v3523_v48  ;;  %v3818_v13 = vmul.f32 %v3786_v38, %v3523_v48  ;;  %v492_v62 = vsel %vm490_vm8, %v6614_v57, %v491_v7  ;;  %v2144_v61 = vsel %vm2142_vm5, %v6614_v57, %v491_v7  ;;  %v3748_v60 = vpop.permute.xlu0 %3747 }
 0x2b8   :  { %v495_v2 = vsel %vm493_vm11, %v494_v18, %v6613_v43  ;;  %v2147_v34 = vsel %vm2145_vm9, %v494_v18, %v6613_v43  ;;  %v3773_v63 = vsel %vm3610_vm1, %v6617_v9, %v3744_v24  ;;  %vm693_vm3 = vweird.f32 %v6618_v20  ;;  %v6627_v43 = vld [vmem:[#allocation60_spill] sm:$0xff]  ;;  %v4177_v18 = vld [vmem:[%s6353_s3 + $0x20] sm:$0xff] }
 0x2b9   :  { %v3674_v30 = vadd.f32 %v3658_v27, %v3642_v22  ;;  %v3834_v0 = vadd.f32 %v3818_v13, %v3802_v42  ;;  %v496_v49 = vsel %vm489_vm14, %v492_v62, %v495_v2  ;;  %v2148_v16 = vsel %vm2141_vm15, %v2144_v61, %v2147_v34  ;;  %v4178_v24 = vld [vmem:[#allocation2 + $0x20] sm:$0xff]  ;;  %v6629_v2 = vld [vmem:[#allocation49_spill] sm:$0xff]  ;;  %v6630_v34 = vld [vmem:[#allocation16_spill] sm:$0xff] }
 0x2ba   :  { %v497_v12 = vsel %vm487_vm13, nan, %v496_v49  ;;  %v2149_v55 = vsel %vm487_vm13, nan, %v2148_v16  ;;  %vm696_vm12 = vcmp.eq.s32.totalorder %v6619_v17, 0  ;;  %v697_v46 = vxor.u32 2147483648, %v6620_v3  ;;  %v6628_v27 = vld [vmem:[#allocation59_spill] sm:$0xff] }
 0x2bb   :  { %3690 = vst [vmem:[#allocation5 + $0x78] sm:$0xff] %v3674_v30  ;;  %3850 = vst [vmem:[#allocation6 + $0x78] sm:$0xff] %v3834_v0  ;;  %v3510_v45 = vmul.f32 %v4753_v32, %v2149_v55  ;;  %v3629_v1 = vmul.f32 %v4175_v26, %v497_v12  ;;  %v3789_v47 = vmul.f32 %v4176_v6, %v497_v12  ;;  %vm699_vm4 = vcmp.eq.s32.totalorder %v6619_v17, 2  ;;  %v3752_v62 = vpop.permute.xlu0 %3751  ;;  %v6632_v6 = vld [vmem:[#allocation57_spill] sm:$0xff] }
 0x2bc   :  { %v700_v59 = vxor.u32 2147483648, %v6621_v23  ;;  %vm2350_vm0 = vcmp.eq.s32.totalorder %v6622_v5, 0  ;;  %v698_v41 = vsel %vm696_vm12, %v6621_v23, %v697_v46  ;;  %vm695_vm7 = vcmp.lt.s32.totalorder %v6619_v17, 2  ;;  %v4179_v17 = vld [vmem:[%s6353_s3 + $0x30] sm:$0xff] }
 0x2bd   :  { %v3645_v8 = vmul.f32 %v6623_v31, %v3510_v45  ;;  %v3805_v53 = vmul.f32 %v3773_v63, %v3510_v45  ;;  %v2352_v4 = vsel %vm2350_vm0, %v6621_v23, %v697_v46  ;;  %vm2349_vm2 = vcmp.lt.s32.totalorder %v6622_v5, 2  ;;  %v6631_v46 = vld [vmem:[#allocation43_spill] sm:$0xff] }
 0x2be   :  { %v701_v33 = vsel %vm699_vm4, %v700_v59, %v6620_v3  ;;  %vm2353_vm6 = vcmp.eq.s32.totalorder %v6622_v5, 2  ;;  %v3775_v48 = vsel %vm3610_vm1, %v6624_v14, %v3748_v60  ;;  %vm899_vm10 = vweird.f32 %v6625_v58  ;;  %v6634_v60 = vld [vmem:[#allocation67_spill] sm:$0xff] }
 0x2bf   :  { %v3661_v28 = vadd.f32 %v3645_v8, %v3629_v1  ;;  %v3821_v35 = vadd.f32 %v3805_v53, %v3789_v47  ;;  %v702_v29 = vsel %vm695_vm7, %v698_v41, %v701_v33  ;;  %v2355_v56 = vsel %vm2353_vm6, %v700_v59, %v6620_v3  ;;  %v4180_v47 = vld [vmem:[#allocation2 + $0x30] sm:$0xff]  ;;  %v6633_v59 = vld [vmem:[#allocation68_spill] sm:$0xff]  ;;  %v6635_v8 = vld [vmem:[#allocation62_spill] sm:$0xff] }
 0x2c0   :  { %v703_v22 = vsel %vm693_vm3, nan, %v702_v29  ;;  %v2356_v38 = vsel %vm2349_vm2, %v2352_v4, %v2355_v56  ;;  %vm901_vm13 = vcmp.lt.s32.totalorder %v6626_v25, 2  ;;  %vm902_vm8 = vcmp.eq.s32.totalorder %v6626_v25, 0  ;;  %v6636_v53 = vld [vmem:[#allocation19_spill] sm:$0xff] }
 0x2c1   :  { %3677 = vst [vmem:[#allocation5 + $0x10] sm:$0xff] %v3661_v28  ;;  %3837 = vst [vmem:[#allocation6 + $0x10] sm:$0xff] %v3821_v35  ;;  %v2357_v42 = vsel %vm693_vm3, nan, %v2356_v38  ;;  %v903_v7 = vxor.u32 2147483648, %v6627_v43  ;;  %v3631_v52 = vmul.f32 %v4177_v18, %v703_v22  ;;  %v3791_v54 = vmul.f32 %v4178_v24, %v703_v22  ;;  %v3756_v35 = vpop.permute.xlu0 %3755 }
 0x2c2   :  { %v3512_v57 = vmul.f32 %v4753_v32, %v2357_v42  ;;  %v906_v13 = vxor.u32 2147483648, %v6628_v27  ;;  %vm905_vm11 = vcmp.eq.s32.totalorder %v6626_v25, 2  ;;  %vm2558_vm5 = vcmp.eq.s32.totalorder %v6629_v2, 0  ;;  %v4181_v25 = vld [vmem:[%s6353_s3 + $0x40] sm:$0xff] }
 0x2c3   :  { %v904_v61 = vsel %vm902_vm8, %v6628_v27, %v903_v7  ;;  %vm2561_vm9 = vcmp.eq.s32.totalorder %v6629_v2, 2  ;;  %v2560_v16 = vsel %vm2558_vm5, %v6628_v27, %v903_v7  ;;  %vm2557_vm14 = vcmp.lt.s32.totalorder %v6629_v2, 2  ;;  %v6639_v27 = vld [vmem:[#allocation77_spill] sm:$0xff]  ;;  %v6641_v2 = vld [vmem:[#allocation70_spill] sm:$0xff] }
 0x2c4   :  { %v3647_v30 = vmul.f32 %v6630_v34, %v3512_v57  ;;  %v3807_v0 = vmul.f32 %v3775_v48, %v3512_v57  ;;  %v907_v49 = vsel %vm905_vm11, %v906_v13, %v6627_v43  ;;  %v2563_v55 = vsel %vm2561_vm9, %v906_v13, %v6627_v43  ;;  %v6637_v57 = vld [vmem:[#allocation54_spill] sm:$0xff] }
 0x2c5   :  { %v908_v12 = vsel %vm901_vm13, %v904_v61, %v907_v49  ;;  %v3777_v9 = vsel %vm3610_vm1, %v5979_v51, %v3752_v62  ;;  %v2564_v26 = vsel %vm2557_vm14, %v2560_v16, %v2563_v55  ;;  %vm1105_vm15 = vweird.f32 %v6631_v46  ;;  %v6640_v62 = vld [vmem:[#allocation76_spill] sm:$0xff]  ;;  %v3760_v16 = vpop.permute.xlu0 %3759 }
 0x2c6   :  { %v3663_v63 = vadd.f32 %v3647_v30, %v3631_v52  ;;  %v3823_v20 = vadd.f32 %v3807_v0, %v3791_v54  ;;  %v909_v45 = vsel %vm899_vm10, nan, %v908_v12  ;;  %v2565_v1 = vsel %vm899_vm10, nan, %v2564_v26  ;;  %v4182_v52 = vld [vmem:[#allocation2 + $0x40] sm:$0xff]  ;;  %v6638_v54 = vld [vmem:[#allocation69_spill] sm:$0xff] }
 0x2c7   :  { %v3633_v3 = vmul.f32 %v4179_v17, %v909_v45  ;;  %vm1107_vm3 = vcmp.lt.s32.totalorder %v6632_v6, 2  ;;  %v3514_v51 = vmul.f32 %v4753_v32, %v2565_v1  ;;  %v3793_v23 = vmul.f32 %v4180_v47, %v909_v45  ;;  %v6644_v47 = vld [vmem:[#allocation78_spill] sm:$0xff] }
 0x2c8   :  { %3679 = vst [vmem:[#allocation5 + $0x20] sm:$0xff] %v3663_v63  ;;  %3839 = vst [vmem:[#allocation6 + $0x20] sm:$0xff] %v3823_v20  ;;  %v1109_v5 = vxor.u32 2147483648, %v6633_v59  ;;  %v1112_v31 = vxor.u32 2147483648, %v6634_v60  ;;  %vm1108_vm12 = vcmp.eq.s32.totalorder %v6632_v6, 0  ;;  %vm1111_vm4 = vcmp.eq.s32.totalorder %v6632_v6, 2 }
 0x2c9   :  { %vm2766_vm0 = vcmp.eq.s32.totalorder %v6635_v8, 0  ;;  %vm2769_vm7 = vcmp.eq.s32.totalorder %v6635_v8, 2  ;;  %v3649_v41 = vmul.f32 %v6636_v53, %v3514_v51  ;;  %v3809_v4 = vmul.f32 %v3777_v9, %v3514_v51  ;;  %v4183_v6 = vld [vmem:[%s6353_s3 + $0x50] sm:$0xff] }
 0x2ca   :  { %v1110_v33 = vsel %vm1108_vm12, %v6634_v60, %v1109_v5  ;;  %v1113_v28 = vsel %vm1111_vm4, %v1112_v31, %v6633_v59  ;;  %vm2765_vm2 = vcmp.lt.s32.totalorder %v6635_v8, 2  ;;  %v2768_v56 = vsel %vm2766_vm0, %v6634_v60, %v1109_v5  ;;  %v6647_v8 = vld [vmem:[#allocation24_spill] sm:$0xff] }
 0x2cb   :  { %v1114_v29 = vsel %vm1107_vm3, %v1110_v33, %v1113_v28  ;;  %v2771_v22 = vsel %vm2769_vm7, %v1112_v31, %v6633_v59  ;;  %v3665_v38 = vadd.f32 %v3649_v41, %v3633_v3  ;;  %v3825_v14 = vadd.f32 %v3809_v4, %v3793_v23  ;;  %v6643_v3 = vld [vmem:[#allocation61_spill] sm:$0xff]  ;;  %v6646_v31 = vld [vmem:[#allocation79_spill] sm:$0xff]  ;;  %v3764_v28 = vpop.permute.xlu0 %3763 }
 0x2cc   :  { %v1115_v48 = vsel %vm1105_vm15, nan, %v1114_v29  ;;  %v2772_v58 = vsel %vm2765_vm2, %v2768_v56, %v2771_v22  ;;  %v3779_v7 = vsel %vm3610_vm1, %v5996_v36, %v3756_v35  ;;  %vm1311_vm6 = vweird.f32 %v6637_v57  ;;  %v6642_v36 = vld [vmem:[#allocation21_spill] sm:$0xff] }
 0x2cd   :  { %v2773_v42 = vsel %vm1105_vm15, nan, %v2772_v58  ;;  %v3635_v43 = vmul.f32 %v4181_v25, %v1115_v48  ;;  %3681 = vst [vmem:[#allocation5 + $0x30] sm:$0xff] %v3665_v38  ;;  %3841 = vst [vmem:[#allocation6 + $0x30] sm:$0xff] %v3825_v14  ;;  %v3795_v24 = vmul.f32 %v4182_v52, %v1115_v48  ;;  %vm1314_vm10 = vcmp.eq.s32.totalorder %v6638_v54, 0  ;;  %v4184_v59 = vld [vmem:[#allocation2 + $0x50] sm:$0xff]  ;;  %v6648_v14 = vld [vmem:[#allocation30_spill] sm:$0xff] }
 0x2ce   :  { %v3516_v18 = vmul.f32 %v4753_v32, %v2773_v42  ;;  %v1315_v13 = vxor.u32 2147483648, %v6639_v27  ;;  %vm1317_vm13 = vcmp.eq.s32.totalorder %v6638_v54, 2  ;;  %v1318_v61 = vxor.u32 2147483648, %v6640_v62  ;;  %v6649_v48 = vld [vmem:[#allocation12_spill] sm:$0xff] }
 0x2cf   :  { %vm2974_vm8 = vcmp.eq.s32.totalorder %v6641_v2, 0  ;;  %vm2977_vm11 = vcmp.eq.s32.totalorder %v6641_v2, 2  ;;  %vm1313_vm5 = vcmp.lt.s32.totalorder %v6638_v54, 2  ;;  %vm2973_vm9 = vcmp.lt.s32.totalorder %v6641_v2, 2 }
 0x2d0   :  { %v3651_v34 = vmul.f32 %v6642_v36, %v3516_v18  ;;  %v3811_v30 = vmul.f32 %v3779_v7, %v3516_v18  ;;  %v1316_v0 = vsel %vm1314_vm10, %v6640_v62, %v1315_v13  ;;  %v2976_v49 = vsel %vm2974_vm8, %v6640_v62, %v1315_v13  ;;  %v4185_v18 = vld [vmem:[%s6353_s3 + $0x60] sm:$0xff]  ;;  %v3768_v36 = vpop.permute.xlu0 %3767 }
 0x2d1   :  { %v1319_v12 = vsel %vm1317_vm13, %v1318_v61, %v6639_v27  ;;  %v2979_v55 = vsel %vm2977_vm11, %v1318_v61, %v6639_v27  ;;  %v3781_v17 = vsel %vm3610_vm1, %v6026_v21, %v3760_v16  ;;  %vm1517_vm14 = vweird.f32 %v6643_v3  ;;  %v6645_v21 = vld [vmem:[#allocation83_spill] sm:$0xff] }
 0x2d2   :  { %v3667_v9 = vadd.f32 %v3651_v34, %v3635_v43  ;;  %v3827_v63 = vadd.f32 %v3811_v30, %v3795_v24  ;;  %v1320_v20 = vsel %vm1313_vm5, %v1316_v0, %v1319_v12  ;;  %v2980_v45 = vsel %vm2973_vm9, %v2976_v49, %v2979_v55  ;;  %v4186_v24 = vld [vmem:[#allocation2 + $0x60] sm:$0xff] }
 0x2d3   :  { %v1321_v26 = vsel %vm1311_vm6, nan, %v1320_v20  ;;  %v2981_v1 = vsel %vm1311_vm6, nan, %v2980_v45  ;;  %vm1520_vm15 = vcmp.eq.s32.totalorder %v6644_v47, 0  ;;  %v1521_v23 = vxor.u32 2147483648, %v5804_v40  ;;  %v4188_v45 = vld [vmem:[#allocation2 + $0x70] sm:$0xff] }
 0x2d4   :  { %3683 = vst [vmem:[#allocation5 + $0x40] sm:$0xff] %v3667_v9  ;;  %3843 = vst [vmem:[#allocation6 + $0x40] sm:$0xff] %v3827_v63  ;;  %v3518_v46 = vmul.f32 %v4753_v32, %v2981_v1  ;;  %v3637_v51 = vmul.f32 %v4183_v6, %v1321_v26  ;;  %v3797_v5 = vmul.f32 %v4184_v59, %v1321_v26  ;;  %vm1523_vm3 = vcmp.eq.s32.totalorder %v6644_v47, 2  ;;  %v6651_v63 = vld [vmem:[#allocation13_spill] sm:$0xff] }
 0x2d5   :  { %v1524_v60 = vxor.u32 2147483648, %v6645_v21  ;;  %vm3182_vm12 = vcmp.eq.s32.totalorder %v6646_v31, 0  ;;  %v1522_v4 = vsel %vm1520_vm15, %v6645_v21, %v1521_v23  ;;  %vm1519_vm4 = vcmp.lt.s32.totalorder %v6644_v47, 2 }
 0x2d6   :  { %v3653_v53 = vmul.f32 %v6647_v8, %v3518_v46  ;;  %v3813_v41 = vmul.f32 %v3781_v17, %v3518_v46  ;;  %v3184_v33 = vsel %vm3182_vm12, %v6645_v21, %v1521_v23  ;;  %vm3181_vm0 = vcmp.lt.s32.totalorder %v6646_v31, 2 }
 0x2d7   :  { %v1525_v35 = vsel %vm1523_vm3, %v1524_v60, %v5804_v40  ;;  %vm3185_vm7 = vcmp.eq.s32.totalorder %v6646_v31, 2  ;;  %v3623_v58 = vsel %vm3610_vm1, %v6649_v48, %v6648_v14  ;;  %v3783_v43 = vsel %vm3610_vm1, %v6054_v50, %v3764_v28 }
 0x2d8   :  { %v3669_v29 = vadd.f32 %v3653_v53, %v3637_v51  ;;  %v3829_v56 = vadd.f32 %v3813_v41, %v3797_v5  ;;  %v1526_v22 = vsel %vm1519_vm4, %v1522_v4, %v1525_v35  ;;  %v3187_v38 = vsel %vm3185_vm7, %v1524_v60, %v5804_v40 }
 0x2d9   :  { %v1527_v42 = vsel %vm1517_vm14, nan, %v1526_v22  ;;  %v3188_v25 = vsel %vm3181_vm0, %v3184_v33, %v3187_v38  ;;  %vm1725_vm2 = vcmp.lt.s32.totalorder %v5842_v44, 2  ;;  %vm1726_vm6 = vcmp.eq.s32.totalorder %v5842_v44, 0 }
 0x2da   :  { %3685 = vst [vmem:[#allocation5 + $0x50] sm:$0xff] %v3669_v29  ;;  %3845 = vst [vmem:[#allocation6 + $0x50] sm:$0xff] %v3829_v56  ;;  %v3189_v7 = vsel %vm1517_vm14, nan, %v3188_v25  ;;  %v1727_v40 = vxor.u32 2147483648, %v6019_v11  ;;  %v3639_v52 = vmul.f32 %v4185_v18, %v1527_v42  ;;  %v3799_v50 = vmul.f32 %v4186_v24, %v1527_v42 }
 0x2db   :  { %v3520_v57 = vmul.f32 %v4753_v32, %v3189_v7  ;;  %v1730_v54 = vxor.u32 2147483648, %v6000_v39  ;;  %vm1729_vm10 = vcmp.eq.s32.totalorder %v5842_v44, 2  ;;  %vm3390_vm13 = vcmp.eq.s32.totalorder %v5860_v10, 0 }
 0x2dc   :  { %v1728_v27 = vsel %vm1726_vm6, %v6000_v39, %v1727_v40  ;;  %vm3393_vm8 = vcmp.eq.s32.totalorder %v5860_v10, 2  ;;  %v3392_v2 = vsel %vm3390_vm13, %v6000_v39, %v1727_v40  ;;  %vm3389_vm11 = vcmp.lt.s32.totalorder %v5860_v10, 2  ;;  %v6650_v39 = vld [vmem:[#allocation38_spill] sm:$0xff] }
 0x2dd   :  { %v3655_v13 = vmul.f32 %v3623_v58, %v3520_v57  ;;  %v3815_v62 = vmul.f32 %v3783_v43, %v3520_v57  ;;  %v1731_v61 = vsel %vm1729_vm10, %v1730_v54, %v6019_v11  ;;  %v3395_v30 = vsel %vm3393_vm8, %v1730_v54, %v6019_v11 }
 0x2de   :  { %v1732_v34 = vsel %vm1725_vm2, %v1728_v27, %v1731_v61  ;;  %vm1723_vm5 = vweird.f32 %v5555_v37  ;;  %v3396_v16 = vsel %vm3389_vm11, %v3392_v2, %v3395_v30  ;;  %v3785_v9 = vsel %vm3610_vm1, %v6082_v15, %v3768_v36  ;;  %v4187_v37 = vld [vmem:[%s6353_s3 + $0x70] sm:$0xff] }
 0x2df   :  { %v3671_v0 = vadd.f32 %v3655_v13, %v3639_v52  ;;  %v3831_v49 = vadd.f32 %v3815_v62, %v3799_v50  ;;  %v1733_v12 = vsel %vm1723_vm5, nan, %v1732_v34  ;;  %v3397_v55 = vsel %vm1723_vm5, nan, %v3396_v16 }
 0x2e0   :  { %v3522_v44 = vmul.f32 %v4753_v32, %v3397_v55  ;;  %v3625_v10 = vsel %vm3610_vm1, %v6651_v63, %v6650_v39  ;;  %v3641_v11 = vmul.f32 %v4187_v37, %v1733_v12  ;;  %v3801_v26 = vmul.f32 %v4188_v45, %v1733_v12 }
 0x2e1   :  { %3687 = vst [vmem:[#allocation5 + $0x60] sm:$0xff] %v3671_v0  ;;  %3847 = vst [vmem:[#allocation6 + $0x60] sm:$0xff] %v3831_v49 }
 0x2e2   :  { %v3657_v20 = vmul.f32 %v3625_v10, %v3522_v44  ;;  %v3817_v15 = vmul.f32 %v3785_v9, %v3522_v44 }
 0x2e4   :  { %v3673_v1 = vadd.f32 %v3657_v20, %v3641_v11  ;;  %v3833_v32 = vadd.f32 %v3817_v15, %v3801_v26 }
 0x2e6   :  { %3689 = vst [vmem:[#allocation5 + $0x70] sm:$0xff] %v3673_v1  ;;  %3849 = vst [vmem:[#allocation6 + $0x70] sm:$0xff] %v3833_v32 }
 0x2e7   :  { %4220 = shalt.err (!%p4217_p9)
}
 0x2e8   :  { %3862 = dma.vmem_to_hbm [thread:$0]  %s3857_s30, 2048, %s6355_s5, [#allocation4], %s4256_s24, %s4256_s24, %s4257_s25  }
 0x2e9   :  { %s4229_s12 = scalar_lea.vmem %s3869_s4, 2048  ;;  %p4234_p11 = scmp.lt.s32.totalorder %s3869_s4, %s3869_s4 }
 0x2ea   :  { %p4230_p10 = scmp.ne.s32.totalorder %s3869_s4, %s4229_s12  ;;  %p4235_p12 = scmp.lt.s32.totalorder %s4229_s12, %s4229_s12 }
 0x2ec   :  { %p4236_p13 = por %p4235_p12, %p4234_p11 }
 0x2ee   :  { %p4237_p0 = pnand %p4236_p13, %p4230_p10 }
 0x2f0   :  { %4240 = shalt.err (!%p4237_p0)
}
 0x2f1   :  { %3874 = dma.vmem_to_hbm [thread:$0]  %s3869_s4, 2048, %s6356_s6, [#allocation7], %s4256_s24, %s4256_s24, %s4257_s25  }
 0x2f2   :  { %4251 = dma.done.wait [#allocation4], 2048  }
 0x2f3   :  { %4252 = vsyncadd [#allocation4], 4294965248 }
 0x2f4   :  { %4253 = dma.done.wait [#allocation7], 2048  }
 0x2f5   :  { %4254 = vsyncadd [#allocation7], 4294965248 }
 0x2f6   :  { %3881 = vsyncpa [#allocation3], 1 }
 0x2f7   :  { %3882 = vsyncpa [#allocation4], 1 }
 0x2f8   :  { %3883 = vsyncpa [#allocation7], 1 }

</bundles_post_ra>
